<compile_context>
chip_gen: v5e
topology: v5e:2x2
jax: 0.10.0
libtpu: 0.0.40
codegen_flags: <defaults>
</compile_context>

<pallas_src>
import functools

import jax
import jax.numpy as jnp
from jax import lax
from jax.experimental import pallas as pl
from jax.experimental.pallas import tpu as pltpu

BN_EPS = 0.9          # nn.BatchNorm1d(n, 0.9) -> eps = 0.9 (positional-arg quirk)
LRELU_SLOPE = 0.2
HIDDEN_LAST = 1024    # width feeding the final Linear


def _round_up(x, m):
    return ((x + m - 1) // m) * m


def _physical_vmem_bytes():
    """Per-core physical VMEM, generation-aware fallback if get_tpu_info is unavailable."""
    try:
        return int(pltpu.get_tpu_info().vmem_capacity_bytes)
    except Exception:
        pass
    try:
        kind = jax.devices()[0].device_kind.lower()
    except Exception:
        kind = ""
    if ("v5" in kind) or ("v6" in kind):
        return 128 << 20   # v5e / v6e: 128 MiB VMEM per TensorCore
    return 64 << 20        # v7x (and unknown): 64 MiB per TensorCore


def _vmem_limit_bytes():
    """Scoped-VMEM budget: 48 MiB on v7x, up to 96 MiB on v5e/v6e."""
    cap = _physical_vmem_bytes()
    return min((cap * 3) // 4, 96 << 20)


def _choose_final_tile(n_pad, batch, vmem_limit):
    """Largest lane-aligned tile dividing n_pad whose pipelined buffers fit VMEM.

    Explicit accounting: 2x bf16 w5 tile (double buffer) + 2x f32 out tile +
    2x f32 b5 tile + resident bf16 h, with ~1/8 headroom for compiler scratch.
    """
    budget = (vmem_limit * 7) // 8
    h_bytes = batch * HIDDEN_LAST * 2
    for tn in (8192, 4096, 2048, 1024, 512, 384, 256, 128):
        if n_pad % tn != 0:
            continue
        w5_bytes = 2 * HIDDEN_LAST * tn * 2       # double-buffered bf16 weight tiles
        out_bytes = 2 * batch * tn * 4            # double-buffered f32 output tiles
        b5_bytes = 2 * tn * 4                     # double-buffered f32 bias tiles
        if w5_bytes + out_bytes + b5_bytes + h_bytes <= budget:
            return tn
    return 128


# --------------------------------------------------------------------------
# Kernel 1: layers 1-4 (small weights, fully VMEM resident, single invocation)
# --------------------------------------------------------------------------
def _mlp_body_kernel(
    z_ref,
    w1_ref, b1_ref,
    w2_ref, b2_ref, g2_ref, be2_ref,
    w3_ref, b3_ref, g3_ref, be3_ref,
    w4_ref, b4_ref, g4_ref, be4_ref,
    h_ref,
):
    def lrelu(x):
        return jnp.where(x > 0, x, LRELU_SLOPE * x)

    def linear(x, w_ref, b_ref):
        # bf16 operands into the MXU, f32 accumulation, f32 bias add.
        return jnp.dot(x.astype(jnp.bfloat16), w_ref[...],
                       preferred_element_type=jnp.float32) + b_ref[...]

    def batchnorm(x, g_ref, be_ref):
        # Training-mode BatchNorm1d: batch mean / biased batch variance (one pass).
        mu = jnp.mean(x, axis=0, keepdims=True)
        var = jnp.mean(x * x, axis=0, keepdims=True) - mu * mu
        return g_ref[...] * (x - mu) * lax.rsqrt(var + BN_EPS) + be_ref[...]

    h = lrelu(linear(z_ref[...], w1_ref, b1_ref))                       # (B, 128)
    h = lrelu(batchnorm(linear(h, w2_ref, b2_ref), g2_ref, be2_ref))    # (B, 256)
    h = lrelu(batchnorm(linear(h, w3_ref, b3_ref), g3_ref, be3_ref))    # (B, 512)
    h = lrelu(batchnorm(linear(h, w4_ref, b4_ref), g4_ref, be4_ref))    # (B, 1024)
    h_ref[...] = h.astype(h_ref.dtype)                                  # bf16 handoff


# --------------------------------------------------------------------------
# Kernel 2: final Linear + tanh, tiled over the output-feature axis
# --------------------------------------------------------------------------
def _final_layer_kernel(h_ref, w5_ref, b5_ref, out_ref):
    acc = jnp.dot(h_ref[...], w5_ref[...], preferred_element_type=jnp.float32)
    out_ref[...] = jnp.tanh(acc + b5_ref[...])


# --------------------------------------------------------------------------
# Parameter construction / one-time preparation (outside jit)
# --------------------------------------------------------------------------
def init_params(key, latent_dim, img_shape):
    """Deterministic synthetic parameters (PyTorch-like init, (in,out) layout, f32)."""
    c, h, w = img_shape
    out_dim = c * h * w
    dims = [latent_dim, 128, 256, 512, 1024, out_dim]
    keys = jax.random.split(key, 16)
    ki = iter(keys)

    def lin(in_d, out_d):
        scale = 1.0 / jnp.sqrt(jnp.float32(in_d))
        w_ = jax.random.uniform(next(ki), (in_d, out_d), jnp.float32, -scale, scale)
        b_ = jax.random.uniform(next(ki), (1, out_d), jnp.float32, -scale, scale)
        return w_, b_

    params = {}
    params["w1"], params["b1"] = lin(dims[0], dims[1])
    params["w2"], params["b2"] = lin(dims[1], dims[2])
    params["g2"] = jnp.ones((1, dims[2]), jnp.float32)
    params["be2"] = jnp.zeros((1, dims[2]), jnp.float32)
    params["w3"], params["b3"] = lin(dims[2], dims[3])
    params["g3"] = jnp.ones((1, dims[3]), jnp.float32)
    params["be3"] = jnp.zeros((1, dims[3]), jnp.float32)
    params["w4"], params["b4"] = lin(dims[3], dims[4])
    params["g4"] = jnp.ones((1, dims[4]), jnp.float32)
    params["be4"] = jnp.zeros((1, dims[4]), jnp.float32)
    params["w5"], params["b5"] = lin(dims[4], dims[5])
    return params


def prepare_params(params, latent_dim):
    """One-time (outside jit) bf16 conversion + lane padding of weights.

    This is the key perf fix: the ~768 MiB (at real img_shape) f32 w5 is converted to
    bf16 and padded exactly once, so the jitted forward never re-reads / re-materializes
    it and the final-layer kernel streams the pre-stored bf16 copy directly.
    """
    bf16 = jnp.bfloat16
    prepped = {}

    # w1: pad the contraction (latent) dim 100 -> 128 so the first matmul K is aligned.
    k_pad = _round_up(latent_dim, 128)
    w1 = params["w1"].astype(bf16)
    if k_pad != latent_dim:
        w1 = jnp.pad(w1, ((0, k_pad - latent_dim), (0, 0)))
    prepped["w1"] = w1
    prepped["b1"] = params["b1"]

    for i in (2, 3, 4):
        prepped[f"w{i}"] = params[f"w{i}"].astype(bf16)
        prepped[f"b{i}"] = params[f"b{i}"]
        prepped[f"g{i}"] = params[f"g{i}"]
        prepped[f"be{i}"] = params[f"be{i}"]

    # w5 / b5: bf16 weight, lane-pad the output-feature axis to a multiple of 128.
    out_dim = params["w5"].shape[1]
    n_pad = _round_up(out_dim, 128)
    w5 = params["w5"].astype(bf16)
    b5 = params["b5"]
    if n_pad != out_dim:
        w5 = jnp.pad(w5, ((0, 0), (0, n_pad - out_dim)))
        b5 = jnp.pad(b5, ((0, 0), (0, n_pad - out_dim)))
    prepped["w5"] = w5
    prepped["b5"] = b5
    prepped = jax.device_put(prepped)
    jax.block_until_ready(prepped)
    return prepped


# --------------------------------------------------------------------------
# Forward
# --------------------------------------------------------------------------
@functools.partial(jax.jit, static_argnames=("img_shape",))
def generator_forward(z, prepped, img_shape):
    b = z.shape[0]
    c, hgt, wid = img_shape
    out_dim = c * hgt * wid
    bf16 = jnp.bfloat16

    vmem_limit = _vmem_limit_bytes()
    vmem_spec = pl.BlockSpec(memory_space=pltpu.MemorySpace.VMEM)

    # Pad the latent activation (cheap: B x 100 -> B x 128) to match the padded w1.
    lat = z.shape[1]
    k_pad = prepped["w1"].shape[0]
    z_p = jnp.pad(z, ((0, 0), (0, k_pad - lat))) if k_pad != lat else z

    # ------------------------- call 1: layers 1-4 -------------------------
    args1 = (
        z_p,
        prepped["w1"], prepped["b1"],
        prepped["w2"], prepped["b2"], prepped["g2"], prepped["be2"],
        prepped["w3"], prepped["b3"], prepped["g3"], prepped["be3"],
        prepped["w4"], prepped["b4"], prepped["g4"], prepped["be4"],
    )
    h = pl.pallas_call(
        _mlp_body_kernel,
        out_shape=jax.ShapeDtypeStruct((b, HIDDEN_LAST), bf16),
        in_specs=[vmem_spec] * len(args1),
        out_specs=vmem_spec,
        compiler_params=pltpu.CompilerParams(vmem_limit_bytes=vmem_limit),
    )(*args1)

    # --------------- call 2: final Linear + tanh, tiled over N -------------
    w5 = prepped["w5"]   # bf16, already padded
    b5 = prepped["b5"]   # f32, already padded
    n_pad = w5.shape[1]

    tn = _choose_final_tile(n_pad, b, vmem_limit)
    grid = (n_pad // tn,)

    cost = pl.CostEstimate(
        flops=2 * b * HIDDEN_LAST * n_pad,
        transcendentals=b * n_pad,
        bytes_accessed=(HIDDEN_LAST * n_pad * 2      # w5 (bf16) stream
                        + b * n_pad * 4              # output (f32)
                        + b * HIDDEN_LAST * 2        # h (bf16)
                        + n_pad * 4),                # b5 (f32)
    )

    flat = pl.pallas_call(
        _final_layer_kernel,
        out_shape=jax.ShapeDtypeStruct((b, n_pad), jnp.float32),
        grid=grid,
        in_specs=[
            pl.BlockSpec((b, HIDDEN_LAST), lambda j: (0, 0)),   # h: resident every step
            pl.BlockSpec((HIDDEN_LAST, tn), lambda j: (0, j)),  # w5: streamed bf16 tiles
            pl.BlockSpec((1, tn), lambda j: (0, j)),            # b5 tile
        ],
        out_specs=pl.BlockSpec((b, tn), lambda j: (0, j)),
        compiler_params=pltpu.CompilerParams(
            dimension_semantics=("parallel",),   # shards w5 streaming across v7x's 2 TCs
            vmem_limit_bytes=vmem_limit,
        ),
        cost_estimate=cost,
    )(h, w5, b5)

    if n_pad != out_dim:
        flat = flat[:, :out_dim]

    # PyTorch: img = img.view(B, C, H, W)  (NCHW)
    return flat.reshape(b, c, hgt, wid)


# --------------------------------------------------------------------------
# Pure-JAX reference (mirrors the kernel math: bf16 MXU operands, f32 accum)
# --------------------------------------------------------------------------
def generator_reference(z, params):
    bf16 = jnp.bfloat16

    def lrelu(x):
        return jnp.where(x > 0, x, LRELU_SLOPE * x)

    def dot(x, w):
        return jnp.dot(x.astype(bf16), w.astype(bf16), preferred_element_type=jnp.float32)

    def bn(x, g, be):
        mu = jnp.mean(x, axis=0, keepdims=True)
        var = jnp.mean(x * x, axis=0, keepdims=True) - mu * mu
        return g * (x - mu) * lax.rsqrt(var + BN_EPS) + be

    h = lrelu(dot(z, params["w1"]) + params["b1"])
    h = lrelu(bn(dot(h, params["w2"]) + params["b2"], params["g2"], params["be2"]))
    h = lrelu(bn(dot(h, params["w3"]) + params["b3"], params["g3"], params["be3"]))
    h = lrelu(bn(dot(h, params["w4"]) + params["b4"], params["g4"], params["be4"]))
    h = h.astype(bf16)   # mirrors the bf16 handoff between the two pallas_calls
    return jnp.tanh(jnp.dot(h, params["w5"].astype(bf16),
                            preferred_element_type=jnp.float32) + params["b5"])


if __name__ == "__main__":
    # Module-consistent small shapes: latent_dim=100 as in the module, img_shape scaled
    # down from (3,256,256) to (3,16,16); batch=8 (sublane multiple).
    LATENT_DIM = 100
    IMG_SHAPE = (3, 16, 16)
    BATCH = 8

    key = jax.random.PRNGKey(0)
    kz, kp = jax.random.split(key)
    z = jax.random.normal(kz, (BATCH, LATENT_DIM), jnp.float32)
    params = init_params(kp, LATENT_DIM, IMG_SHAPE)
    prepped = prepare_params(params, LATENT_DIM)   # one-time bf16 convert + pad

    img = generator_forward(z, prepped, IMG_SHAPE)
    jax.block_until_ready(img)

    assert img.shape == (BATCH,) + IMG_SHAPE, img.shape

    ref = generator_reference(z, params).reshape(BATCH, *IMG_SHAPE)
    max_err = float(jnp.max(jnp.abs(img - ref)))
    if not jnp.allclose(img, ref, atol=5e-3, rtol=5e-3):
        raise AssertionError(f"Pallas kernel mismatch vs JAX reference (max abs err {max_err})")

    print("KERNEL_OK")
</pallas_src>

<mosaic_0001>
module attributes {stable_mosaic.version = 11 : i64} {
  func.func @_mlp_body_kernel(%arg0: memref<8x128xf32, #tpu.memory_space<vmem>>, %arg1: memref<128x128xbf16, #tpu.memory_space<vmem>>, %arg2: memref<1x128xf32, #tpu.memory_space<vmem>>, %arg3: memref<128x256xbf16, #tpu.memory_space<vmem>>, %arg4: memref<1x256xf32, #tpu.memory_space<vmem>>, %arg5: memref<1x256xf32, #tpu.memory_space<vmem>>, %arg6: memref<1x256xf32, #tpu.memory_space<vmem>>, %arg7: memref<256x512xbf16, #tpu.memory_space<vmem>>, %arg8: memref<1x512xf32, #tpu.memory_space<vmem>>, %arg9: memref<1x512xf32, #tpu.memory_space<vmem>>, %arg10: memref<1x512xf32, #tpu.memory_space<vmem>>, %arg11: memref<512x1024xbf16, #tpu.memory_space<vmem>>, %arg12: memref<1x1024xf32, #tpu.memory_space<vmem>>, %arg13: memref<1x1024xf32, #tpu.memory_space<vmem>>, %arg14: memref<1x1024xf32, #tpu.memory_space<vmem>>, %arg15: memref<8x1024xbf16, #tpu.memory_space<vmem>>) attributes {dimension_semantics = [], scalar_prefetch = 0 : i64, scratch_operands = 0 : i64, tpu.core_type = #tpu.core_type<tc>} {
    %c0 = arith.constant 0 : index
    %c0_0 = arith.constant 0 : index
    %0 = vector.load %arg0[%c0, %c0_0] : memref<8x128xf32, #tpu.memory_space<vmem>>, vector<8x128xf32>
    %1 = arith.truncf %0 : vector<8x128xf32> to vector<8x128xbf16>
    %c0_1 = arith.constant 0 : index
    %c0_2 = arith.constant 0 : index
    %2 = vector.load %arg1[%c0_1, %c0_2] : memref<128x128xbf16, #tpu.memory_space<vmem>>, vector<128x128xbf16>
    %cst = arith.constant dense<0.000000e+00> : vector<8x128xf32>
    %3 = tpu.matmul %1, %2, %cst {dimension_numbers = #tpu.dot_dimension_numbers<[1], [0], [0], [1], [0, 0, 1, 1], [], []>} : vector<8x128xbf16>, vector<128x128xbf16>, vector<8x128xf32> -> vector<8x128xf32>
    %c0_3 = arith.constant 0 : index
    %c0_4 = arith.constant 0 : index
    %4 = vector.load %arg2[%c0_3, %c0_4] : memref<1x128xf32, #tpu.memory_space<vmem>>, vector<1x128xf32>
    %5 = vector.broadcast %4 : vector<1x128xf32> to vector<8x128xf32>
    %6 = arith.addf %3, %5 : vector<8x128xf32>
    %cst_5 = arith.constant 0.000000e+00 : f32
    %7 = vector.broadcast %cst_5 : f32 to vector<8x128xf32>
    %8 = arith.cmpf ogt, %6, %7 : vector<8x128xf32>
    %cst_6 = arith.constant 2.000000e-01 : f32
    %9 = vector.broadcast %cst_6 : f32 to vector<8x128xf32>
    %10 = arith.mulf %9, %6 : vector<8x128xf32>
    %11 = arith.select %8, %6, %10 : vector<8x128xi1>, vector<8x128xf32>
    %12 = arith.truncf %11 : vector<8x128xf32> to vector<8x128xbf16>
    %c0_7 = arith.constant 0 : index
    %c0_8 = arith.constant 0 : index
    %13 = vector.load %arg3[%c0_7, %c0_8] : memref<128x256xbf16, #tpu.memory_space<vmem>>, vector<128x256xbf16>
    %cst_9 = arith.constant dense<0.000000e+00> : vector<8x256xf32>
    %14 = tpu.matmul %12, %13, %cst_9 {dimension_numbers = #tpu.dot_dimension_numbers<[1], [0], [0], [1], [0, 0, 1, 1], [], []>} : vector<8x128xbf16>, vector<128x256xbf16>, vector<8x256xf32> -> vector<8x256xf32>
    %c0_10 = arith.constant 0 : index
    %c0_11 = arith.constant 0 : index
    %15 = vector.load %arg4[%c0_10, %c0_11] : memref<1x256xf32, #tpu.memory_space<vmem>>, vector<1x256xf32>
    %16 = vector.broadcast %15 : vector<1x256xf32> to vector<8x256xf32>
    %17 = arith.addf %14, %16 : vector<8x256xf32>
    %cst_12 = arith.constant dense<0.000000e+00> : vector<256xf32>
    %18 = vector.multi_reduction <add>, %17, %cst_12 [0] : vector<8x256xf32> to vector<256xf32>
    %19 = vector.shape_cast %18 : vector<256xf32> to vector<1x256xf32>
    %cst_13 = arith.constant 8.000000e+00 : f32
    %20 = vector.broadcast %cst_13 : f32 to vector<1x256xf32>
    %21 = arith.divf %19, %20 : vector<1x256xf32>
    %22 = arith.mulf %17, %17 : vector<8x256xf32>
    %cst_14 = arith.constant dense<0.000000e+00> : vector<256xf32>
    %23 = vector.multi_reduction <add>, %22, %cst_14 [0] : vector<8x256xf32> to vector<256xf32>
    %24 = vector.shape_cast %23 : vector<256xf32> to vector<1x256xf32>
    %cst_15 = arith.constant 8.000000e+00 : f32
    %25 = vector.broadcast %cst_15 : f32 to vector<1x256xf32>
    %26 = arith.divf %24, %25 : vector<1x256xf32>
    %27 = arith.mulf %21, %21 : vector<1x256xf32>
    %28 = arith.subf %26, %27 : vector<1x256xf32>
    %c0_16 = arith.constant 0 : index
    %c0_17 = arith.constant 0 : index
    %29 = vector.load %arg5[%c0_16, %c0_17] : memref<1x256xf32, #tpu.memory_space<vmem>>, vector<1x256xf32>
    %30 = vector.broadcast %21 : vector<1x256xf32> to vector<8x256xf32>
    %31 = arith.subf %17, %30 : vector<8x256xf32>
    %32 = vector.broadcast %29 : vector<1x256xf32> to vector<8x256xf32>
    %33 = arith.mulf %32, %31 : vector<8x256xf32>
    %cst_18 = arith.constant 0.899999976 : f32
    %34 = vector.broadcast %cst_18 : f32 to vector<1x256xf32>
    %35 = arith.addf %28, %34 : vector<1x256xf32>
    %36 = math.rsqrt %35 : vector<1x256xf32>
    %37 = vector.broadcast %36 : vector<1x256xf32> to vector<8x256xf32>
    %38 = arith.mulf %33, %37 : vector<8x256xf32>
    %c0_19 = arith.constant 0 : index
    %c0_20 = arith.constant 0 : index
    %39 = vector.load %arg6[%c0_19, %c0_20] : memref<1x256xf32, #tpu.memory_space<vmem>>, vector<1x256xf32>
    %40 = vector.broadcast %39 : vector<1x256xf32> to vector<8x256xf32>
    %41 = arith.addf %38, %40 : vector<8x256xf32>
    %cst_21 = arith.constant 0.000000e+00 : f32
    %42 = vector.broadcast %cst_21 : f32 to vector<8x256xf32>
    %43 = arith.cmpf ogt, %41, %42 : vector<8x256xf32>
    %cst_22 = arith.constant 2.000000e-01 : f32
    %44 = vector.broadcast %cst_22 : f32 to vector<8x256xf32>
    %45 = arith.mulf %44, %41 : vector<8x256xf32>
    %46 = arith.select %43, %41, %45 : vector<8x256xi1>, vector<8x256xf32>
    %47 = arith.truncf %46 : vector<8x256xf32> to vector<8x256xbf16>
    %c0_23 = arith.constant 0 : index
    %c0_24 = arith.constant 0 : index
    %48 = vector.load %arg7[%c0_23, %c0_24] : memref<256x512xbf16, #tpu.memory_space<vmem>>, vector<256x512xbf16>
    %cst_25 = arith.constant dense<0.000000e+00> : vector<8x512xf32>
    %49 = tpu.matmul %47, %48, %cst_25 {dimension_numbers = #tpu.dot_dimension_numbers<[1], [0], [0], [1], [0, 0, 1, 1], [], []>} : vector<8x256xbf16>, vector<256x512xbf16>, vector<8x512xf32> -> vector<8x512xf32>
    %c0_26 = arith.constant 0 : index
    %c0_27 = arith.constant 0 : index
    %50 = vector.load %arg8[%c0_26, %c0_27] : memref<1x512xf32, #tpu.memory_space<vmem>>, vector<1x512xf32>
    %51 = vector.broadcast %50 : vector<1x512xf32> to vector<8x512xf32>
    %52 = arith.addf %49, %51 : vector<8x512xf32>
    %cst_28 = arith.constant dense<0.000000e+00> : vector<512xf32>
    %53 = vector.multi_reduction <add>, %52, %cst_28 [0] : vector<8x512xf32> to vector<512xf32>
    %54 = vector.shape_cast %53 : vector<512xf32> to vector<1x512xf32>
    %cst_29 = arith.constant 8.000000e+00 : f32
    %55 = vector.broadcast %cst_29 : f32 to vector<1x512xf32>
    %56 = arith.divf %54, %55 : vector<1x512xf32>
    %57 = arith.mulf %52, %52 : vector<8x512xf32>
    %cst_30 = arith.constant dense<0.000000e+00> : vector<512xf32>
    %58 = vector.multi_reduction <add>, %57, %cst_30 [0] : vector<8x512xf32> to vector<512xf32>
    %59 = vector.shape_cast %58 : vector<512xf32> to vector<1x512xf32>
    %cst_31 = arith.constant 8.000000e+00 : f32
    %60 = vector.broadcast %cst_31 : f32 to vector<1x512xf32>
    %61 = arith.divf %59, %60 : vector<1x512xf32>
    %62 = arith.mulf %56, %56 : vector<1x512xf32>
    %63 = arith.subf %61, %62 : vector<1x512xf32>
    %c0_32 = arith.constant 0 : index
    %c0_33 = arith.constant 0 : index
    %64 = vector.load %arg9[%c0_32, %c0_33] : memref<1x512xf32, #tpu.memory_space<vmem>>, vector<1x512xf32>
    %65 = vector.broadcast %56 : vector<1x512xf32> to vector<8x512xf32>
    %66 = arith.subf %52, %65 : vector<8x512xf32>
    %67 = vector.broadcast %64 : vector<1x512xf32> to vector<8x512xf32>
    %68 = arith.mulf %67, %66 : vector<8x512xf32>
    %cst_34 = arith.constant 0.899999976 : f32
    %69 = vector.broadcast %cst_34 : f32 to vector<1x512xf32>
    %70 = arith.addf %63, %69 : vector<1x512xf32>
    %71 = math.rsqrt %70 : vector<1x512xf32>
    %72 = vector.broadcast %71 : vector<1x512xf32> to vector<8x512xf32>
    %73 = arith.mulf %68, %72 : vector<8x512xf32>
    %c0_35 = arith.constant 0 : index
    %c0_36 = arith.constant 0 : index
    %74 = vector.load %arg10[%c0_35, %c0_36] : memref<1x512xf32, #tpu.memory_space<vmem>>, vector<1x512xf32>
    %75 = vector.broadcast %74 : vector<1x512xf32> to vector<8x512xf32>
    %76 = arith.addf %73, %75 : vector<8x512xf32>
    %cst_37 = arith.constant 0.000000e+00 : f32
    %77 = vector.broadcast %cst_37 : f32 to vector<8x512xf32>
    %78 = arith.cmpf ogt, %76, %77 : vector<8x512xf32>
    %cst_38 = arith.constant 2.000000e-01 : f32
    %79 = vector.broadcast %cst_38 : f32 to vector<8x512xf32>
    %80 = arith.mulf %79, %76 : vector<8x512xf32>
    %81 = arith.select %78, %76, %80 : vector<8x512xi1>, vector<8x512xf32>
    %82 = arith.truncf %81 : vector<8x512xf32> to vector<8x512xbf16>
    %c0_39 = arith.constant 0 : index
    %c0_40 = arith.constant 0 : index
    %83 = vector.load %arg11[%c0_39, %c0_40] : memref<512x1024xbf16, #tpu.memory_space<vmem>>, vector<512x1024xbf16>
    %cst_41 = arith.constant dense<0.000000e+00> : vector<8x1024xf32>
    %84 = tpu.matmul %82, %83, %cst_41 {dimension_numbers = #tpu.dot_dimension_numbers<[1], [0], [0], [1], [0, 0, 1, 1], [], []>} : vector<8x512xbf16>, vector<512x1024xbf16>, vector<8x1024xf32> -> vector<8x1024xf32>
    %c0_42 = arith.constant 0 : index
    %c0_43 = arith.constant 0 : index
    %85 = vector.load %arg12[%c0_42, %c0_43] : memref<1x1024xf32, #tpu.memory_space<vmem>>, vector<1x1024xf32>
    %86 = vector.broadcast %85 : vector<1x1024xf32> to vector<8x1024xf32>
    %87 = arith.addf %84, %86 : vector<8x1024xf32>
    %cst_44 = arith.constant dense<0.000000e+00> : vector<1024xf32>
    %88 = vector.multi_reduction <add>, %87, %cst_44 [0] : vector<8x1024xf32> to vector<1024xf32>
    %89 = vector.shape_cast %88 : vector<1024xf32> to vector<1x1024xf32>
    %cst_45 = arith.constant 8.000000e+00 : f32
    %90 = vector.broadcast %cst_45 : f32 to vector<1x1024xf32>
    %91 = arith.divf %89, %90 : vector<1x1024xf32>
    %92 = arith.mulf %87, %87 : vector<8x1024xf32>
    %cst_46 = arith.constant dense<0.000000e+00> : vector<1024xf32>
    %93 = vector.multi_reduction <add>, %92, %cst_46 [0] : vector<8x1024xf32> to vector<1024xf32>
    %94 = vector.shape_cast %93 : vector<1024xf32> to vector<1x1024xf32>
    %cst_47 = arith.constant 8.000000e+00 : f32
    %95 = vector.broadcast %cst_47 : f32 to vector<1x1024xf32>
    %96 = arith.divf %94, %95 : vector<1x1024xf32>
    %97 = arith.mulf %91, %91 : vector<1x1024xf32>
    %98 = arith.subf %96, %97 : vector<1x1024xf32>
    %c0_48 = arith.constant 0 : index
    %c0_49 = arith.constant 0 : index
    %99 = vector.load %arg13[%c0_48, %c0_49] : memref<1x1024xf32, #tpu.memory_space<vmem>>, vector<1x1024xf32>
    %100 = vector.broadcast %91 : vector<1x1024xf32> to vector<8x1024xf32>
    %101 = arith.subf %87, %100 : vector<8x1024xf32>
    %102 = vector.broadcast %99 : vector<1x1024xf32> to vector<8x1024xf32>
    %103 = arith.mulf %102, %101 : vector<8x1024xf32>
    %cst_50 = arith.constant 0.899999976 : f32
    %104 = vector.broadcast %cst_50 : f32 to vector<1x1024xf32>
    %105 = arith.addf %98, %104 : vector<1x1024xf32>
    %106 = math.rsqrt %105 : vector<1x1024xf32>
    %107 = vector.broadcast %106 : vector<1x1024xf32> to vector<8x1024xf32>
    %108 = arith.mulf %103, %107 : vector<8x1024xf32>
    %c0_51 = arith.constant 0 : index
    %c0_52 = arith.constant 0 : index
    %109 = vector.load %arg14[%c0_51, %c0_52] : memref<1x1024xf32, #tpu.memory_space<vmem>>, vector<1x1024xf32>
    %110 = vector.broadcast %109 : vector<1x1024xf32> to vector<8x1024xf32>
    %111 = arith.addf %108, %110 : vector<8x1024xf32>
    %cst_53 = arith.constant 0.000000e+00 : f32
    %112 = vector.broadcast %cst_53 : f32 to vector<8x1024xf32>
    %113 = arith.cmpf ogt, %111, %112 : vector<8x1024xf32>
    %cst_54 = arith.constant 2.000000e-01 : f32
    %114 = vector.broadcast %cst_54 : f32 to vector<8x1024xf32>
    %115 = arith.mulf %114, %111 : vector<8x1024xf32>
    %116 = arith.select %113, %111, %115 : vector<8x1024xi1>, vector<8x1024xf32>
    %117 = arith.truncf %116 : vector<8x1024xf32> to vector<8x1024xbf16>
    %c0_55 = arith.constant 0 : index
    %c0_56 = arith.constant 0 : index
    %118 = vector.load %arg15[%c0_55, %c0_56] : memref<8x1024xbf16, #tpu.memory_space<vmem>>, vector<8x1024xbf16>
    tpu.vector_store %arg15[%c0_55, %c0_56], %117 {strides = array<i32>} : memref<8x1024xbf16, #tpu.memory_space<vmem>>, vector<8x1024xbf16>,
    return
  }
}

module attributes {stable_mosaic.version = 11 : i64} {
  func.func @_final_layer_kernel(%arg0: i32, %arg1: memref<8x1024xbf16, #tpu.memory_space<vmem>>, %arg2: memref<1024x384xbf16, #tpu.memory_space<vmem>>, %arg3: memref<1x384xf32, #tpu.memory_space<vmem>>, %arg4: memref<8x384xf32, #tpu.memory_space<vmem>>) attributes {dimension_semantics = [#tpu.dimension_semantics<parallel>], iteration_bounds = array<i64: 2>, scalar_prefetch = 0 : i64, scratch_operands = 0 : i64, tpu.core_type = #tpu.core_type<tc>, window_params = [{pipeline_mode = #tpu.pipeline_mode<synchronous>, transform_indices = @transform_0, window_bounds = array<i64: 8, 1024>}, {transform_indices = @transform_1, window_bounds = array<i64: 1024, 384>}, {transform_indices = @transform_2, window_bounds = array<i64: 1, 384>}, {transform_indices = @transform_3, window_bounds = array<i64: 8, 384>}]} {
    %c0 = arith.constant 0 : index
    %c0_0 = arith.constant 0 : index
    %0 = vector.load %arg1[%c0, %c0_0] : memref<8x1024xbf16, #tpu.memory_space<vmem>>, vector<8x1024xbf16>
    %c0_1 = arith.constant 0 : index
    %c0_2 = arith.constant 0 : index
    %1 = vector.load %arg2[%c0_1, %c0_2] : memref<1024x384xbf16, #tpu.memory_space<vmem>>, vector<1024x384xbf16>
    %cst = arith.constant dense<0.000000e+00> : vector<8x384xf32>
    %2 = tpu.matmul %0, %1, %cst {dimension_numbers = #tpu.dot_dimension_numbers<[1], [0], [0], [1], [0, 0, 1, 1], [], []>} : vector<8x1024xbf16>, vector<1024x384xbf16>, vector<8x384xf32> -> vector<8x384xf32>
    %c0_3 = arith.constant 0 : index
    %c0_4 = arith.constant 0 : index
    %3 = vector.load %arg3[%c0_3, %c0_4] : memref<1x384xf32, #tpu.memory_space<vmem>>, vector<1x384xf32>
    %4 = vector.broadcast %3 : vector<1x384xf32> to vector<8x384xf32>
    %5 = arith.addf %2, %4 : vector<8x384xf32>
    %6 = math.tanh %5 : vector<8x384xf32>
    %c0_5 = arith.constant 0 : index
    %c0_6 = arith.constant 0 : index
    %7 = vector.load %arg4[%c0_5, %c0_6] : memref<8x384xf32, #tpu.memory_space<vmem>>, vector<8x384xf32>
    tpu.vector_store %arg4[%c0_5, %c0_6], %6 {strides = array<i32>} : memref<8x384xf32, #tpu.memory_space<vmem>>, vector<8x384xf32>,
    return
  }
  func.func @transform_0(%arg0: i32) -> (i32, i32) {
    %c0_i32 = arith.constant 0 : i32
    %c0_i32_0 = arith.constant 0 : i32
    %c0_i32_1 = arith.constant 0 : i32
    return %c0_i32, %c0_i32_0 : i32, i32
  }
  func.func @transform_1(%arg0: i32) -> (i32, i32) {
    %c0_i32 = arith.constant 0 : i32
    %c0_i32_0 = arith.constant 0 : i32
    return %c0_i32, %arg0 : i32, i32
  }
  func.func @transform_2(%arg0: i32) -> (i32, i32) {
    %c0_i32 = arith.constant 0 : i32
    %c0_i32_0 = arith.constant 0 : i32
    return %c0_i32, %arg0 : i32, i32
  }
  func.func @transform_3(%arg0: i32) -> (i32, i32) {
    %c0_i32 = arith.constant 0 : i32
    %c0_i32_0 = arith.constant 0 : i32
    return %c0_i32, %arg0 : i32, i32
  }
}

</mosaic_0001>

<bundles_post_ra>
// kernel: generator_forward.3
= control target key start
LH: loop header
LB: loop body
LE: loop exit
PB: predicated region body
PF: predicated region fallthrough
CT: control target
= control target key end

     0   :  { %8 = vsyncpa [#allocation3], 0  ;;  %s3681_s0 = inlined_call_operand.vmem [shape: bf16[8,1024], index: 0, kind: input, shape index: {}]   ;;  %s3682_s1 = inlined_call_operand.hbm [shape: bf16[1024,768], index: 1, kind: input, shape index: {}]   ;;  %s3683_s2 = inlined_call_operand.hbm [shape: f32[1,768], index: 2, kind: input, shape index: {}]   ;;  %s3684_s3 = inlined_call_operand.vmem [shape: f32[8,768], index: 3, kind: output, shape index: {}]  }
   0x1   :  { %10 = vsyncpa [#allocation3 + $0x1], 0 }
   0x2   :  { %11 = vsyncpa [#allocation5], 0 }
   0x3   :  { %13 = vsyncpa [#allocation5 + $0x1], 0  ;;  %s3113_s12 = smov 0   ;;  %s3115_s13 = smov 0  }
   0x4   :  { %s3117_s14 = smov 0   ;;  %s3119_s15 = smov 0  }
   0x5 LB: > { %s1963_s16 = sadd.s32 4294967295, %s3088_s15   ;;  %s3133_s17 = sadd.s32 1, %s3088_s15   ;;  %s3088_s15 = sphi %s3119_s15, %s3691_s15   ;;  %s3084_s14 = sphi %s3117_s14, %s3690_s14   ;;  %s3080_s13 = sphi %s3115_s13, %s3689_s13   ;;  %s3076_s12 = sphi %s3113_s12, %s3688_s12  }
   0x6   : > { %s44_s18 = ssub.s32 %s3088_s15, %s3133_s17  ;;  %s47_s19 = sadd.s32 1, %s3084_s14 }
   0x7   : > { %p45_p0 = scmp.eq.s32.totalorder %s44_s18, 0  ;;  %p54_p1 = scmp.ne.s32.totalorder %s3084_s14, %s3080_s13 }
   0x8   : > { %p55_p2 = scmp.eq.s32.totalorder %s3088_s15, 0  ;;  %p60_p3 = scmp.ne.s32.totalorder %s3080_s13, %s3076_s12 }
   0x9   : > { %s3143_s20 = scalar_select %p45_p0, %s3084_s14, %s47_s19  }
   0xa   : > { %p56_p4 = por %p55_p2, %p54_p1  ;;  %p61_p5 = scmp.eq.s32.totalorder %s1963_s16, 0 }
   0xb   : > { %p2948_p6 = scmp.lt.s32.totalorder %s3088_s15, 2  ;;  %s3153_s22 = sand.u32 1, %s3084_s14  }
   0xc   : > { %p3148_p7 = por %p61_p5, %p60_p3  ;;  %s2933_s23 = smul.u32 1536, %s3153_s22 }
   0xd   : > { %s2740_s24 = smul.u32 12, %s3088_s15  ;;  %p3157_p8 = pnand %p2948_p6, %p56_p4 }
   0xe   : > { %s143_s29 = scalar_lea.vmem [#allocation2], %s2933_s23  ;;  %s140_s5 = scalar_lea.sflag [#allocation3], %s3153_s22 }
   0xf   : > { %s148_s28 = scalar_lea.hbm %s3682_s1, %s2740_s24  ;;  %s151_s30 = sshll.u32 %s143_s29, 4  ;;  %s152_s30 = int_to_ptr.vmem [resolvable:$true] %s151_s30 }
  0x10   : > { %s149_s4 = sshll.u32 %s148_s28, 4  ;;  %p2994_p10 = pneg %p3157_p8  ;;  %s150_s4 = int_to_ptr.hbm [resolvable:$true] %s149_s4 }
  0x11   : > { %s2990_s6 = sshra.s32 %s150_s4, 4  ;;  %s2997_s10 = scalar_lea.hbm %s3682_s1, 3072  ;;  %s2991_s6 = int_to_ptr.hbm [resolvable:$true] %s2990_s6 }
  0x12   : > { %s2992_s7 = scalar_lea.hbm %s2991_s6, 1536  ;;  %p2998_p13 = scmp.lt.s32.totalorder %s2991_s6, %s3682_s1 }
  0x13   : > { %p2993_p9 = scmp.ne.s32.totalorder %s2991_s6, %s2992_s7  ;;  %p2999_p0 = scmp.lt.s32.totalorder %s2997_s10, %s2992_s7 }
  0x15   : > { %p2995_p11 = pnand %p2994_p10, %p2993_p9  ;;  %p3000_p1 = por %p2999_p0, %p2998_p13 }
  0x17   : > { %p2996_p12 = pneg %p2995_p11 }
  0x19   : > { %p3001_p2 = pnand %p3000_p1, %p2996_p12 }
  0x1b   : > { %3004 = shalt.err (!%p3001_p2)
}
  0x1c   : > { %s3090_s18 = smov 384   ;;  %s3091_s19 = smov 192  }
  0x1d   : > { %s3092_s23 = smov 12   ;;  %p1968_p3 = scmp.ge.s32.totalorder %s3088_s15, 1 }
  0x1e   : > { %2944 = dma.hbm_to_vmem [thread:$0]  (!%p3157_p8), %s150_s4, 24576, %s152_s30, %s140_s5, %s3090_s18, %s3091_s19, %s3092_s23  }
  0x1f   : > { %p178_p4 = scmp.lt.s32.totalorder %s3088_s15, 3  ;;  %s2934_s24 = smul.u32 3, %s3153_s22 }
  0x20   : > { %s166_s27 = smul.u32 3, %s3088_s15  ;;  %s162_s10 = scalar_lea.sflag [#allocation5], %s3153_s22 }
  0x21   : > { %p3181_p5 = pnand %p1968_p3, %p178_p4  ;;  %s165_s7 = scalar_lea.vmem [#allocation4], %s2934_s24 }
  0x22   : > { %s169_s6 = scalar_lea.hbm %s3683_s2, %s166_s27  ;;  %s173_s8 = sshll.u32 %s165_s7, 4  ;;  %s174_s8 = int_to_ptr.vmem [resolvable:$true] %s173_s8 }
  0x23   : > { %s171_s9 = sshll.u32 %s169_s6, 4  ;;  %s3027_s12 = scalar_lea.hbm %s3683_s2, 6  ;;  %s172_s9 = int_to_ptr.hbm [resolvable:$true] %s171_s9 }
  0x24   : > { %s3020_s30 = sshra.s32 %s172_s9, 4  ;;  %s3021_s30 = int_to_ptr.hbm [resolvable:$true] %s3020_s30 }
  0x25   : > { %s3022_s4 = scalar_lea.hbm %s3021_s30, 3  ;;  %p3028_p12 = scmp.lt.s32.totalorder %s3021_s30, %s3683_s2 }
  0x26   : > { %p3023_p6 = scmp.ne.s32.totalorder %s3021_s30, %s3022_s4  ;;  %p3029_p13 = scmp.lt.s32.totalorder %s3027_s12, %s3022_s4 }
  0x28   : > { %p3025_p9 = pnand %p3023_p6, %p2994_p10  ;;  %p3030_p0 = por %p3029_p13, %p3028_p12 }
  0x2a   : > { %p3026_p11 = pneg %p3025_p9 }
  0x2c   : > { %p3031_p1 = pnand %p3030_p0, %p3026_p11 }
  0x2e   : > { %3034 = shalt.err (!%p3031_p1)
}
  0x2f   : > { %2947 = dma.hbm_to_vmem [thread:$0]  (!%p3157_p8), %s172_s9, 48, %s174_s8, %s162_s10  }
  0x30   : > { %182 = sbr.rel (%p3181_p5) target bundleno = 398 (0x18e), region = 32  ;;  %s184_s22 = sand.u32 (!%p3181_p5), 1, %s3080_s13  }
  0x31   : > { %s2935_s23 = smul.u32 (!%p3181_p5), 1536, %s184_s22  ;;  %s185_s24 = scalar_lea.sflag (!%p3181_p5), [#allocation3], %s184_s22 }
  0x33   : > { %s3204_s27 = scalar_lea.vmem (!%p3181_p5), [#allocation2], %s2935_s23 }
  0x35   : > { %3067 = dma.done.wait (%p3148_p7), %s185_s24, 24576  }
  0x36   : > { %3069 = vsyncadd (%p3148_p7), %s185_s24, 4294942720  ;;  %s2936_s28 = smul.u32 3, %s184_s22  ;;  %s195_s29 = scalar_lea.sflag [#allocation5], %s184_s22 }
  0x38   : > { %s3210_s25 = scalar_lea.vmem [#allocation4], %s2936_s28 }
  0x39   : > { %3071 = dma.done.wait (%p3148_p7), %s195_s29, 48  }
  0x3a   : > { %3073 = vsyncadd (%p3148_p7), %s195_s29, 4294967248  ;;  %v2056_v0 = vld [vmem:[%s3204_s27 + $0xa8] sm:$0xf]  ;;  %v2763_v1 = vld [vmem:[%s3204_s27 + $0xb0] sm:$0xf0]  ;;  %s229_s4 = smul.u32 3, %s1963_s16 }
  0x3b   : > { %v2152_v2 = vld [vmem:[%s3204_s27 + $0x168] sm:$0xf]  ;;  %v2057_v3 = vor.u32 %v2763_v1, %v2056_v0  ;;  %v2787_v4 = vld [vmem:[%s3204_s27 + $0x170] sm:$0xf0]  ;;  %v2044_v11 = vld [vmem:[%s3204_s27 + $0x90] sm:$0xf] }
  0x3c   : > { %v2248_v5 = vld [vmem:[%s3204_s27 + $0x228] sm:$0xf]  ;;  %v2811_v6 = vld [vmem:[%s3204_s27 + $0x230] sm:$0xf0]  ;;  %v2153_v7 = vor.u32 %v2787_v4, %v2152_v2  ;;  %v2760_v13 = vld [vmem:[%s3204_s27 + $0x98] sm:$0xf0] }
  0x3d   : > { %v2249_v8 = vor.u32 %v2811_v6, %v2248_v5  ;;  %v2344_v9 = vld [vmem:[%s3204_s27 + $0x2e8] sm:$0xf]  ;;  %v2835_v10 = vld [vmem:[%s3204_s27 + $0x2f0] sm:$0xf0]  ;;  %1555 = vmatpush.bf16.msra.mxu0 %v2057_v3  ;;  %v2140_v14 = vld [vmem:[%s3204_s27 + $0x150] sm:$0xf]  ;;  %v2045_v16 = vor.u32 %v2760_v13, %v2044_v11 }
  0x3e   : > { %v2345_v12 = vor.u32 %v2835_v10, %v2344_v9  ;;  %v2784_v15 = vld [vmem:[%s3204_s27 + $0x158] sm:$0xf0]  ;;  %1568 = vmatpush.bf16.msra.mxu1 %v2153_v7  ;;  %v2236_v18 = vld [vmem:[%s3204_s27 + $0x210] sm:$0xf]  ;;  %v2032_v23 = vld [vmem:[%s3204_s27 + $0x78] sm:$0xf] }
  0x3f   : > { %1581 = vmatpush.bf16.msra.mxu2 %v2249_v8  ;;  %v2141_v17 = vor.u32 %v2784_v15, %v2140_v14  ;;  %v2808_v19 = vld [vmem:[%s3204_s27 + $0x218] sm:$0xf0]  ;;  %v2332_v20 = vld [vmem:[%s3204_s27 + $0x2d0] sm:$0xf]  ;;  %v2757_v24 = vld [vmem:[%s3204_s27 + $0x80] sm:$0xf0] }
  0x40   : > { %1594 = vmatpush.bf16.msra.mxu3 %v2345_v12  ;;  %v2237_v21 = vor.u32 %v2808_v19, %v2236_v18  ;;  %v2832_v22 = vld [vmem:[%s3204_s27 + $0x2d8] sm:$0xf0]  ;;  %v2128_v26 = vld [vmem:[%s3204_s27 + $0x138] sm:$0xf]  ;;  %v2781_v27 = vld [vmem:[%s3204_s27 + $0x140] sm:$0xf0]  ;;  %v2033_v29 = vor.u32 %v2757_v24, %v2032_v23 }
  0x41   : > { %v2333_v25 = vor.u32 %v2832_v22, %v2332_v20  ;;  %v2224_v28 = vld [vmem:[%s3204_s27 + $0x1f8] sm:$0xf]  ;;  %1556 = vmatpush.bf16.msra.mxu0 %v2045_v16  ;;  %v2805_v30 = vld [vmem:[%s3204_s27 + $0x200] sm:$0xf0]  ;;  %v2129_v33 = vor.u32 %v2781_v27, %v2128_v26  ;;  %v2020_v35 = vld [vmem:[%s3204_s27 + $0x60] sm:$0xf] }
  0x42   : > { %v2320_v31 = vld [vmem:[%s3204_s27 + $0x2b8] sm:$0xf]  ;;  %v2829_v32 = vld [vmem:[%s3204_s27 + $0x2c0] sm:$0xf0]  ;;  %1569 = vmatpush.bf16.msra.mxu1 %v2141_v17  ;;  %v2225_v34 = vor.u32 %v2805_v30, %v2224_v28  ;;  %v2754_v36 = vld [vmem:[%s3204_s27 + $0x68] sm:$0xf0] }
  0x43   : > { %1582 = vmatpush.bf16.msra.mxu2 %v2237_v21  ;;  %v2116_v37 = vld [vmem:[%s3204_s27 + $0x120] sm:$0xf]  ;;  %v2321_v38 = vor.u32 %v2829_v32, %v2320_v31  ;;  %v2778_v39 = vld [vmem:[%s3204_s27 + $0x128] sm:$0xf0]  ;;  %v2021_v44 = vor.u32 %v2754_v36, %v2020_v35  ;;  %v2008_v47 = vld [vmem:[%s3204_s27 + $0x48] sm:$0xf] }
  0x44   : > { %1595 = vmatpush.bf16.msra.mxu3 %v2333_v25  ;;  %v2212_v40 = vld [vmem:[%s3204_s27 + $0x1e0] sm:$0xf]  ;;  %v2802_v41 = vld [vmem:[%s3204_s27 + $0x1e8] sm:$0xf0]  ;;  %v2117_v45 = vor.u32 %v2778_v39, %v2116_v37  ;;  %v2751_v48 = vld [vmem:[%s3204_s27 + $0x50] sm:$0xf0] }
  0x45   : > { %v2308_v42 = vld [vmem:[%s3204_s27 + $0x2a0] sm:$0xf]  ;;  %v2826_v43 = vld [vmem:[%s3204_s27 + $0x2a8] sm:$0xf0]  ;;  %1557 = vmatpush.bf16.msra.mxu0 %v2033_v29  ;;  %v2213_v46 = vor.u32 %v2802_v41, %v2212_v40  ;;  %v2104_v49 = vld [vmem:[%s3204_s27 + $0x108] sm:$0xf]  ;;  %v2009_v56 = vor.u32 %v2751_v48, %v2008_v47 }
  0x46   : > { %1570 = vmatpush.bf16.msra.mxu1 %v2129_v33  ;;  %v2309_v50 = vor.u32 %v2826_v43, %v2308_v42  ;;  %v2775_v51 = vld [vmem:[%s3204_s27 + $0x110] sm:$0xf0]  ;;  %v2200_v52 = vld [vmem:[%s3204_s27 + $0x1c8] sm:$0xf]  ;;  %v1996_v59 = vld [vmem:[%s3204_s27 + $0x30] sm:$0xf] }
  0x47   : > { %1583 = vmatpush.bf16.msra.mxu2 %v2225_v34  ;;  %v2799_v53 = vld [vmem:[%s3204_s27 + $0x1d0] sm:$0xf0]  ;;  %v2296_v54 = vld [vmem:[%s3204_s27 + $0x288] sm:$0xf]  ;;  %v2105_v57 = vor.u32 %v2775_v51, %v2104_v49  ;;  %v2748_v60 = vld [vmem:[%s3204_s27 + $0x38] sm:$0xf0] }
  0x48   : > { %1596 = vmatpush.bf16.msra.mxu3 %v2321_v38  ;;  %v2823_v55 = vld [vmem:[%s3204_s27 + $0x290] sm:$0xf0]  ;;  %v2201_v58 = vor.u32 %v2799_v53, %v2200_v52  ;;  %v2092_v61 = vld [vmem:[%s3204_s27 + $0xf0] sm:$0xf]  ;;  %v2772_v63 = vld [vmem:[%s3204_s27 + $0xf8] sm:$0xf0]  ;;  %v1997_v4 = vor.u32 %v2748_v60, %v1996_v59 }
  0x49   : > { %1558 = vmatpush.bf16.msra.mxu0 %v2021_v44  ;;  %v2297_v62 = vor.u32 %v2823_v55, %v2296_v54  ;;  %v2188_v0 = vld [vmem:[%s3204_s27 + $0x1b0] sm:$0xf]  ;;  %v2796_v1 = vld [vmem:[%s3204_s27 + $0x1b8] sm:$0xf0]  ;;  %v2093_v5 = vor.u32 %v2772_v63, %v2092_v61  ;;  %v1984_v7 = vld [vmem:[%s3204_s27 + $0x18] sm:$0xf] }
  0x4a   : > { %1571 = vmatpush.bf16.msra.mxu1 %v2117_v45  ;;  %v2284_v2 = vld [vmem:[%s3204_s27 + $0x270] sm:$0xf]  ;;  %v2820_v3 = vld [vmem:[%s3204_s27 + $0x278] sm:$0xf0]  ;;  %v2189_v6 = vor.u32 %v2796_v1, %v2188_v0  ;;  %v2745_v8 = vld [vmem:[%s3204_s27 + $0x20] sm:$0xf0] }
  0x4b   : > { %1584 = vmatpush.bf16.msra.mxu2 %v2213_v46  ;;  %v2080_v9 = vld [vmem:[%s3204_s27 + $0xd8] sm:$0xf]  ;;  %v2285_v10 = vor.u32 %v2820_v3, %v2284_v2  ;;  %v2769_v11 = vld [vmem:[%s3204_s27 + $0xe0] sm:$0xf0]  ;;  %v1985_v16 = vor.u32 %v2745_v8, %v1984_v7  ;;  %v1972_v17 = vld [vmem:[%s3204_s27] sm:$0xf] }
  0x4c   : > { %1597 = vmatpush.bf16.msra.mxu3 %v2309_v50  ;;  %v2176_v12 = vld [vmem:[%s3204_s27 + $0x198] sm:$0xf]  ;;  %v2793_v13 = vld [vmem:[%s3204_s27 + $0x1a0] sm:$0xf0]  ;;  %v2742_v18 = vld [vmem:[%s3204_s27 + $0x8] sm:$0xf0]  ;;  %v2081_v19 = vor.u32 %v2769_v11, %v2080_v9 }
  0x4d   : > { %1559 = vmatpush.bf16.msra.mxu0 %v2009_v56  ;;  %v2272_v14 = vld [vmem:[%s3204_s27 + $0x258] sm:$0xf]  ;;  %v2817_v15 = vld [vmem:[%s3204_s27 + $0x260] sm:$0xf0]  ;;  %v2177_v20 = vor.u32 %v2793_v13, %v2176_v12  ;;  %v2068_v21 = vld [vmem:[%s3204_s27 + $0xc0] sm:$0xf]  ;;  %v1973_v31 = vor.u32 %v2742_v18, %v1972_v17 }
  0x4e   : > { %1572 = vmatpush.bf16.msra.mxu1 %v2105_v57  ;;  %v2766_v22 = vld [vmem:[%s3204_s27 + $0xc8] sm:$0xf0]  ;;  %v2164_v23 = vld [vmem:[%s3204_s27 + $0x180] sm:$0xf]  ;;  %v2273_v24 = vor.u32 %v2817_v15, %v2272_v14  ;;  %v2440_v28 = vld [vmem:[%s3204_s27 + $0x3a8] sm:$0xf] }
  0x4f   : > { %1585 = vmatpush.bf16.msra.mxu2 %v2201_v58  ;;  %v2790_v25 = vld [vmem:[%s3204_s27 + $0x188] sm:$0xf0]  ;;  %v2260_v26 = vld [vmem:[%s3204_s27 + $0x240] sm:$0xf]  ;;  %v2859_v29 = vld [vmem:[%s3204_s27 + $0x3b0] sm:$0xf0]  ;;  %v2069_v35 = vor.u32 %v2766_v22, %v2068_v21 }
  0x50   : > { %1598 = vmatpush.bf16.msra.mxu3 %v2297_v62  ;;  %v2814_v27 = vld [vmem:[%s3204_s27 + $0x248] sm:$0xf0]  ;;  %v2536_v30 = vld [vmem:[%s3204_s27 + $0x468] sm:$0xf]  ;;  %v2883_v32 = vld [vmem:[%s3204_s27 + $0x470] sm:$0xf0]  ;;  %v2165_v36 = vor.u32 %v2790_v25, %v2164_v23  ;;  %v2441_v40 = vor.u32 %v2859_v29, %v2440_v28 }
  0x51   : > { %1560 = vmatpush.bf16.msra.mxu0 %v1997_v4  ;;  %v2632_v33 = vld [vmem:[%s3204_s27 + $0x528] sm:$0xf]  ;;  %v2907_v34 = vld [vmem:[%s3204_s27 + $0x530] sm:$0xf0]  ;;  %v2261_v39 = vor.u32 %v2814_v27, %v2260_v26  ;;  %v2537_v41 = vor.u32 %v2883_v32, %v2536_v30  ;;  %v2428_v43 = vld [vmem:[%s3204_s27 + $0x390] sm:$0xf] }
  0x52   : > { %1573 = vmatpush.bf16.msra.mxu1 %v2093_v5  ;;  %v2728_v37 = vld [vmem:[%s3204_s27 + $0x5e8] sm:$0xf]  ;;  %v2931_v38 = vld [vmem:[%s3204_s27 + $0x5f0] sm:$0xf0]  ;;  %v2633_v42 = vor.u32 %v2907_v34, %v2632_v33  ;;  %v2856_v44 = vld [vmem:[%s3204_s27 + $0x398] sm:$0xf0] }
  0x53   : > { %1586 = vmatpush.bf16.msra.mxu2 %v2189_v6  ;;  %v2524_v45 = vld [vmem:[%s3204_s27 + $0x450] sm:$0xf]  ;;  %v2729_v46 = vor.u32 %v2931_v38, %v2728_v37  ;;  %v2880_v47 = vld [vmem:[%s3204_s27 + $0x458] sm:$0xf0]  ;;  %v2429_v52 = vor.u32 %v2856_v44, %v2428_v43  ;;  %v2416_v53 = vld [vmem:[%s3204_s27 + $0x378] sm:$0xf] }
  0x54   : > { %1599 = vmatpush.bf16.msra.mxu3 %v2285_v10  ;;  %v2620_v48 = vld [vmem:[%s3204_s27 + $0x510] sm:$0xf]  ;;  %v2904_v49 = vld [vmem:[%s3204_s27 + $0x518] sm:$0xf0]  ;;  %v2525_v54 = vor.u32 %v2880_v47, %v2524_v45  ;;  %v2853_v56 = vld [vmem:[%s3204_s27 + $0x380] sm:$0xf0] }
  0x55   : > { %1561 = vmatpush.bf16.msra.mxu0 %v1985_v16  ;;  %v2716_v50 = vld [vmem:[%s3204_s27 + $0x5d0] sm:$0xf]  ;;  %v2928_v51 = vld [vmem:[%s3204_s27 + $0x5d8] sm:$0xf0]  ;;  %v2621_v55 = vor.u32 %v2904_v49, %v2620_v48  ;;  %v2512_v57 = vld [vmem:[%s3204_s27 + $0x438] sm:$0xf]  ;;  %v2417_v0 = vor.u32 %v2853_v56, %v2416_v53 }
  0x56   : > { %1574 = vmatpush.bf16.msra.mxu1 %v2081_v19  ;;  %v2877_v58 = vld [vmem:[%s3204_s27 + $0x440] sm:$0xf0]  ;;  %v2717_v59 = vor.u32 %v2928_v51, %v2716_v50  ;;  %v2608_v60 = vld [vmem:[%s3204_s27 + $0x4f8] sm:$0xf]  ;;  %v236_v2 = vld [vmem:[%s3681_s0 + $0x8] sm:$0xff]  ;;  %p230_p7 = scmp.lt.s32.totalorder %s229_s4, 5 }
  0x57   : > { %1587 = vmatpush.bf16.msra.mxu2 %v2177_v20  ;;  %v2901_v61 = vld [vmem:[%s3204_s27 + $0x500] sm:$0xf0]  ;;  %v2704_v62 = vld [vmem:[%s3204_s27 + $0x5b8] sm:$0xf]  ;;  %v2513_v1 = vor.u32 %v2877_v58, %v2512_v57  ;;  %v2404_v5 = vld [vmem:[%s3204_s27 + $0x360] sm:$0xf]  ;;  %v509_v8 = vunpack.c.l.b16 %v236_v2  ;;  %v510_v10 = vunpack.c.h.b16 %v236_v2 }
  0x58   : > { %1600 = vmatpush.bf16.msra.mxu3 %v2273_v24  ;;  %v2925_v63 = vld [vmem:[%s3204_s27 + $0x5c0] sm:$0xf0]  ;;  %v2609_v4 = vor.u32 %v2901_v61, %v2608_v60  ;;  %v2850_v6 = vld [vmem:[%s3204_s27 + $0x368] sm:$0xf0]  ;;  %v2500_v7 = vld [vmem:[%s3204_s27 + $0x420] sm:$0xf] }
  0x59   : > { %1562 = vmatpush.bf16.msra.mxu0 %v1973_v31  ;;  %v235_v3 = vld [vmem:[%s3681_s0] sm:$0xff]  ;;  %v2705_v11 = vor.u32 %v2925_v63, %v2704_v62  ;;  %v2874_v12 = vld [vmem:[%s3204_s27 + $0x428] sm:$0xf0]  ;;  %v3318_v18 = vpack.c.b16 %v509_v8, %v509_v8  ;;  %v3322_v20 = vpack.c.b16 %v510_v10, %v510_v10  ;;  %v2405_v21 = vor.u32 %v2850_v6, %v2404_v5  ;;  %v2392_v25 = vld [vmem:[%s3204_s27 + $0x348] sm:$0xf]  ;;  %s3693_s4 = smov (!%p230_p7, %s229_s4), 5 }
  0x5a   : > { %1575 = vmatpush.bf16.msra.mxu1 %v2069_v35  ;;  %v507_v9 = vunpack.c.l.b16 %v235_v3  ;;  %v2596_v13 = vld [vmem:[%s3204_s27 + $0x4e0] sm:$0xf]  ;;  %v2898_v14 = vld [vmem:[%s3204_s27 + $0x4e8] sm:$0xf0]  ;;  %v508_v15 = vunpack.c.h.b16 %v235_v3  ;;  %v2501_v23 = vor.u32 %v2874_v12, %v2500_v7  ;;  %v2847_v26 = vld [vmem:[%s3204_s27 + $0x350] sm:$0xf0] }
  0x5b   : > { %1588 = vmatpush.bf16.msra.mxu2 %v2165_v36  ;;  %v2692_v16 = vld [vmem:[%s3204_s27 + $0x5a0] sm:$0xf]  ;;  %v2922_v17 = vld [vmem:[%s3204_s27 + $0x5a8] sm:$0xf0]  ;;  %v2597_v24 = vor.u32 %v2898_v14, %v2596_v13  ;;  %v2488_v27 = vld [vmem:[%s3204_s27 + $0x408] sm:$0xf]  ;;  %v2393_v34 = vor.u32 %v2847_v26, %v2392_v25 }
  0x5c   : > { %1601 = vmatpush.bf16.msra.mxu3 %v2261_v39  ;;  %v3320_v19 = vpack.c.b16 %v507_v9, %v507_v9  ;;  %v3324_v22 = vpack.c.b16 %v508_v15, %v508_v15  ;;  %v2693_v28 = vor.u32 %v2922_v17, %v2692_v16  ;;  %v2871_v29 = vld [vmem:[%s3204_s27 + $0x410] sm:$0xf0]  ;;  %v2584_v30 = vld [vmem:[%s3204_s27 + $0x4c8] sm:$0xf]  ;;  %v2380_v37 = vld [vmem:[%s3204_s27 + $0x330] sm:$0xf] }
  0x5d   : > { %1607 = vmatpush.bf16.msrb.mxu0 %v2441_v40  ;;  %v2895_v31 = vld [vmem:[%s3204_s27 + $0x4d0] sm:$0xf0]  ;;  %v2680_v32 = vld [vmem:[%s3204_s27 + $0x588] sm:$0xf]  ;;  %v2489_v35 = vor.u32 %v2871_v29, %v2488_v27  ;;  %v2844_v38 = vld [vmem:[%s3204_s27 + $0x338] sm:$0xf0] }
  0x5e   : > { %1620 = vmatpush.bf16.msrb.mxu1 %v2537_v41  ;;  %1589 = vmatmul.bf16.vlgmr.msra.gmra.mxu2 %v3318_v18  ;;  %v2919_v33 = vld [vmem:[%s3204_s27 + $0x590] sm:$0xf0]  ;;  %v2585_v36 = vor.u32 %v2895_v31, %v2584_v30  ;;  %v2476_v39 = vld [vmem:[%s3204_s27 + $0x3f0] sm:$0xf]  ;;  %v2868_v41 = vld [vmem:[%s3204_s27 + $0x3f8] sm:$0xf0] }
  0x5f   : > { %1633 = vmatpush.bf16.msrb.mxu2 %v2633_v42  ;;  %1563 = vmatmul.bf16.vlgmr.msra.gmra.mxu0 %v3320_v19  ;;  %v2681_v40 = vor.u32 %v2919_v33, %v2680_v32  ;;  %v2572_v42 = vld [vmem:[%s3204_s27 + $0x4b0] sm:$0xf]  ;;  %v2892_v43 = vld [vmem:[%s3204_s27 + $0x4b8] sm:$0xf0]  ;;  %v2477_v47 = vor.u32 %v2868_v41, %v2476_v39  ;;  %v2368_v49 = vld [vmem:[%s3204_s27 + $0x318] sm:$0xf] }
  0x60   : > { %1646 = vmatpush.bf16.msrb.mxu3 %v2729_v46  ;;  %1576 = vmatmul.bf16.vlgmr.msra.gmra.mxu1 %v3324_v22  ;;  %v2668_v44 = vld [vmem:[%s3204_s27 + $0x570] sm:$0xf]  ;;  %v2916_v45 = vld [vmem:[%s3204_s27 + $0x578] sm:$0xf0]  ;;  %v2381_v46 = vor.u32 %v2844_v38, %v2380_v37  ;;  %v2573_v48 = vor.u32 %v2892_v43, %v2572_v42  ;;  %v2841_v50 = vld [vmem:[%s3204_s27 + $0x320] sm:$0xf0] }
  0x61   : > { %1608 = vmatpush.bf16.msrb.mxu0 %v2429_v52  ;;  %1602 = vmatmul.bf16.vlgmr.msra.gmra.mxu3 %v3322_v20  ;;  %v2464_v51 = vld [vmem:[%s3204_s27 + $0x3d8] sm:$0xf]  ;;  %v2669_v52 = vor.u32 %v2916_v45, %v2668_v44  ;;  %v2865_v53 = vld [vmem:[%s3204_s27 + $0x3e0] sm:$0xf0]  ;;  %v2356_v58 = vld [vmem:[%s3204_s27 + $0x300] sm:$0xf] }
  0x62   : > { %1621 = vmatpush.bf16.msrb.mxu1 %v2525_v54  ;;  %v2560_v54 = vld [vmem:[%s3204_s27 + $0x498] sm:$0xf]  ;;  %v2913_v57 = vld [vmem:[%s3204_s27 + $0x560] sm:$0xf0]  ;;  %v2838_v60 = vld [vmem:[%s3204_s27 + $0x308] sm:$0xf0]  ;;  %v2465_v63 = vor.u32 %v2865_v53, %v2464_v51 }
  0x63   : > { %1634 = vmatpush.bf16.msrb.mxu2 %v2621_v55  ;;  %v2889_v55 = vld [vmem:[%s3204_s27 + $0x4a0] sm:$0xf0]  ;;  %v2656_v56 = vld [vmem:[%s3204_s27 + $0x558] sm:$0xf]  ;;  %v2452_v61 = vld [vmem:[%s3204_s27 + $0x3c0] sm:$0xf] }
  0x64   : > { %1647 = vmatpush.bf16.msrb.mxu3 %v2717_v59  ;;  %v2369_v59 = vor.u32 %v2841_v50, %v2368_v49  ;;  %v2862_v62 = vld [vmem:[%s3204_s27 + $0x3c8] sm:$0xf0]  ;;  %v238_v3 = vld [vmem:[%s3681_s0 + $0x18] sm:$0xff]  ;;  %v2644_v5 = vld [vmem:[%s3204_s27 + $0x540] sm:$0xf]  ;;  %s1969_s5 = sshll.u32 %s3693_s4, 3 }
  0x65   : > { %1609 = vmatpush.bf16.msrb.mxu0 %v2417_v0  ;;  %v2561_v0 = vor.u32 %v2889_v55, %v2560_v54  ;;  %v2886_v2 = vld [vmem:[%s3204_s27 + $0x488] sm:$0xf0]  ;;  %v237_v7 = vld [vmem:[%s3681_s0 + $0x10] sm:$0xff]  ;;  %v2058_v9 = vld [vmem:[%s3204_s27 + $0xb4] sm:$0xf0]  ;;  %v513_v15 = vunpack.c.l.b16 %v238_v3  ;;  %v2453_v16 = vor.u32 %v2862_v62, %v2452_v61  ;;  %v514_v25 = vunpack.c.h.b16 %v238_v3  ;;  %s3661_s15 = scalar_lea.vmem %s3684_s3, %s1969_s5 }
  0x66   : > { %1622 = vmatpush.bf16.msrb.mxu1 %v2513_v1  ;;  %v2548_v1 = vld [vmem:[%s3204_s27 + $0x480] sm:$0xf]  ;;  %v2910_v6 = vld [vmem:[%s3204_s27 + $0x548] sm:$0xf0]  ;;  %v2154_v12 = vld [vmem:[%s3204_s27 + $0x174] sm:$0xf0] }
  0x67   : > { %1635 = vmatpush.bf16.msrb.mxu2 %v2609_v4  ;;  %v2657_v4 = vor.u32 %v2913_v57, %v2656_v56  ;;  %v2762_v8 = vld [vmem:[%s3204_s27 + $0xac] sm:$0xf]  ;;  %v2250_v14 = vld [vmem:[%s3204_s27 + $0x234] sm:$0xf0]  ;;  %v2549_v17 = vor.u32 %v2886_v2, %v2548_v1  ;;  %v2645_v26 = vor.u32 %v2910_v6, %v2644_v5  ;;  %v2759_v31 = vld [vmem:[%s3204_s27 + $0x94] sm:$0xf]  ;;  %v3382_v38 = vpack.c.b16 %v513_v15, %v513_v15 }
  0x68   : > { %1648 = vmatpush.bf16.msrb.mxu3 %v2705_v11  ;;  %v2786_v10 = vld [vmem:[%s3204_s27 + $0x16c] sm:$0xf]  ;;  %v2357_v11 = vor.u32 %v2838_v60, %v2356_v58  ;;  %v2061_v27 = vor.u32 %v2762_v8, %v2058_v9  ;;  %v2046_v32 = vld [vmem:[%s3204_s27 + $0x9c] sm:$0xf0]  ;;  %v2783_v33 = vld [vmem:[%s3204_s27 + $0x154] sm:$0xf]  ;;  %v3388_v42 = vpack.c.b16 %v514_v25, %v514_v25 }
  0x69   : > { %1610 = vmatpush.bf16.msrb.mxu0 %v2405_v21  ;;  %v2810_v13 = vld [vmem:[%s3204_s27 + $0x22c] sm:$0xf]  ;;  %v2157_v29 = vor.u32 %v2786_v10, %v2154_v12  ;;  %v2238_v37 = vld [vmem:[%s3204_s27 + $0x21c] sm:$0xf0]  ;;  %v2831_v39 = vld [vmem:[%s3204_s27 + $0x2d4] sm:$0xf]  ;;  %v2049_v43 = vor.u32 %v2759_v31, %v2046_v32 }
  0x6a   : > { %1623 = vmatpush.bf16.msrb.mxu1 %v2501_v23  ;;  %v2834_v21 = vld [vmem:[%s3204_s27 + $0x2ec] sm:$0xf]  ;;  %v2346_v23 = vld [vmem:[%s3204_s27 + $0x2f4] sm:$0xf0]  ;;  %v2253_v30 = vor.u32 %v2810_v13, %v2250_v14  ;;  %v2780_v49 = vld [vmem:[%s3204_s27 + $0x13c] sm:$0xf] }
  0x6b   : > { %1636 = vmatpush.bf16.msrb.mxu2 %v2597_v24  ;;  %v511_v24 = vunpack.c.l.b16 %v237_v7  ;;  %v2130_v51 = vld [vmem:[%s3204_s27 + $0x144] sm:$0xf0]  ;;  %v2828_v54 = vld [vmem:[%s3204_s27 + $0x2bc] sm:$0xf]  ;;  %v2022_v60 = vld [vmem:[%s3204_s27 + $0x6c] sm:$0xf0] }
  0x6c   : > { %1649 = vmatpush.bf16.msrb.mxu3 %v2693_v28  ;;  %v512_v28 = vunpack.c.h.b16 %v237_v7  ;;  %v2226_v53 = vld [vmem:[%s3204_s27 + $0x204] sm:$0xf0]  ;;  %v2133_v57 = vor.u32 %v2780_v49, %v2130_v51  ;;  %v2777_v61 = vld [vmem:[%s3204_s27 + $0x124] sm:$0xf]  ;;  %v2214_v1 = vld [vmem:[%s3204_s27 + $0x1ec] sm:$0xf0] }
  0x6d   : > { %1611 = vmatpush.bf16.msrb.mxu0 %v2393_v34  ;;  %v2349_v34 = vor.u32 %v2834_v21, %v2346_v23  ;;  %v3386_v41 = vpack.c.b16 %v511_v24, %v511_v24  ;;  %v2322_v55 = vld [vmem:[%s3204_s27 + $0x2c4] sm:$0xf0]  ;;  %v2825_v2 = vld [vmem:[%s3204_s27 + $0x2a4] sm:$0xf]  ;;  %v2310_v3 = vld [vmem:[%s3204_s27 + $0x2ac] sm:$0xf0] }
  0x6e   : > { %1624 = vmatpush.bf16.msrb.mxu1 %v2489_v35  ;;  %v2142_v35 = vld [vmem:[%s3204_s27 + $0x15c] sm:$0xf0]  ;;  %v3390_v44 = vpack.c.b16 %v512_v28, %v512_v28  ;;  %v2325_v62 = vor.u32 %v2828_v54, %v2322_v55  ;;  %v2750_v7 = vld [vmem:[%s3204_s27 + $0x4c] sm:$0xf]  ;;  %v2010_v8 = vld [vmem:[%s3204_s27 + $0x54] sm:$0xf0]  ;;  %v2313_v10 = vor.u32 %v2825_v2, %v2310_v3 }
  0x6f   : > { %1637 = vmatpush.bf16.msrb.mxu2 %v2585_v36  ;;  %v2807_v36 = vld [vmem:[%s3204_s27 + $0x214] sm:$0xf]  ;;  %v2145_v45 = vor.u32 %v2783_v33, %v2142_v35  ;;  %v2774_v9 = vld [vmem:[%s3204_s27 + $0x10c] sm:$0xf]  ;;  %v2202_v13 = vld [vmem:[%s3204_s27 + $0x1d4] sm:$0xf0] }
  0x70   : > { %1650 = vmatpush.bf16.msrb.mxu3 %v2681_v40  ;;  %v2334_v40 = vld [vmem:[%s3204_s27 + $0x2dc] sm:$0xf0]  ;;  %v2798_v12 = vld [vmem:[%s3204_s27 + $0x1cc] sm:$0xf]  ;;  %v2298_v15 = vld [vmem:[%s3204_s27 + $0x294] sm:$0xf0] }
  0x71   : > { %1612 = vmatpush.bf16.msrb.mxu0 %v2381_v46  ;;  %v2241_v46 = vor.u32 %v2807_v36, %v2238_v37  ;;  %v2337_v50 = vor.u32 %v2831_v39, %v2334_v40  ;;  %v2822_v14 = vld [vmem:[%s3204_s27 + $0x28c] sm:$0xf]  ;;  %v2205_v21 = vor.u32 %v2798_v12, %v2202_v13  ;;  %v2747_v23 = vld [vmem:[%s3204_s27 + $0x34] sm:$0xf]  ;;  %v1998_v24 = vld [vmem:[%s3204_s27 + $0x3c] sm:$0xf0] }
  0x72   : > { %1625 = vmatpush.bf16.msrb.mxu1 %v2477_v47  ;;  %v2756_v47 = vld [vmem:[%s3204_s27 + $0x7c] sm:$0xf]  ;;  %v2771_v25 = vld [vmem:[%s3204_s27 + $0xf4] sm:$0xf]  ;;  %v2286_v31 = vld [vmem:[%s3204_s27 + $0x27c] sm:$0xf0]  ;;  %v2001_v32 = vor.u32 %v2747_v23, %v1998_v24 }
  0x73   : > { %1638 = vmatpush.bf16.msrb.mxu2 %v2573_v48  ;;  %v2034_v48 = vld [vmem:[%s3204_s27 + $0x84] sm:$0xf0]  ;;  %v2795_v28 = vld [vmem:[%s3204_s27 + $0x1b4] sm:$0xf]  ;;  %v2744_v35 = vld [vmem:[%s3204_s27 + $0x1c] sm:$0xf] }
  0x74   : > { %1651 = vmatpush.bf16.msrb.mxu3 %v2669_v52  ;;  %v2804_v52 = vld [vmem:[%s3204_s27 + $0x1fc] sm:$0xf]  ;;  %v2037_v56 = vor.u32 %v2756_v47, %v2034_v48  ;;  %v1986_v36 = vld [vmem:[%s3204_s27 + $0x24] sm:$0xf0]  ;;  %v2741_v49 = vld [vmem:[%s3204_s27 + $0x4] sm:$0xf] }
  0x75   : > { %1613 = vmatpush.bf16.msrb.mxu0 %v2369_v59  ;;  %v2229_v58 = vor.u32 %v2804_v52, %v2226_v53  ;;  %v2753_v59 = vld [vmem:[%s3204_s27 + $0x64] sm:$0xf]  ;;  %v2768_v37 = vld [vmem:[%s3204_s27 + $0xdc] sm:$0xf]  ;;  %v2082_v40 = vld [vmem:[%s3204_s27 + $0xe4] sm:$0xf0]  ;;  %v1989_v48 = vor.u32 %v2744_v35, %v1986_v36 }
  0x76   : > { %1626 = vmatpush.bf16.msrb.mxu1 %v2465_v63  ;;  %v2118_v63 = vld [vmem:[%s3204_s27 + $0x12c] sm:$0xf0]  ;;  %v2274_v47 = vld [vmem:[%s3204_s27 + $0x264] sm:$0xf0]  ;;  %v2085_v51 = vor.u32 %v2768_v37, %v2082_v40  ;;  %v2765_v53 = vld [vmem:[%s3204_s27 + $0xc4] sm:$0xf] }
  0x77   : > { %1639 = vmatpush.bf16.msrb.mxu2 %v2561_v0  ;;  %v2801_v0 = vld [vmem:[%s3204_s27 + $0x1e4] sm:$0xf]  ;;  %v2121_v5 = vor.u32 %v2777_v61, %v2118_v63  ;;  %v2070_v54 = vld [vmem:[%s3204_s27 + $0xcc] sm:$0xf0]  ;;  %v2442_v61 = vld [vmem:[%s3204_s27 + $0x3b4] sm:$0xf0] }
  0x78   : > { %1652 = vmatpush.bf16.msrb.mxu3 %v2657_v4  ;;  %v2025_v4 = vor.u32 %v2753_v59, %v2022_v60  ;;  %v2217_v6 = vor.u32 %v2801_v0, %v2214_v1  ;;  %v2789_v55 = vld [vmem:[%s3204_s27 + $0x184] sm:$0xf]  ;;  %v2262_v59 = vld [vmem:[%s3204_s27 + $0x24c] sm:$0xf0]  ;;  %v2858_v60 = vld [vmem:[%s3204_s27 + $0x3ac] sm:$0xf]  ;;  %v2073_v3 = vor.u32 %v2765_v53, %v2070_v54 }
  0x79   : > { %1614 = vmatpush.bf16.msrb.mxu0 %v2357_v11  ;;  %v2106_v11 = vld [vmem:[%s3204_s27 + $0x114] sm:$0xf0]  ;;  %v2906_v1 = vld [vmem:[%s3204_s27 + $0x52c] sm:$0xf]  ;;  %v2430_v12 = vld [vmem:[%s3204_s27 + $0x39c] sm:$0xf0] }
  0x7a   : > { %1627 = vmatpush.bf16.msrb.mxu1 %v2453_v16  ;;  %v2013_v16 = vor.u32 %v2750_v7, %v2010_v8  ;;  %v2538_v0 = vld [vmem:[%s3204_s27 + $0x474] sm:$0xf0]  ;;  %v2445_v8 = vor.u32 %v2858_v60, %v2442_v61  ;;  %v2879_v13 = vld [vmem:[%s3204_s27 + $0x454] sm:$0xf]  ;;  %v2718_v23 = vld [vmem:[%s3204_s27 + $0x5dc] sm:$0xf0] }
  0x7b   : > { %1640 = vmatpush.bf16.msrb.mxu2 %v2549_v17  ;;  %v2109_v17 = vor.u32 %v2774_v9, %v2106_v11  ;;  %v2634_v2 = vld [vmem:[%s3204_s27 + $0x534] sm:$0xf0]  ;;  %v2855_v11 = vld [vmem:[%s3204_s27 + $0x394] sm:$0xf]  ;;  %v2706_v35 = vld [vmem:[%s3204_s27 + $0x5c4] sm:$0xf0] }
  0x7c   : > { %1653 = vmatpush.bf16.msrb.mxu3 %v2645_v26  ;;  %1615 = vmatmul.bf16.vlgmr.msrb.gmra.mxu0 %v3386_v41  ;;  %v2301_v26 = vor.u32 %v2822_v14, %v2298_v15  ;;  %v2526_v15 = vld [vmem:[%s3204_s27 + $0x45c] sm:$0xf0]  ;;  %v2433_v24 = vor.u32 %v2855_v11, %v2430_v12  ;;  %v2849_v40 = vld [vmem:[%s3204_s27 + $0x364] sm:$0xf]  ;;  %v2894_v60 = vld [vmem:[%s3204_s27 + $0x4cc] sm:$0xf] }
  0x7d   : > { %1659 = vmatpush.bf16.msra.mxu0 %v2061_v27  ;;  %1628 = vmatmul.bf16.vlgmr.msrb.gmra.mxu1 %v3390_v44  ;;  %v2094_v27 = vld [vmem:[%s3204_s27 + $0xfc] sm:$0xf0]  ;;  %v2586_v61 = vld [vmem:[%s3204_s27 + $0x4d4] sm:$0xf0] }
  0x7e   : > { %1672 = vmatpush.bf16.msra.mxu1 %v2157_v29  ;;  %1641 = vmatmul.bf16.vlgmr.msrb.gmra.mxu2 %v3382_v38  ;;  %v2190_v29 = vld [vmem:[%s3204_s27 + $0x1bc] sm:$0xf0]  ;;  %v2097_v33 = vor.u32 %v2771_v25, %v2094_v27  ;;  %v2529_v25 = vor.u32 %v2879_v13, %v2526_v15  ;;  %v2852_v27 = vld [vmem:[%s3204_s27 + $0x37c] sm:$0xf] }
  0x7f   : > { %1685 = vmatpush.bf16.msra.mxu2 %v2253_v30  ;;  %1654 = vmatmul.bf16.vlgmr.msrb.gmra.mxu3 %v3388_v42  ;;  %v2819_v30 = vld [vmem:[%s3204_s27 + $0x274] sm:$0xf]  ;;  %v2670_v11 = vld [vmem:[%s3204_s27 + $0x57c] sm:$0xf0]  ;;  %v2840_v15 = vld [vmem:[%s3204_s27 + $0x31c] sm:$0xf] }
  0x80   : > { %1698 = vmatpush.bf16.msra.mxu3 %v2349_v34  ;;  %v2193_v34 = vor.u32 %v2795_v28, %v2190_v29  ;;  %v2289_v39 = vor.u32 %v2819_v30, %v2286_v31  ;;  %v2418_v28 = vld [vmem:[%s3204_s27 + $0x384] sm:$0xf0]  ;;  %v2876_v29 = vld [vmem:[%s3204_s27 + $0x43c] sm:$0xf] }
  0x81   : > { %1660 = vmatpush.bf16.msra.mxu0 %v2049_v43  ;;  %v2792_v43 = vld [vmem:[%s3204_s27 + $0x19c] sm:$0xf]  ;;  %v2514_v31 = vld [vmem:[%s3204_s27 + $0x444] sm:$0xf0]  ;;  %v2421_v36 = vor.u32 %v2852_v27, %v2418_v28 }
  0x82   : > { %1673 = vmatpush.bf16.msra.mxu1 %v2145_v45  ;;  %v2178_v45 = vld [vmem:[%s3204_s27 + $0x1a4] sm:$0xf0]  ;;  %v2517_v37 = vor.u32 %v2876_v29, %v2514_v31  ;;  %v2837_v29 = vld [vmem:[%s3204_s27 + $0x304] sm:$0xf] }
  0x83   : > { %1686 = vmatpush.bf16.msra.mxu2 %v2241_v46  ;;  %v2816_v46 = vld [vmem:[%s3204_s27 + $0x25c] sm:$0xf]  ;;  %v2181_v52 = vor.u32 %v2792_v43, %v2178_v45  ;;  %v2406_v43 = vld [vmem:[%s3204_s27 + $0x36c] sm:$0xf0]  ;;  %v2873_v45 = vld [vmem:[%s3204_s27 + $0x424] sm:$0xf] }
  0x84   : > { %1699 = vmatpush.bf16.msra.mxu3 %v2337_v50  ;;  %v1974_v50 = vld [vmem:[%s3204_s27 + $0xc] sm:$0xf0]  ;;  %v2658_v27 = vld [vmem:[%s3204_s27 + $0x564] sm:$0xf0] }
  0x85   : > { %1661 = vmatpush.bf16.msra.mxu0 %v2037_v56  ;;  %v2277_v56 = vor.u32 %v2816_v46, %v2274_v47  ;;  %v1977_v63 = vor.u32 %v2741_v49, %v1974_v50  ;;  %v2502_v47 = vld [vmem:[%s3204_s27 + $0x42c] sm:$0xf0]  ;;  %v2921_v50 = vld [vmem:[%s3204_s27 + $0x5a4] sm:$0xf] }
  0x86   : > { %1674 = vmatpush.bf16.msra.mxu1 %v2133_v57  ;;  %v2166_v57 = vld [vmem:[%s3204_s27 + $0x18c] sm:$0xf0]  ;;  %v2505_v53 = vor.u32 %v2873_v45, %v2502_v47  ;;  %v2764_v45 = vld [vmem:[%s3204_s27 + $0xb8] sm:$0xf0] }
  0x87   : > { %1687 = vmatpush.bf16.msra.mxu2 %v2229_v58  ;;  %v2813_v58 = vld [vmem:[%s3204_s27 + $0x244] sm:$0xf]  ;;  %v2598_v49 = vld [vmem:[%s3204_s27 + $0x4ec] sm:$0xf0] }
  0x88   : > { %1700 = vmatpush.bf16.msra.mxu3 %v2325_v62  ;;  %v2882_v62 = vld [vmem:[%s3204_s27 + $0x46c] sm:$0xf]  ;;  %v2265_v7 = vor.u32 %v2813_v58, %v2262_v59  ;;  %v2490_v59 = vld [vmem:[%s3204_s27 + $0x414] sm:$0xf0] }
  0x89   : > { %1662 = vmatpush.bf16.msra.mxu0 %v2025_v4  ;;  %v2169_v4 = vor.u32 %v2789_v55, %v2166_v57  ;;  %v2541_v9 = vor.u32 %v2882_v62, %v2538_v0  ;;  %v2846_v55 = vld [vmem:[%s3204_s27 + $0x34c] sm:$0xf] }
  0x8a   : > { %1675 = vmatpush.bf16.msra.mxu1 %v2121_v5  ;;  %v2930_v5 = vld [vmem:[%s3204_s27 + $0x5ec] sm:$0xf] }
  0x8b   : > { %1688 = vmatpush.bf16.msra.mxu2 %v2217_v6  ;;  %v2730_v6 = vld [vmem:[%s3204_s27 + $0x5f4] sm:$0xf0]  ;;  %v2870_v57 = vld [vmem:[%s3204_s27 + $0x40c] sm:$0xf] }
  0x8c   : > { %1701 = vmatpush.bf16.msra.mxu3 %v2313_v10  ;;  %v2637_v10 = vor.u32 %v2906_v1, %v2634_v2  ;;  %v2733_v14 = vor.u32 %v2930_v5, %v2730_v6  ;;  %v2918_v62 = vld [vmem:[%s3204_s27 + $0x58c] sm:$0xf]  ;;  %v2493_v1 = vor.u32 %v2870_v57, %v2490_v59  ;;  %v2589_v2 = vor.u32 %v2894_v60, %v2586_v61  ;;  %v2867_v5 = vld [vmem:[%s3204_s27 + $0x3f4] sm:$0xf]  ;;  %v2052_v59 = vld [vmem:[%s3204_s27 + $0x98] sm:$0xf] }
  0x8d   : > { %1663 = vmatpush.bf16.msra.mxu0 %v2013_v16  ;;  %v2903_v16 = vld [vmem:[%s3204_s27 + $0x514] sm:$0xf]  ;;  %v2761_v60 = vld [vmem:[%s3204_s27 + $0xa0] sm:$0xf0]  ;;  %v2148_v61 = vld [vmem:[%s3204_s27 + $0x158] sm:$0xf] }
  0x8e   : > { %1676 = vmatpush.bf16.msra.mxu1 %v2109_v17  ;;  %v2622_v17 = vld [vmem:[%s3204_s27 + $0x51c] sm:$0xf0] }
  0x8f   : > { %1689 = vmatpush.bf16.msra.mxu2 %v2205_v21  ;;  %v2927_v21 = vld [vmem:[%s3204_s27 + $0x5d4] sm:$0xf] }
  0x90   : > { %1702 = vmatpush.bf16.msra.mxu3 %v2301_v26  ;;  %v2625_v26 = vor.u32 %v2903_v16, %v2622_v17  ;;  %v2721_v30 = vor.u32 %v2927_v21, %v2718_v23  ;;  %v2370_v16 = vld [vmem:[%s3204_s27 + $0x324] sm:$0xf0]  ;;  %v2864_v17 = vld [vmem:[%s3204_s27 + $0x3dc] sm:$0xf] }
  0x91   : > { %1664 = vmatpush.bf16.msra.mxu0 %v2001_v32  ;;  %v2900_v32 = vld [vmem:[%s3204_s27 + $0x4fc] sm:$0xf]  ;;  %v2466_v23 = vld [vmem:[%s3204_s27 + $0x3e4] sm:$0xf0]  ;;  %v2373_v28 = vor.u32 %v2840_v15, %v2370_v16  ;;  %v2830_v15 = vld [vmem:[%s3204_s27 + $0x2c8] sm:$0xf0] }
  0x92   : > { %1677 = vmatpush.bf16.msra.mxu1 %v2097_v33  ;;  %v2610_v33 = vld [vmem:[%s3204_s27 + $0x504] sm:$0xf0]  ;;  %v2469_v31 = vor.u32 %v2864_v17, %v2466_v23 }
  0x93   : > { %1690 = vmatpush.bf16.msra.mxu2 %v2193_v34  ;;  %v2924_v34 = vld [vmem:[%s3204_s27 + $0x5bc] sm:$0xf]  ;;  %v2028_v23 = vld [vmem:[%s3204_s27 + $0x68] sm:$0xf] }
  0x94   : > { %1703 = vmatpush.bf16.msra.mxu3 %v2289_v39  ;;  %v2613_v39 = vor.u32 %v2900_v32, %v2610_v33  ;;  %v2709_v46 = vor.u32 %v2924_v34, %v2706_v35  ;;  %v2861_v33 = vld [vmem:[%s3204_s27 + $0x3c4] sm:$0xf]  ;;  %v2454_v34 = vld [vmem:[%s3204_s27 + $0x3cc] sm:$0xf0] }
  0x95   : > { %1665 = vmatpush.bf16.msra.mxu0 %v1989_v48  ;;  %v2897_v48 = vld [vmem:[%s3204_s27 + $0x4e4] sm:$0xf] }
  0x96   : > { %1678 = vmatpush.bf16.msra.mxu1 %v2085_v51  ;;  %v2694_v51 = vld [vmem:[%s3204_s27 + $0x5ac] sm:$0xf0]  ;;  %v2601_v54 = vor.u32 %v2897_v48, %v2598_v49  ;;  %v2885_v35 = vld [vmem:[%s3204_s27 + $0x484] sm:$0xf]  ;;  %v2788_v48 = vld [vmem:[%s3204_s27 + $0x178] sm:$0xf0] }
  0x97   : > { %1691 = vmatpush.bf16.msra.mxu2 %v2181_v52  ;;  %v2409_v52 = vor.u32 %v2849_v40, %v2406_v43  ;;  %v2697_v58 = vor.u32 %v2921_v50, %v2694_v51  ;;  %v2646_v40 = vld [vmem:[%s3204_s27 + $0x54c] sm:$0xf0]  ;;  %v2812_v50 = vld [vmem:[%s3204_s27 + $0x238] sm:$0xf0]  ;;  %v2457_v51 = vor.u32 %v2861_v33, %v2454_v34 }
  0x98   : > { %1704 = vmatpush.bf16.msra.mxu3 %v2277_v56  ;;  %v2394_v56 = vld [vmem:[%s3204_s27 + $0x354] sm:$0xf0]  ;;  %v2064_v43 = vld [vmem:[%s3204_s27 + $0xb0] sm:$0xf] }
  0x99   : > { %1666 = vmatpush.bf16.msra.mxu0 %v1977_v63  ;;  %v2682_v63 = vld [vmem:[%s3204_s27 + $0x594] sm:$0xf0]  ;;  %v2397_v0 = vor.u32 %v2846_v55, %v2394_v56  ;;  %v2256_v49 = vld [vmem:[%s3204_s27 + $0x230] sm:$0xf]  ;;  %v2065_v56 = vor.u32 %v2764_v45, %v2064_v43  ;;  %v2800_v45 = vld [vmem:[%s3204_s27 + $0x1d8] sm:$0xf0] }
  0x9a   : > { %1679 = vmatpush.bf16.msra.mxu1 %v2073_v3  ;;  %v2843_v3 = vld [vmem:[%s3204_s27 + $0x334] sm:$0xf]  ;;  %v2685_v6 = vor.u32 %v2918_v62, %v2682_v63  ;;  %v2785_v63 = vld [vmem:[%s3204_s27 + $0x160] sm:$0xf0]  ;;  %v2208_v43 = vld [vmem:[%s3204_s27 + $0x1d0] sm:$0xf] }
  0x9b   : > { %1692 = vmatpush.bf16.msra.mxu2 %v2169_v4  ;;  %v2382_v4 = vld [vmem:[%s3204_s27 + $0x33c] sm:$0xf0] }
  0x9c   : > { %1705 = vmatpush.bf16.msra.mxu3 %v2265_v7  ;;  %1667 = vmatmul.bf16.vlgmr.msra.gmra.mxu0 %v3320_v19  ;;  %v2478_v7 = vld [vmem:[%s3204_s27 + $0x3fc] sm:$0xf0]  ;;  %v2385_v12 = vor.u32 %v2843_v3, %v2382_v4  ;;  %v2833_v3 = vld [vmem:[%s3204_s27 + $0x2e0] sm:$0xf0]  ;;  %v2053_v4 = vor.u32 %v2761_v60, %v2052_v59 }
  0x9d   : > { %1711 = vmatpush.bf16.msrb.mxu0 %v2445_v8  ;;  %1680 = vmatmul.bf16.vlgmr.msra.gmra.mxu1 %v3324_v22  ;;  %v2891_v8 = vld [vmem:[%s3204_s27 + $0x4b4] sm:$0xf]  ;;  %v2481_v13 = vor.u32 %v2867_v5, %v2478_v7  ;;  %v2149_v5 = vor.u32 %v2785_v63, %v2148_v61  ;;  %v2040_v7 = vld [vmem:[%s3204_s27 + $0x80] sm:$0xf]  ;;  %v2821_v59 = vld [vmem:[%s3204_s27 + $0x280] sm:$0xf0] }
  0x9e   : > { %1724 = vmatpush.bf16.msrb.mxu1 %v2541_v9  ;;  %1693 = vmatmul.bf16.vlgmr.msra.gmra.mxu2 %v3318_v18  ;;  %v2574_v9 = vld [vmem:[%s3204_s27 + $0x4bc] sm:$0xf0] }
  0x9f   : > { %1737 = vmatpush.bf16.msrb.mxu2 %v2637_v10  ;;  %1706 = vmatmul.bf16.vlgmr.msra.gmra.mxu3 %v3322_v20  ;;  %v2915_v10 = vld [vmem:[%s3204_s27 + $0x574] sm:$0xf]  ;;  %v1992_v63 = vld [vmem:[%s3204_s27 + $0x20] sm:$0xf] }
  0xa0   : > { %1750 = vmatpush.bf16.msrb.mxu3 %v2733_v14  ;;  %v2577_v14 = vor.u32 %v2891_v8, %v2574_v9  ;;  %v2673_v21 = vor.u32 %v2915_v10, %v2670_v11  ;;  %v2758_v8 = vld [vmem:[%s3204_s27 + $0x88] sm:$0xf0]  ;;  %v2136_v9 = vld [vmem:[%s3204_s27 + $0x140] sm:$0xf] }
  0xa1   : > { %1712 = vmatpush.bf16.msrb.mxu0 %v2433_v24  ;;  %v2888_v24 = vld [vmem:[%s3204_s27 + $0x49c] sm:$0xf]  ;;  %v2782_v11 = vld [vmem:[%s3204_s27 + $0x148] sm:$0xf0]  ;;  %v2041_v16 = vor.u32 %v2758_v8, %v2040_v7 }
  0xa2   : > { %1725 = vmatpush.bf16.msrb.mxu1 %v2529_v25  ;;  %v2562_v25 = vld [vmem:[%s3204_s27 + $0x4a4] sm:$0xf0]  ;;  %v2137_v17 = vor.u32 %v2782_v11, %v2136_v9  ;;  %v2818_v7 = vld [vmem:[%s3204_s27 + $0x268] sm:$0xf0] }
  0xa3   : > { %1738 = vmatpush.bf16.msrb.mxu2 %v2625_v26  ;;  %v2912_v26 = vld [vmem:[%s3204_s27 + $0x55c] sm:$0xf]  ;;  %v2565_v32 = vor.u32 %v2888_v24, %v2562_v25  ;;  %v2755_v24 = vld [vmem:[%s3204_s27 + $0x70] sm:$0xf0]  ;;  %v2124_v25 = vld [vmem:[%s3204_s27 + $0x128] sm:$0xf] }
  0xa4   : > { %1751 = vmatpush.bf16.msrb.mxu3 %v2721_v30  ;;  %v2358_v30 = vld [vmem:[%s3204_s27 + $0x30c] sm:$0xf0]  ;;  %v1980_v9 = vld [vmem:[%s3204_s27 + $0x8] sm:$0xf] }
  0xa5   : > { %1713 = vmatpush.bf16.msrb.mxu0 %v2421_v36  ;;  %v2661_v36 = vor.u32 %v2912_v26, %v2658_v27  ;;  %v2361_v47 = vor.u32 %v2837_v29, %v2358_v30  ;;  %v2779_v27 = vld [vmem:[%s3204_s27 + $0x130] sm:$0xf0]  ;;  %v2316_v30 = vld [vmem:[%s3204_s27 + $0x2a8] sm:$0xf] }
  0xa6   : > { %1726 = vmatpush.bf16.msrb.mxu1 %v2517_v37  ;;  %v2550_v37 = vld [vmem:[%s3204_s27 + $0x48c] sm:$0xf0]  ;;  %v2803_v29 = vld [vmem:[%s3204_s27 + $0x1f0] sm:$0xf0]  ;;  %v2125_v33 = vor.u32 %v2779_v27, %v2124_v25  ;;  %v2860_v25 = vld [vmem:[%s3204_s27 + $0x3b8] sm:$0xf0] }
  0xa7   : > { %1739 = vmatpush.bf16.msrb.mxu2 %v2613_v39  ;;  %v2909_v39 = vld [vmem:[%s3204_s27 + $0x544] sm:$0xf] }
  0xa8   : > { %1752 = vmatpush.bf16.msrb.mxu3 %v2709_v46  ;;  %v2160_v46 = vld [vmem:[%s3204_s27 + $0x170] sm:$0xf]  ;;  %v2649_v55 = vor.u32 %v2909_v39, %v2646_v40  ;;  %v2776_v40 = vld [vmem:[%s3204_s27 + $0x118] sm:$0xf0] }
  0xa9   : > { %1714 = vmatpush.bf16.msrb.mxu0 %v2409_v52  ;;  %v2553_v52 = vor.u32 %v2885_v35, %v2550_v37  ;;  %v2161_v57 = vor.u32 %v2788_v48, %v2160_v46  ;;  %v2016_v35 = vld [vmem:[%s3204_s27 + $0x50] sm:$0xf] }
  0xaa   : > { %1727 = vmatpush.bf16.msrb.mxu1 %v2505_v53  ;;  %v2352_v53 = vld [vmem:[%s3204_s27 + $0x2f0] sm:$0xf] }
  0xab   : > { %1740 = vmatpush.bf16.msrb.mxu2 %v2601_v54  ;;  %v2836_v54 = vld [vmem:[%s3204_s27 + $0x2f8] sm:$0xf0]  ;;  %v2112_v37 = vld [vmem:[%s3204_s27 + $0x110] sm:$0xf] }
  0xac   : > { %1753 = vmatpush.bf16.msrb.mxu3 %v2697_v58  ;;  %v2257_v58 = vor.u32 %v2812_v50, %v2256_v49  ;;  %v2353_v62 = vor.u32 %v2836_v54, %v2352_v53  ;;  %v2304_v46 = vld [vmem:[%s3204_s27 + $0x290] sm:$0xf]  ;;  %v2113_v49 = vor.u32 %v2776_v40, %v2112_v37  ;;  %v2209_v50 = vor.u32 %v2800_v45, %v2208_v43  ;;  %v2100_v53 = vld [vmem:[%s3204_s27 + $0xf8] sm:$0xf]  ;;  %v2857_v43 = vld [vmem:[%s3204_s27 + $0x3a0] sm:$0xf0] }
  0xad   : > { %1715 = vmatpush.bf16.msrb.mxu0 %v2397_v0  ;;  %v2244_v0 = vld [vmem:[%s3204_s27 + $0x218] sm:$0xf] }
  0xae   : > { %1728 = vmatpush.bf16.msrb.mxu1 %v2493_v1  ;;  %v2809_v1 = vld [vmem:[%s3204_s27 + $0x220] sm:$0xf0]  ;;  %v2436_v40 = vld [vmem:[%s3204_s27 + $0x398] sm:$0xf] }
  0xaf   : > { %1741 = vmatpush.bf16.msrb.mxu2 %v2589_v2  ;;  %v2340_v2 = vld [vmem:[%s3204_s27 + $0x2d8] sm:$0xf] }
  0xb0   : > { %1754 = vmatpush.bf16.msrb.mxu3 %v2685_v6  ;;  %v2245_v6 = vor.u32 %v2809_v1, %v2244_v0  ;;  %v2341_v10 = vor.u32 %v2833_v3, %v2340_v2  ;;  %v2746_v0 = vld [vmem:[%s3204_s27 + $0x28] sm:$0xf0]  ;;  %v2088_v1 = vld [vmem:[%s3204_s27 + $0xe0] sm:$0xf]  ;;  %v2532_v45 = vld [vmem:[%s3204_s27 + $0x458] sm:$0xf] }
  0xb1   : > { %1716 = vmatpush.bf16.msrb.mxu0 %v2385_v12  ;;  %v2232_v12 = vld [vmem:[%s3204_s27 + $0x200] sm:$0xf]  ;;  %v2770_v3 = vld [vmem:[%s3204_s27 + $0xe8] sm:$0xf0]  ;;  %v1993_v8 = vor.u32 %v2746_v0, %v1992_v63 }
  0xb2   : > { %1729 = vmatpush.bf16.msrb.mxu1 %v2481_v13  ;;  %v2806_v13 = vld [vmem:[%s3204_s27 + $0x208] sm:$0xf0]  ;;  %v2089_v11 = vor.u32 %v2770_v3, %v2088_v1  ;;  %v2851_v3 = vld [vmem:[%s3204_s27 + $0x370] sm:$0xf0] }
  0xb3   : > { %1742 = vmatpush.bf16.msrb.mxu2 %v2577_v14  ;;  %v2328_v14 = vld [vmem:[%s3204_s27 + $0x2c0] sm:$0xf]  ;;  %v2926_v63 = vld [vmem:[%s3204_s27 + $0x5c8] sm:$0xf0] }
  0xb4   : > { %1755 = vmatpush.bf16.msrb.mxu3 %v2673_v21  ;;  %v2233_v21 = vor.u32 %v2806_v13, %v2232_v12  ;;  %v2329_v26 = vor.u32 %v2830_v15, %v2328_v14  ;;  %v2076_v13 = vld [vmem:[%s3204_s27 + $0xc8] sm:$0xf]  ;;  %v2767_v14 = vld [vmem:[%s3204_s27 + $0xd0] sm:$0xf0] }
  0xb5   : > { %1717 = vmatpush.bf16.msrb.mxu0 %v2373_v28  ;;  %v2220_v28 = vld [vmem:[%s3204_s27 + $0x1e8] sm:$0xf] }
  0xb6   : > { %1730 = vmatpush.bf16.msrb.mxu1 %v2469_v31  ;;  %v2827_v31 = vld [vmem:[%s3204_s27 + $0x2b0] sm:$0xf0]  ;;  %v2221_v34 = vor.u32 %v2803_v29, %v2220_v28  ;;  %v2172_v15 = vld [vmem:[%s3204_s27 + $0x188] sm:$0xf]  ;;  %v2884_v28 = vld [vmem:[%s3204_s27 + $0x478] sm:$0xf0] }
  0xb7   : > { %1743 = vmatpush.bf16.msrb.mxu2 %v2565_v32  ;;  %v2029_v32 = vor.u32 %v2755_v24, %v2028_v23  ;;  %v2317_v39 = vor.u32 %v2827_v31, %v2316_v30  ;;  %v2815_v23 = vld [vmem:[%s3204_s27 + $0x250] sm:$0xf0]  ;;  %v2448_v24 = vld [vmem:[%s3204_s27 + $0x3b0] sm:$0xf]  ;;  %v2908_v30 = vld [vmem:[%s3204_s27 + $0x538] sm:$0xf0]  ;;  %v2077_v31 = vor.u32 %v2767_v14, %v2076_v13 }
  0xb8   : > { %1756 = vmatpush.bf16.msrb.mxu3 %v2661_v36  ;;  %v2752_v36 = vld [vmem:[%s3204_s27 + $0x58] sm:$0xf0]  ;;  %v2640_v29 = vld [vmem:[%s3204_s27 + $0x530] sm:$0xf] }
  0xb9   : > { %1718 = vmatpush.bf16.msrb.mxu0 %v2361_v47  ;;  %v2824_v47 = vld [vmem:[%s3204_s27 + $0x298] sm:$0xf0]  ;;  %v2017_v48 = vor.u32 %v2752_v36, %v2016_v35  ;;  %v2449_v36 = vor.u32 %v2860_v25, %v2448_v24  ;;  %v2496_v13 = vld [vmem:[%s3204_s27 + $0x410] sm:$0xf] }
  0xba   : > { %1731 = vmatpush.bf16.msrb.mxu1 %v2457_v51  ;;  %v2004_v51 = vld [vmem:[%s3204_s27 + $0x38] sm:$0xf]  ;;  %v2305_v54 = vor.u32 %v2824_v47, %v2304_v46  ;;  %v2881_v47 = vld [vmem:[%s3204_s27 + $0x460] sm:$0xf0] }
  0xbb   : > { %1744 = vmatpush.bf16.msrb.mxu2 %v2553_v52  ;;  %v2749_v52 = vld [vmem:[%s3204_s27 + $0x40] sm:$0xf0] }
  0xbc   : > { %1757 = vmatpush.bf16.msrb.mxu3 %v2649_v55  ;;  %1719 = vmatmul.bf16.vlgmr.msrb.gmra.mxu0 %v3386_v41  ;;  %v2773_v55 = vld [vmem:[%s3204_s27 + $0x100] sm:$0xf0]  ;;  %v2005_v60 = vor.u32 %v2749_v52, %v2004_v51  ;;  %v2437_v52 = vor.u32 %v2857_v43, %v2436_v40 }
  0xbd   : > { %1763 = vmatpush.bf16.msra.mxu0 %v2065_v56  ;;  %1732 = vmatmul.bf16.vlgmr.msrb.gmra.mxu1 %v3390_v44  ;;  %v2196_v56 = vld [vmem:[%s3204_s27 + $0x1b8] sm:$0xf]  ;;  %v2101_v61 = vor.u32 %v2773_v55, %v2100_v53  ;;  %v2929_v51 = vld [vmem:[%s3204_s27 + $0x5e0] sm:$0xf0]  ;;  %v2533_v53 = vor.u32 %v2881_v47, %v2532_v45  ;;  %v2424_v55 = vld [vmem:[%s3204_s27 + $0x380] sm:$0xf] }
  0xbe   : > { %1776 = vmatpush.bf16.msra.mxu1 %v2161_v57  ;;  %1745 = vmatmul.bf16.vlgmr.msrb.gmra.mxu2 %v3382_v38  ;;  %v2797_v57 = vld [vmem:[%s3204_s27 + $0x1c0] sm:$0xf0]  ;;  %v2376_v45 = vld [vmem:[%s3204_s27 + $0x320] sm:$0xf] }
  0xbf   : > { %1789 = vmatpush.bf16.msra.mxu2 %v2257_v58  ;;  %1758 = vmatmul.bf16.vlgmr.msrb.gmra.mxu3 %v3388_v42  ;;  %v2292_v58 = vld [vmem:[%s3204_s27 + $0x278] sm:$0xf]  ;;  %v2472_v47 = vld [vmem:[%s3204_s27 + $0x3e0] sm:$0xf] }
  0xc0   : > { %1802 = vmatpush.bf16.msra.mxu3 %v2353_v62  ;;  %v2197_v62 = vor.u32 %v2797_v57, %v2196_v56  ;;  %v2293_v2 = vor.u32 %v2821_v59, %v2292_v58  ;;  %v2854_v56 = vld [vmem:[%s3204_s27 + $0x388] sm:$0xf0]  ;;  %v2520_v57 = vld [vmem:[%s3204_s27 + $0x440] sm:$0xf] }
  0xc1   : > { %1764 = vmatpush.bf16.msra.mxu0 %v2053_v4  ;;  %v2184_v4 = vld [vmem:[%s3204_s27 + $0x1a0] sm:$0xf]  ;;  %v2878_v59 = vld [vmem:[%s3204_s27 + $0x448] sm:$0xf0]  ;;  %v2425_v0 = vor.u32 %v2854_v56, %v2424_v55 }
  0xc2   : > { %1777 = vmatpush.bf16.msra.mxu1 %v2149_v5  ;;  %v2794_v5 = vld [vmem:[%s3204_s27 + $0x1a8] sm:$0xf0] }
  0xc3   : > { %1790 = vmatpush.bf16.msra.mxu2 %v2245_v6  ;;  %v2280_v6 = vld [vmem:[%s3204_s27 + $0x260] sm:$0xf]  ;;  %v2185_v12 = vor.u32 %v2794_v5, %v2184_v4  ;;  %v2508_v4 = vld [vmem:[%s3204_s27 + $0x428] sm:$0xf]  ;;  %v2875_v5 = vld [vmem:[%s3204_s27 + $0x430] sm:$0xf0] }
  0xc4   : > { %1803 = vmatpush.bf16.msra.mxu3 %v2341_v10  ;;  %v2743_v10 = vld [vmem:[%s3204_s27 + $0x10] sm:$0xf0] }
  0xc5   : > { %1765 = vmatpush.bf16.msra.mxu0 %v2041_v16  ;;  %v2281_v16 = vor.u32 %v2818_v7, %v2280_v6  ;;  %v1981_v27 = vor.u32 %v2743_v10, %v1980_v9  ;;  %v2899_v6 = vld [vmem:[%s3204_s27 + $0x4f0] sm:$0xf0]  ;;  %v2700_v7 = vld [vmem:[%s3204_s27 + $0x5a8] sm:$0xf]  ;;  %v2509_v9 = vor.u32 %v2875_v5, %v2508_v4 }
  0xc6   : > { %1778 = vmatpush.bf16.msra.mxu1 %v2137_v17  ;;  %v2791_v17 = vld [vmem:[%s3204_s27 + $0x190] sm:$0xf0] }
  0xc7   : > { %1791 = vmatpush.bf16.msra.mxu2 %v2233_v21  ;;  %v2268_v21 = vld [vmem:[%s3204_s27 + $0x248] sm:$0xf]  ;;  %v2911_v4 = vld [vmem:[%s3204_s27 + $0x550] sm:$0xf0] }
  0xc8   : > { %1804 = vmatpush.bf16.msra.mxu3 %v2329_v26  ;;  %v2544_v26 = vld [vmem:[%s3204_s27 + $0x470] sm:$0xf]  ;;  %v2269_v35 = vor.u32 %v2815_v23, %v2268_v21  ;;  %v2920_v23 = vld [vmem:[%s3204_s27 + $0x598] sm:$0xf0] }
  0xc9   : > { %1766 = vmatpush.bf16.msra.mxu0 %v2029_v32  ;;  %v2173_v32 = vor.u32 %v2791_v17, %v2172_v15  ;;  %v2545_v37 = vor.u32 %v2884_v28, %v2544_v26  ;;  %v2872_v15 = vld [vmem:[%s3204_s27 + $0x418] sm:$0xf0]  ;;  %v2688_v21 = vld [vmem:[%s3204_s27 + $0x590] sm:$0xf]  ;;  %v2845_v28 = vld [vmem:[%s3204_s27 + $0x340] sm:$0xf0] }
  0xca   : > { %1779 = vmatpush.bf16.msra.mxu1 %v2125_v33  ;;  %v2736_v33 = vld [vmem:[%s3204_s27 + $0x5f0] sm:$0xf]  ;;  %v2896_v17 = vld [vmem:[%s3204_s27 + $0x4d8] sm:$0xf0]  ;;  %v2497_v25 = vor.u32 %v2872_v15, %v2496_v13 }
  0xcb   : > { %1792 = vmatpush.bf16.msra.mxu2 %v2221_v34  ;;  %v2932_v34 = vld [vmem:[%s3204_s27 + $0x5f8] sm:$0xf0] }
  0xcc   : > { %1805 = vmatpush.bf16.msra.mxu3 %v2317_v39  ;;  %v2641_v39 = vor.u32 %v2908_v30, %v2640_v29  ;;  %v2737_v46 = vor.u32 %v2932_v34, %v2736_v33  ;;  %v2484_v29 = vld [vmem:[%s3204_s27 + $0x3f8] sm:$0xf]  ;;  %v2689_v30 = vor.u32 %v2920_v23, %v2688_v21  ;;  %v2893_v33 = vld [vmem:[%s3204_s27 + $0x4c0] sm:$0xf0] }
  0xcd   : > { %1767 = vmatpush.bf16.msra.mxu0 %v2017_v48  ;;  %v2628_v48 = vld [vmem:[%s3204_s27 + $0x518] sm:$0xf] }
  0xce   : > { %1780 = vmatpush.bf16.msra.mxu1 %v2113_v49  ;;  %v2905_v49 = vld [vmem:[%s3204_s27 + $0x520] sm:$0xf0]  ;;  %v2676_v34 = vld [vmem:[%s3204_s27 + $0x578] sm:$0xf] }
  0xcf   : > { %1793 = vmatpush.bf16.msra.mxu2 %v2209_v50  ;;  %v2724_v50 = vld [vmem:[%s3204_s27 + $0x5d8] sm:$0xf] }
  0xd0   : > { %1806 = vmatpush.bf16.msra.mxu3 %v2305_v54  ;;  %v2629_v54 = vor.u32 %v2905_v49, %v2628_v48  ;;  %v2725_v58 = vor.u32 %v2929_v51, %v2724_v50  ;;  %v2866_v50 = vld [vmem:[%s3204_s27 + $0x3e8] sm:$0xf0]  ;;  %v2568_v51 = vld [vmem:[%s3204_s27 + $0x4a0] sm:$0xf] }
  0xd1   : > { %1768 = vmatpush.bf16.msra.mxu0 %v2005_v60  ;;  %v2616_v60 = vld [vmem:[%s3204_s27 + $0x500] sm:$0xf] }
  0xd2   : > { %1781 = vmatpush.bf16.msra.mxu1 %v2101_v61  ;;  %v2902_v61 = vld [vmem:[%s3204_s27 + $0x508] sm:$0xf0] }
  0xd3   : > { %1794 = vmatpush.bf16.msra.mxu2 %v2197_v62  ;;  %v2712_v62 = vld [vmem:[%s3204_s27 + $0x5c0] sm:$0xf]  ;;  %v2617_v1 = vor.u32 %v2902_v61, %v2616_v60  ;;  %v2839_v60 = vld [vmem:[%s3204_s27 + $0x310] sm:$0xf0]  ;;  %v2460_v61 = vld [vmem:[%s3204_s27 + $0x3c8] sm:$0xf] }
  0xd4   : > { %1807 = vmatpush.bf16.msra.mxu3 %v2293_v2  ;;  %v2412_v2 = vld [vmem:[%s3204_s27 + $0x368] sm:$0xf] }
  0xd5   : > { %1769 = vmatpush.bf16.msra.mxu0 %v1993_v8  ;;  %v2413_v8 = vor.u32 %v2851_v3, %v2412_v2  ;;  %v2652_v3 = vld [vmem:[%s3204_s27 + $0x548] sm:$0xf] }
  0xd6   : > { %1782 = vmatpush.bf16.msra.mxu1 %v2089_v11  ;;  %v2400_v11 = vld [vmem:[%s3204_s27 + $0x350] sm:$0xf] }
  0xd7   : > { %1795 = vmatpush.bf16.msra.mxu2 %v2185_v12  ;;  %v2848_v12 = vld [vmem:[%s3204_s27 + $0x358] sm:$0xf0] }
  0xd8   : > { %1808 = vmatpush.bf16.msra.mxu3 %v2281_v16  ;;  %v2592_v16 = vld [vmem:[%s3204_s27 + $0x4d0] sm:$0xf]  ;;  %v2401_v24 = vor.u32 %v2848_v12, %v2400_v11 }
  0xd9   : > { %1770 = vmatpush.bf16.msra.mxu0 %v1981_v27  ;;  %v2593_v26 = vor.u32 %v2896_v17, %v2592_v16  ;;  %v2388_v27 = vld [vmem:[%s3204_s27 + $0x338] sm:$0xf] }
  0xda   : > { %1783 = vmatpush.bf16.msra.mxu1 %v2077_v31  ;;  %v2869_v31 = vld [vmem:[%s3204_s27 + $0x400] sm:$0xf0] }
  0xdb   : > { %1796 = vmatpush.bf16.msra.mxu2 %v2173_v32  ;;  %v2580_v32 = vld [vmem:[%s3204_s27 + $0x4b8] sm:$0xf]  ;;  %v2485_v40 = vor.u32 %v2869_v31, %v2484_v29 }
  0xdc   : > { %1809 = vmatpush.bf16.msra.mxu3 %v2269_v35  ;;  %1771 = vmatmul.bf16.vlgmr.msra.gmra.mxu0 %v3320_v19  ;;  %v2713_v19 = vor.u32 %v2926_v63, %v2712_v62  ;;  %v2917_v35 = vld [vmem:[%s3204_s27 + $0x580] sm:$0xf0]  ;;  %v2581_v43 = vor.u32 %v2893_v33, %v2580_v32 }
  0xdd   : > { %1815 = vmatpush.bf16.msrb.mxu0 %v2449_v36  ;;  %1784 = vmatmul.bf16.vlgmr.msra.gmra.mxu1 %v3324_v22  ;;  %v2923_v22 = vld [vmem:[%s3204_s27 + $0x5b0] sm:$0xf0]  ;;  %v2389_v36 = vor.u32 %v2845_v28, %v2388_v27  ;;  %v1577_v48 = vpop.f32.mrf.mxu1  ;;  %v2677_v49 = vor.u32 %v2917_v35, %v2676_v34 }
  0xde   : > { %1828 = vmatpush.bf16.msrb.mxu1 %v2545_v37  ;;  %1797 = vmatmul.bf16.vlgmr.msra.gmra.mxu2 %v3318_v18  ;;  %v2521_v18 = vor.u32 %v2878_v59, %v2520_v57  ;;  %v2701_v14 = vor.u32 %v2923_v22, %v2700_v7  ;;  %v3633_v37 = vld [vmem:[%s3210_s25] sm:$0x7]  ;;  %v2473_v57 = vor.u32 %v2866_v50, %v2472_v47  ;;  %v2364_v59 = vld [vmem:[%s3204_s27 + $0x308] sm:$0xf] }
  0xdf   : > { %1841 = vmatpush.bf16.msrb.mxu2 %v2641_v39  ;;  %1810 = vmatmul.bf16.vlgmr.msra.gmra.mxu3 %v3322_v20  ;;  %v2604_v20 = vld [vmem:[%s3204_s27 + $0x4e8] sm:$0xf]  ;;  %v1564_v39 = vpop.f32.mrf.mxu0  ;;  %v497_v55 = vperm.slane %v3633_v37, 0  ;;  %v2365_v5 = vor.u32 %v2839_v60, %v2364_v59  ;;  %v498_v33 = vperm.slane %v3633_v37, 1 }
  0xe0   : > { %1854 = vmatpush.bf16.msrb.mxu3 %v2737_v46  ;;  %v2605_v10 = vor.u32 %v2899_v6, %v2604_v20  ;;  %v2842_v46 = vld [vmem:[%s3204_s27 + $0x328] sm:$0xf0] }
  0xe1   : > { %1816 = vmatpush.bf16.msrb.mxu0 %v2437_v52  ;;  %v2890_v52 = vld [vmem:[%s3204_s27 + $0x4a8] sm:$0xf0]  ;;  %v2377_v56 = vor.u32 %v2842_v46, %v2376_v45  ;;  %v1590_v62 = vpop.f32.mrf.mxu2 }
  0xe2   : > { %1829 = vmatpush.bf16.msrb.mxu1 %v2533_v53  ;;  %v2664_v53 = vld [vmem:[%s3204_s27 + $0x560] sm:$0xf] }
  0xe3   : > { %1842 = vmatpush.bf16.msrb.mxu2 %v2629_v54  ;;  %v2914_v54 = vld [vmem:[%s3204_s27 + $0x568] sm:$0xf0] }
  0xe4   : > { %1855 = vmatpush.bf16.msrb.mxu3 %v2725_v58  ;;  %v2569_v58 = vor.u32 %v2890_v52, %v2568_v51  ;;  %v2665_v63 = vor.u32 %v2914_v54, %v2664_v53  ;;  %v1603_v2 = vpop.f32.mrf.mxu3 }
  0xe5   : > { %1817 = vmatpush.bf16.msrb.mxu0 %v2425_v0  ;;  %v2863_v0 = vld [vmem:[%s3204_s27 + $0x3d0] sm:$0xf0]  ;;  %v1579_v22 = vpop.f32.mrf.mxu1 }
  0xe6   : > { %1830 = vmatpush.bf16.msrb.mxu1 %v2521_v18  ;;  %v2556_v18 = vld [vmem:[%s3204_s27 + $0x488] sm:$0xf]  ;;  %v2461_v6 = vor.u32 %v2863_v0, %v2460_v61  ;;  %v499_v0 = vperm.slane %v3633_v37, 2 }
  0xe7   : > { %1843 = vmatpush.bf16.msrb.mxu2 %v2617_v1  ;;  %v2887_v1 = vld [vmem:[%s3204_s27 + $0x490] sm:$0xf0]  ;;  %v1566_v20 = vpop.f32.mrf.mxu0 }
  0xe8   : > { %1856 = vmatpush.bf16.msrb.mxu3 %v2713_v19  ;;  %v1565_v19 = vadd.f32 %v1564_v39, %v497_v55  ;;  %v2557_v7 = vor.u32 %v2887_v1, %v2556_v18 }
  0xe9   : > { %1818 = vmatpush.bf16.msrb.mxu0 %v2413_v8  ;;  %v2653_v8 = vor.u32 %v2911_v4, %v2652_v3 }
  0xea   : > { %1831 = vmatpush.bf16.msrb.mxu1 %v2509_v9  ;;  %v1578_v9 = vadd.f32 %v1577_v48, %v1565_v19 }
  0xeb   : > { %1844 = vmatpush.bf16.msrb.mxu2 %v2605_v10  ;;  %v1592_v10 = vpop.f32.mrf.mxu2 }
  0xec   : > { %1857 = vmatpush.bf16.msrb.mxu3 %v2701_v14  ;;  %v1605_v11 = vpop.f32.mrf.mxu3  ;;  %v1591_v12 = vadd.f32 %v1590_v62, %v1578_v9 }
  0xed   : > { %1819 = vmatpush.bf16.msrb.mxu0 %v2401_v24 }
  0xee   : > { %1832 = vmatpush.bf16.msrb.mxu1 %v2497_v25  ;;  %v1604_v13 = vadd.f32 %v1603_v2, %v1591_v12 }
  0xef   : > { %1845 = vmatpush.bf16.msrb.mxu2 %v2593_v26 }
  0xf0   : > { %1858 = vmatpush.bf16.msrb.mxu3 %v2689_v30 }
  0xf1   : > { %1820 = vmatpush.bf16.msrb.mxu0 %v2389_v36 }
  0xf2   : > { %1833 = vmatpush.bf16.msrb.mxu1 %v2485_v40 }
  0xf3   : > { %1846 = vmatpush.bf16.msrb.mxu2 %v2581_v43 }
  0xf4   : > { %1859 = vmatpush.bf16.msrb.mxu3 %v2677_v49 }
  0xf5   : > { %1821 = vmatpush.bf16.msrb.mxu0 %v2377_v56 }
  0xf6   : > { %1834 = vmatpush.bf16.msrb.mxu1 %v2473_v57 }
  0xf7   : > { %1847 = vmatpush.bf16.msrb.mxu2 %v2569_v58 }
  0xf8   : > { %1860 = vmatpush.bf16.msrb.mxu3 %v2665_v63 }
  0xf9   : > { %1822 = vmatpush.bf16.msrb.mxu0 %v2365_v5  ;;  %v1616_v14 = vpop.f32.mrf.mxu0 }
  0xfa   : > { %1835 = vmatpush.bf16.msrb.mxu1 %v2461_v6  ;;  %v1617_v15 = vadd.f32 %v1616_v14, %v1604_v13  ;;  %v1629_v16 = vpop.f32.mrf.mxu1 }
  0xfb   : > { %1848 = vmatpush.bf16.msrb.mxu2 %v2557_v7 }
  0xfc   : > { %1861 = vmatpush.bf16.msrb.mxu3 %v2653_v8  ;;  %1823 = vmatmul.bf16.vlgmr.msrb.gmra.mxu0 %v3386_v41  ;;  %v1630_v17 = vadd.f32 %v1629_v16, %v1617_v15 }
  0xfd   : > { %1836 = vmatmul.bf16.vlgmr.msrb.gmra.mxu1 %v3390_v44 }
  0xfe   : > { %1849 = vmatmul.bf16.vlgmr.msrb.gmra.mxu2 %v3382_v38 }
  0xff   : > { %1862 = vmatmul.bf16.vlgmr.msrb.gmra.mxu3 %v3388_v42 }
 0x101   : > { %v1642_v21 = vpop.f32.mrf.mxu2  ;;  %v1618_v25 = vpop.f32.mrf.mxu0 }
 0x102   : > { %v1643_v23 = vadd.f32 %v1642_v21, %v1630_v17  ;;  %v1655_v24 = vpop.f32.mrf.mxu3  ;;  %v1631_v26 = vpop.f32.mrf.mxu1 }
 0x104   : > { %v1656_v41 = vadd.f32 %v1655_v24, %v1643_v23 }
 0x106   : > { %2984 = vtanh.f32 %v1656_v41 }
 0x109   : > { %v1644_v38 = vpop.f32.mrf.mxu2 }
 0x10a   : > { %v1657_v42 = vpop.f32.mrf.mxu3 }
 0x10c   : > { %v2985_v44 = vpop.eup %2984 }
 0x10d   : > { %1870 = vst [vmem:[%s3661_s15] sm:$0xff] %v2985_v44 }
 0x119   : > { %v1668_v27 = vpop.f32.mrf.mxu0 }
 0x11a   : > { %v1681_v28 = vpop.f32.mrf.mxu1  ;;  %v1669_v36 = vadd.f32 %v1668_v27, %v498_v33 }
 0x11c   : > { %v1682_v39 = vadd.f32 %v1681_v28, %v1669_v36 }
 0x121   : > { %v1694_v29 = vpop.f32.mrf.mxu2  ;;  %v1670_v31 = vpop.f32.mrf.mxu0 }
 0x122   : > { %v1707_v30 = vpop.f32.mrf.mxu3  ;;  %v1683_v32 = vpop.f32.mrf.mxu1  ;;  %v1695_v40 = vadd.f32 %v1694_v29, %v1682_v39 }
 0x124   : > { %v1708_v43 = vadd.f32 %v1707_v30, %v1695_v40 }
 0x129   : > { %v1696_v34 = vpop.f32.mrf.mxu2 }
 0x12a   : > { %v1709_v35 = vpop.f32.mrf.mxu3 }
 0x139   : > { %v1720_v45 = vpop.f32.mrf.mxu0 }
 0x13a   : > { %v1721_v46 = vadd.f32 %v1720_v45, %v1708_v43  ;;  %v1733_v47 = vpop.f32.mrf.mxu1 }
 0x13c   : > { %v1734_v48 = vadd.f32 %v1733_v47, %v1721_v46 }
 0x141   : > { %v1746_v49 = vpop.f32.mrf.mxu2  ;;  %v1722_v53 = vpop.f32.mrf.mxu0 }
 0x142   : > { %v1747_v50 = vadd.f32 %v1746_v49, %v1734_v48  ;;  %v1759_v51 = vpop.f32.mrf.mxu3  ;;  %v1735_v54 = vpop.f32.mrf.mxu1 }
 0x144   : > { %v1760_v52 = vadd.f32 %v1759_v51, %v1747_v50 }
 0x146   : > { %2986 = vtanh.f32 %v1760_v52 }
 0x149   : > { %v1748_v55 = vpop.f32.mrf.mxu2 }
 0x14a   : > { %v1761_v56 = vpop.f32.mrf.mxu3 }
 0x14c   : > { %v2987_v57 = vpop.eup %2986 }
 0x14d   : > { %1871 = vst [vmem:[%s3661_s15 + $0x8] sm:$0xff] %v2987_v57 }
 0x159   : > { %v1772_v58 = vpop.f32.mrf.mxu0 }
 0x15a   : > { %v1785_v59 = vpop.f32.mrf.mxu1  ;;  %v1773_v2 = vadd.f32 %v1772_v58, %v499_v0 }
 0x15c   : > { %v1786_v3 = vadd.f32 %v1785_v59, %v1773_v2 }
 0x161   : > { %v1798_v60 = vpop.f32.mrf.mxu2  ;;  %v1774_v62 = vpop.f32.mrf.mxu0 }
 0x162   : > { %v1811_v61 = vpop.f32.mrf.mxu3  ;;  %v1787_v63 = vpop.f32.mrf.mxu1  ;;  %v1799_v4 = vadd.f32 %v1798_v60, %v1786_v3 }
 0x164   : > { %v1812_v19 = vadd.f32 %v1811_v61, %v1799_v4 }
 0x169   : > { %v1800_v18 = vpop.f32.mrf.mxu2 }
 0x16a   : > { %v1813_v1 = vpop.f32.mrf.mxu3 }
 0x179   : > { %v1824_v5 = vpop.f32.mrf.mxu0 }
 0x17a   : > { %v1837_v20 = vpop.f32.mrf.mxu1  ;;  %v1825_v6 = vadd.f32 %v1824_v5, %v1812_v19 }
 0x17c   : > { %v1838_v7 = vadd.f32 %v1837_v20, %v1825_v6 }
 0x181   : > { %v1850_v22 = vpop.f32.mrf.mxu2  ;;  %v1826_v10 = vpop.f32.mrf.mxu0 }
 0x182   : > { %v1851_v8 = vadd.f32 %v1850_v22, %v1838_v7  ;;  %v1863_v9 = vpop.f32.mrf.mxu3  ;;  %v1839_v11 = vpop.f32.mrf.mxu1 }
 0x184   : > { %v1864_v12 = vadd.f32 %v1863_v9, %v1851_v8 }
 0x186   : > { %2988 = vtanh.f32 %v1864_v12 }
 0x189   : > { %v1852_v13 = vpop.f32.mrf.mxu2 }
 0x18a   : > { %v1865_v37 = vpop.f32.mrf.mxu3 }
 0x18c   : > { %v2989_v14 = vpop.eup %2988 }
 0x18d   : > { %1872 = vst [vmem:[%s3661_s15 + $0x10] sm:$0xff] %v2989_v14 }
 0x18e PF: > { %p16_p8 = scmp.ge.s32.totalorder %s3133_s17, 4   ;;  %s3688_s12 = smov %s3080_s13 }
 0x18f   : > { %s3689_s13 = smov %s3084_s14  ;;  %s3690_s14 = smov %s3143_s20 }
 0x190   : > { %s3691_s15 = smov %s3133_s17  ;;  %18 = sbr.rel (!%p16_p8) target bundleno = 5 (0x5), region = 85 }
 0x195   :  { %1895 = vsyncpa [#allocation3], 1 }
 0x196   :  { %1897 = vsyncpa [#allocation3 + $0x1], 1 }
 0x197   :  { %1898 = vsyncpa [#allocation5], 1 }
 0x198   :  { %1900 = vsyncpa [#allocation5 + $0x1], 1 }

// kernel: generator_forward.2
= control target key start
LH: loop header
LB: loop body
LE: loop exit
PB: predicated region body
PF: predicated region fallthrough
CT: control target
= control target key end

     0   :  { %20 = vsyncpa [#allocation3], 0  ;;  %s6157_s0 = inlined_call_operand.vmem [shape: f32[8,128], index: 0, kind: input, shape index: {}]   ;;  %s6158_s1 = inlined_call_operand.hbm [shape: bf16[128,128], index: 1, kind: input, shape index: {}]   ;;  %s6159_s2 = inlined_call_operand.hbm [shape: f32[1,128], index: 2, kind: input, shape index: {}]   ;;  %s6160_s3 = inlined_call_operand.hbm [shape: bf16[128,256], index: 3, kind: input, shape index: {}]   ;;  %s6161_s4 = inlined_call_operand.hbm [shape: f32[1,256], index: 4, kind: input, shape index: {}]   ;;  %s6162_s5 = inlined_call_operand.hbm [shape: f32[1,256], index: 5, kind: input, shape index: {}]   ;;  %s6163_s6 = inlined_call_operand.hbm [shape: f32[1,256], index: 6, kind: input, shape index: {}]   ;;  %s6164_s7 = inlined_call_operand.hbm [shape: bf16[256,512], index: 7, kind: input, shape index: {}]   ;;  %s6165_s8 = inlined_call_operand.hbm [shape: f32[1,512], index: 8, kind: input, shape index: {}]   ;;  %s6166_s9 = inlined_call_operand.hbm [shape: f32[1,512], index: 9, kind: input, shape index: {}]   ;;  %s6167_s10 = inlined_call_operand.hbm [shape: f32[1,512], index: 10, kind: input, shape index: {}]   ;;  %s6168_s11 = inlined_call_operand.hbm [shape: bf16[512,1024], index: 11, kind: input, shape index: {}]   ;;  %s6169_s12 = inlined_call_operand.hbm [shape: f32[1,1024], index: 12, kind: input, shape index: {}]   ;;  %s6170_s13 = inlined_call_operand.hbm [shape: f32[1,1024], index: 13, kind: input, shape index: {}]   ;;  %s6171_s14 = inlined_call_operand.hbm [shape: f32[1,1024], index: 14, kind: input, shape index: {}]   ;;  %s6172_s15 = inlined_call_operand.vmem [shape: bf16[8,1024], index: 15, kind: output, shape index: {}]  }
   0x1   :  { %21 = vsyncpa [#allocation5], 0 }
   0x2   :  { %22 = vsyncpa [#allocation8], 0 }
   0x3   :  { %23 = vsyncpa [#allocation11], 0 }
   0x4   :  { %24 = vsyncpa [#allocation14], 0 }
   0x5   :  { %25 = vsyncpa [#allocation17], 0 }
   0x6   :  { %26 = vsyncpa [#allocation20], 0  ;;  %s48_s20 = sshll.u32 %s6159_s2, 4  ;;  %s49_s20 = int_to_ptr.hbm [resolvable:$true] %s48_s20 }
   0x7   :  { %27 = vsyncpa [#allocation23], 0  ;;  %s5649_s21 = smov [#allocation4]   ;;  %s72_s25 = sshll.u32 %s6161_s4, 4  ;;  %s73_s25 = int_to_ptr.hbm [resolvable:$true] %s72_s25 }
   0x8   :  { %s50_s22 = sshll.u32 %s5649_s21, 4  ;;  %s5650_s26 = smov [#allocation7]   ;;  %s51_s22 = int_to_ptr.vmem [resolvable:$true] %s50_s22 }
   0x9   :  { %53 = dma.hbm_to_vmem [thread:$0]  %s49_s20, 16, %s51_s22, [#allocation5]  }
   0xa   :  { %s74_s27 = sshll.u32 %s5650_s26, 4  ;;  %s94_s30 = sshll.u32 %s6163_s6, 4  ;;  %s75_s27 = int_to_ptr.vmem [resolvable:$true] %s74_s27  ;;  %s95_s30 = int_to_ptr.hbm [resolvable:$true] %s94_s30 }
   0xb   :  { %77 = dma.hbm_to_vmem [thread:$0]  %s73_s25, 32, %s75_s27, [#allocation8]  }
   0xc   :  { %s118_s17 = sshll.u32 %s6165_s8, 4  ;;  %s5651_s18 = smov [#allocation10]   ;;  %s119_s17 = int_to_ptr.hbm [resolvable:$true] %s118_s17 }
   0xd   :  { %s96_s19 = sshll.u32 %s5651_s18, 4  ;;  %s5652_s4 = smov [#allocation13]   ;;  %s97_s19 = int_to_ptr.vmem [resolvable:$true] %s96_s19 }
   0xe   :  { %99 = dma.hbm_to_vmem [thread:$0]  %s95_s30, 32, %s97_s19, [#allocation11]  }
   0xf   :  { %s120_s20 = sshll.u32 %s5652_s4, 4  ;;  %s140_s23 = sshll.u32 %s6167_s10, 4  ;;  %s121_s20 = int_to_ptr.vmem [resolvable:$true] %s120_s20  ;;  %s141_s23 = int_to_ptr.hbm [resolvable:$true] %s140_s23 }
  0x10   :  { %123 = dma.hbm_to_vmem [thread:$0]  %s119_s17, 64, %s121_s20, [#allocation14]  }
  0x11   :  { %s164_s25 = sshll.u32 %s6169_s12, 4  ;;  %s5653_s26 = smov [#allocation16]   ;;  %s165_s25 = int_to_ptr.hbm [resolvable:$true] %s164_s25 }
  0x12   :  { %s142_s8 = sshll.u32 %s5653_s26, 4  ;;  %s5654_s27 = smov [#allocation19]   ;;  %s143_s8 = int_to_ptr.vmem [resolvable:$true] %s142_s8 }
  0x13   :  { %145 = dma.hbm_to_vmem [thread:$0]  %s141_s23, 64, %s143_s8, [#allocation17]  }
  0x14   :  { %s166_s28 = sshll.u32 %s5654_s27, 4  ;;  %s34_s2 = sshll.u32 %s6158_s1, 4  ;;  %s167_s28 = int_to_ptr.vmem [resolvable:$true] %s166_s28  ;;  %s35_s2 = int_to_ptr.hbm [resolvable:$true] %s34_s2 }
  0x15   :  { %169 = dma.hbm_to_vmem [thread:$0]  %s165_s25, 128, %s167_s28, [#allocation20]  }
  0x16   :  { %s5655_s10 = smov [#allocation2]   ;;  %s58_s12 = sshll.u32 %s6160_s3, 4  ;;  %s59_s12 = int_to_ptr.hbm [resolvable:$true] %s58_s12 }
  0x17   :  { %s36_s16 = sshll.u32 %s5655_s10, 4  ;;  %s5656_s19 = smov 64   ;;  %s37_s16 = int_to_ptr.vmem [resolvable:$true] %s36_s16 }
  0x18   :  { %s5657_s4 = smov 4   ;;  %s5658_s20 = smov [#allocation6]  }
  0x19   :  { %42 = dma.hbm_to_vmem [thread:$0]  %s35_s2, 1024, %s37_s16, [#allocation3], %s5656_s19, %s5656_s19, %s5657_s4  }
  0x1a   :  { %s60_s21 = sshll.u32 %s5658_s20, 4  ;;  %s5659_s22 = smov 128   ;;  %s61_s21 = int_to_ptr.vmem [resolvable:$true] %s60_s21 }
  0x1b   :  { %s5660_s23 = smov 8   ;;  %s83_s24 = sshll.u32 %s6162_s5, 4  ;;  %s84_s24 = int_to_ptr.hbm [resolvable:$true] %s83_s24 }
  0x1c   :  { %66 = dma.hbm_to_vmem [thread:$0]  %s59_s12, 2048, %s61_s21, [#allocation5], %s5659_s22, %s5659_s22, %s5660_s23  }
  0x1d   :  { %s5661_s25 = smov [#allocation9]   ;;  %s104_s27 = sshll.u32 %s6164_s7, 4  ;;  %s105_s27 = int_to_ptr.hbm [resolvable:$true] %s104_s27 }
  0x1e   :  { %s85_s26 = sshll.u32 %s5661_s25, 4  ;;  %s5662_s28 = smov [#allocation12]   ;;  %s86_s26 = int_to_ptr.vmem [resolvable:$true] %s85_s26 }
  0x1f   :  { %88 = dma.hbm_to_vmem [thread:$0]  %s84_s24, 32, %s86_s26, [#allocation8]  }
  0x20   :  { %s106_s29 = sshll.u32 %s5662_s28, 4  ;;  %s5663_s30 = smov 256   ;;  %s107_s29 = int_to_ptr.vmem [resolvable:$true] %s106_s29 }
  0x21   :  { %s5664_s2 = smov 16   ;;  %s129_s5 = sshll.u32 %s6166_s9, 4  ;;  %s130_s5 = int_to_ptr.hbm [resolvable:$true] %s129_s5 }
  0x22   :  { %112 = dma.hbm_to_vmem [thread:$0]  %s105_s27, 8192, %s107_s29, [#allocation11], %s5663_s30, %s5663_s30, %s5664_s2  }
  0x23   :  { %s5665_s17 = smov [#allocation15]   ;;  %s150_s7 = sshll.u32 %s6168_s11, 4  ;;  %s151_s7 = int_to_ptr.hbm [resolvable:$true] %s150_s7 }
  0x24   :  { %s131_s18 = sshll.u32 %s5665_s17, 4  ;;  %s5666_s4 = smov [#allocation18]   ;;  %s132_s18 = int_to_ptr.vmem [resolvable:$true] %s131_s18 }
  0x25   :  { %134 = dma.hbm_to_vmem [thread:$0]  %s130_s5, 64, %s132_s18, [#allocation14]  }
  0x26   :  { %s152_s20 = sshll.u32 %s5666_s4, 4  ;;  %s5667_s21 = smov 512   ;;  %s153_s20 = int_to_ptr.vmem [resolvable:$true] %s152_s20 }
  0x27   :  { %s5668_s22 = smov 32   ;;  %s175_s9 = sshll.u32 %s6170_s13, 4  ;;  %s176_s9 = int_to_ptr.hbm [resolvable:$true] %s175_s9 }
  0x28   :  { %158 = dma.hbm_to_vmem [thread:$0]  %s151_s7, 32768, %s153_s20, [#allocation17], %s5667_s21, %s5667_s21, %s5668_s22  }
  0x29   :  { %s5669_s6 = smov [#allocation21]   ;;  %s186_s11 = sshll.u32 %s6171_s14, 4  ;;  %s187_s11 = int_to_ptr.hbm [resolvable:$true] %s186_s11 }
  0x2a   :  { %s177_s24 = sshll.u32 %s5669_s6, 4  ;;  %s5670_s8 = smov [#allocation22]   ;;  %s178_s24 = int_to_ptr.vmem [resolvable:$true] %s177_s24 }
  0x2b   :  { %180 = dma.hbm_to_vmem [thread:$0]  %s176_s9, 128, %s178_s24, [#allocation20]  }
  0x2c   :  { %s188_s3 = sshll.u32 %s5670_s8, 4  ;;  %s189_s3 = int_to_ptr.vmem [resolvable:$true] %s188_s3 }
  0x2d   :  { %191 = dma.hbm_to_vmem [thread:$0]  %s187_s11, 128, %s189_s3, [#allocation23]  }
  0x2e   :  { %5633 = dma.done.wait [#allocation3], 1024  }
  0x2f   :  { %5634 = vsyncadd [#allocation3], 4294966272 }
  0x30   :  { %5635 = dma.done.wait [#allocation5], 2064  }
  0x31   :  { %5636 = vsyncadd [#allocation5], 4294965232 }
  0x32   :  { %5637 = dma.done.wait [#allocation8], 64  }
  0x33   :  { %5638 = vsyncadd [#allocation8], 4294967232 }
  0x34   :  { %5639 = dma.done.wait [#allocation11], 8224  }
  0x35   :  { %5640 = vsyncadd [#allocation11], 4294959072 }
  0x36   :  { %5641 = dma.done.wait [#allocation14], 128  }
  0x37   :  { %5642 = vsyncadd [#allocation14], 4294967168 }
  0x38   :  { %5643 = dma.done.wait [#allocation17], 32832  }
  0x39   :  { %5644 = vsyncadd [#allocation17], 4294934464 }
  0x3a   :  { %5645 = dma.done.wait [#allocation20], 256  }
  0x3b   :  { %5646 = vsyncadd [#allocation20], 4294967040 }
  0x3c   :  { %5647 = dma.done.wait [#allocation23], 128  }
  0x3d   :  { %5648 = vsyncadd [#allocation23], 4294967168  ;;  %v4905_v0 = vld [vmem:[#allocation2 + $0x38] sm:$0xff]  ;;  %v4904_v1 = vld [vmem:[#allocation2 + $0x30] sm:$0xff] }
  0x3e   :  { %318 = vmatpush.bf16.msra.mxu0 %v4905_v0  ;;  %v3612_v2 = vld [vmem:[#allocation6 + $0x70] sm:$0xf]  ;;  %v4921_v3 = vld [vmem:[#allocation6 + $0x74] sm:$0xf0]  ;;  %v4920_v4 = vld [vmem:[#allocation6 + $0x74] sm:$0xf] }
  0x3f   :  { %v3613_v5 = vor.u32 %v4921_v3, %v3612_v2  ;;  %v3614_v6 = vld [vmem:[#allocation6 + $0x78] sm:$0xf0]  ;;  %v3604_v7 = vld [vmem:[#allocation6 + $0x60] sm:$0xf]  ;;  %v4919_v8 = vld [vmem:[#allocation6 + $0x64] sm:$0xf0] }
  0x40   :  { %v3617_v9 = vor.u32 %v4920_v4, %v3614_v6  ;;  %v4918_v10 = vld [vmem:[#allocation6 + $0x64] sm:$0xf]  ;;  %v3606_v11 = vld [vmem:[#allocation6 + $0x68] sm:$0xf0]  ;;  %v3605_v13 = vor.u32 %v4919_v8, %v3604_v7  ;;  %v3596_v15 = vld [vmem:[#allocation6 + $0x50] sm:$0xf] }
  0x41   :  { %v4903_v12 = vld [vmem:[#allocation2 + $0x28] sm:$0xff]  ;;  %437 = vmatpush.bf16.msra.mxu1 %v3613_v5  ;;  %v3609_v14 = vor.u32 %v4918_v10, %v3606_v11  ;;  %v4917_v16 = vld [vmem:[#allocation6 + $0x54] sm:$0xf0]  ;;  %v4916_v17 = vld [vmem:[#allocation6 + $0x54] sm:$0xf] }
  0x42   :  { %319 = vmatpush.bf16.msra.mxu0 %v4904_v1  ;;  %450 = vmatpush.bf16.msra.mxu2 %v3617_v9  ;;  %v3598_v18 = vld [vmem:[#allocation6 + $0x58] sm:$0xf0]  ;;  %v3597_v20 = vor.u32 %v4917_v16, %v3596_v15  ;;  %v3588_v22 = vld [vmem:[#allocation6 + $0x40] sm:$0xf]  ;;  %v4915_v23 = vld [vmem:[#allocation6 + $0x44] sm:$0xf0] }
  0x43   :  { %v4902_v19 = vld [vmem:[#allocation2 + $0x20] sm:$0xff]  ;;  %v3601_v21 = vor.u32 %v4916_v17, %v3598_v18  ;;  %v3590_v25 = vld [vmem:[#allocation6 + $0x48] sm:$0xf0]  ;;  %v4901_v26 = vld [vmem:[#allocation2 + $0x18] sm:$0xff]  ;;  %v3589_v27 = vor.u32 %v4915_v23, %v3588_v22 }
  0x44   :  { %v4914_v24 = vld [vmem:[#allocation6 + $0x44] sm:$0xf]  ;;  %v3580_v29 = vld [vmem:[#allocation6 + $0x30] sm:$0xf]  ;;  %v4913_v30 = vld [vmem:[#allocation6 + $0x34] sm:$0xf0] }
  0x45   :  { %438 = vmatpush.bf16.msra.mxu1 %v3605_v13  ;;  %v3593_v28 = vor.u32 %v4914_v24, %v3590_v25  ;;  %v4912_v31 = vld [vmem:[#allocation6 + $0x34] sm:$0xf]  ;;  %v3582_v32 = vld [vmem:[#allocation6 + $0x38] sm:$0xf0]  ;;  %v3581_v34 = vor.u32 %v4913_v30, %v3580_v29  ;;  %v3572_v36 = vld [vmem:[#allocation6 + $0x20] sm:$0xf] }
  0x46   :  { %320 = vmatpush.bf16.msra.mxu0 %v4903_v12  ;;  %451 = vmatpush.bf16.msra.mxu2 %v3609_v14  ;;  %v4900_v33 = vld [vmem:[#allocation2 + $0x10] sm:$0xff]  ;;  %v3585_v35 = vor.u32 %v4912_v31, %v3582_v32  ;;  %v4911_v37 = vld [vmem:[#allocation6 + $0x24] sm:$0xf0]  ;;  %v4910_v38 = vld [vmem:[#allocation6 + $0x24] sm:$0xf] }
  0x47   :  { %v3574_v39 = vld [vmem:[#allocation6 + $0x28] sm:$0xf0]  ;;  %v3573_v41 = vor.u32 %v4911_v37, %v3572_v36  ;;  %v4898_v43 = vld [vmem:[#allocation2] sm:$0xff]  ;;  %v3564_v46 = vld [vmem:[#allocation6 + $0x10] sm:$0xf]  ;;  %v5671_v36 = vmov 8.0  }
  0x48   :  { %v4899_v40 = vld [vmem:[#allocation2 + $0x8] sm:$0xff]  ;;  %v3577_v42 = vor.u32 %v4910_v38, %v3574_v39  ;;  %v248_v44 = vld [vmem:[%s6157_s0] sm:$0xff]  ;;  %v4909_v47 = vld [vmem:[#allocation6 + $0x14] sm:$0xf0]  ;;  %5266 = vrcp.f32 %v5671_v36 }
  0x49   :  { %439 = vmatpush.bf16.msra.mxu1 %v3597_v20  ;;  %v249_v45 = vpack.c.bf16 %v248_v44, %v248_v44  ;;  %v4908_v48 = vld [vmem:[#allocation6 + $0x14] sm:$0xf]  ;;  %v3565_v49 = vor.u32 %v4909_v47, %v3564_v46  ;;  %v3566_v50 = vld [vmem:[#allocation6 + $0x18] sm:$0xf0]  ;;  %v3556_v52 = vld [vmem:[#allocation6] sm:$0xf] }
  0x4a   :  { %321 = vmatpush.bf16.msra.mxu0 %v4902_v19  ;;  %452 = vmatpush.bf16.msra.mxu2 %v3601_v21  ;;  %v3569_v51 = vor.u32 %v4908_v48, %v3566_v50  ;;  %v4907_v53 = vld [vmem:[#allocation6 + $0x4] sm:$0xf0]  ;;  %v4906_v54 = vld [vmem:[#allocation6 + $0x4] sm:$0xf]  ;;  %v3558_v56 = vld [vmem:[#allocation6 + $0x8] sm:$0xf0] }
  0x4b   :  { %v3557_v55 = vor.u32 %v4907_v53, %v3556_v52  ;;  %v3561_v57 = vor.u32 %v4906_v54, %v3558_v56  ;;  %v5265_v58 = vld [vmem:[#allocation4] ss:$0 sm:$0xff]  ;;  %v3732_v1 = vld [vmem:[#allocation12 + $0xe0] sm:$0xf]  ;;  %v4952_v2 = vld [vmem:[#allocation12 + $0xec] sm:$0xf0] }
  0x4c   :  { %v4950_v3 = vld [vmem:[#allocation12 + $0xe4] sm:$0xf]  ;;  %v3733_v4 = vor.u32 %v4952_v2, %v3732_v1  ;;  %v3734_v5 = vld [vmem:[#allocation12 + $0xf0] sm:$0xf0]  ;;  %v3716_v7 = vld [vmem:[#allocation12 + $0xc0] sm:$0xf] }
  0x4d   :  { %440 = vmatpush.bf16.msra.mxu1 %v3589_v27  ;;  %v3737_v6 = vor.u32 %v4950_v3, %v3734_v5  ;;  %v4948_v8 = vld [vmem:[#allocation12 + $0xcc] sm:$0xf0]  ;;  %v4946_v10 = vld [vmem:[#allocation12 + $0xc4] sm:$0xf]  ;;  %v3718_v11 = vld [vmem:[#allocation12 + $0xd0] sm:$0xf0] }
  0x4e   :  { %322 = vmatpush.bf16.msra.mxu0 %v4901_v26  ;;  %453 = vmatpush.bf16.msra.mxu2 %v3593_v28  ;;  %v3717_v9 = vor.u32 %v4948_v8, %v3716_v7  ;;  %v3721_v12 = vor.u32 %v4946_v10, %v3718_v11  ;;  %v3860_v13 = vld [vmem:[#allocation12 + $0x1e0] sm:$0xf]  ;;  %v4984_v14 = vld [vmem:[#allocation12 + $0x1ec] sm:$0xf0]  ;;  %v4982_v15 = vld [vmem:[#allocation12 + $0x1e4] sm:$0xf] }
  0x4f   :  { %948 = vmatpush.bf16.msra.mxu3 %v3733_v4  ;;  %v3861_v16 = vor.u32 %v4984_v14, %v3860_v13  ;;  %v3862_v17 = vld [vmem:[#allocation12 + $0x1f0] sm:$0xf0]  ;;  %v3700_v19 = vld [vmem:[#allocation12 + $0xa0] sm:$0xf]  ;;  %v4944_v20 = vld [vmem:[#allocation12 + $0xac] sm:$0xf0] }
  0x50   :  { %v3865_v18 = vor.u32 %v4982_v15, %v3862_v17  ;;  %v4942_v21 = vld [vmem:[#allocation12 + $0xa4] sm:$0xf]  ;;  %v3701_v22 = vor.u32 %v4944_v20, %v3700_v19  ;;  %v3702_v23 = vld [vmem:[#allocation12 + $0xb0] sm:$0xf0]  ;;  %v3844_v25 = vld [vmem:[#allocation12 + $0x1c0] sm:$0xf] }
  0x51   :  { %441 = vmatpush.bf16.msra.mxu1 %v3581_v34  ;;  %v3705_v24 = vor.u32 %v4942_v21, %v3702_v23  ;;  %v4980_v26 = vld [vmem:[#allocation12 + $0x1cc] sm:$0xf0]  ;;  %v4978_v27 = vld [vmem:[#allocation12 + $0x1c4] sm:$0xf]  ;;  %v3846_v29 = vld [vmem:[#allocation12 + $0x1d0] sm:$0xf0] }
  0x52   :  { %323 = vmatpush.bf16.msra.mxu0 %v4900_v33  ;;  %454 = vmatpush.bf16.msra.mxu2 %v3585_v35  ;;  %v3845_v28 = vor.u32 %v4980_v26, %v3844_v25  ;;  %v3849_v30 = vor.u32 %v4978_v27, %v3846_v29  ;;  %v3684_v31 = vld [vmem:[#allocation12 + $0x80] sm:$0xf]  ;;  %v4940_v32 = vld [vmem:[#allocation12 + $0x8c] sm:$0xf0]  ;;  %v4938_v34 = vld [vmem:[#allocation12 + $0x84] sm:$0xf] }
  0x53   :  { %949 = vmatpush.bf16.msra.mxu3 %v3717_v9  ;;  %v3685_v33 = vor.u32 %v4940_v32, %v3684_v31  ;;  %v3686_v35 = vld [vmem:[#allocation12 + $0x90] sm:$0xf0]  ;;  %v3828_v38 = vld [vmem:[#allocation12 + $0x1a0] sm:$0xf]  ;;  %v4976_v39 = vld [vmem:[#allocation12 + $0x1ac] sm:$0xf0] }
  0x54   :  { %v3689_v37 = vor.u32 %v4938_v34, %v3686_v35  ;;  %v3668_v44 = vld [vmem:[#allocation12 + $0x60] sm:$0xf]  ;;  %v4934_v46 = vld [vmem:[#allocation12 + $0x64] sm:$0xf]  ;;  %v3670_v48 = vld [vmem:[#allocation12 + $0x70] sm:$0xf0] }
  0x55   :  { %442 = vmatpush.bf16.msra.mxu1 %v3573_v41  ;;  %v3829_v41 = vor.u32 %v4976_v39, %v3828_v38  ;;  %v3812_v50 = vld [vmem:[#allocation12 + $0x180] sm:$0xf]  ;;  %v4970_v52 = vld [vmem:[#allocation12 + $0x184] sm:$0xf]  ;;  %v3814_v54 = vld [vmem:[#allocation12 + $0x190] sm:$0xf0] }
  0x56   :  { %324 = vmatpush.bf16.msra.mxu0 %v4899_v40  ;;  %455 = vmatpush.bf16.msra.mxu2 %v3577_v42  ;;  %v4974_v40 = vld [vmem:[#allocation12 + $0x1a4] sm:$0xf]  ;;  %v3830_v42 = vld [vmem:[#allocation12 + $0x1b0] sm:$0xf0]  ;;  %v3817_v56 = vor.u32 %v4970_v52, %v3814_v54  ;;  %v4968_v1 = vld [vmem:[#allocation12 + $0x16c] sm:$0xf0] }
  0x57   :  { %950 = vmatpush.bf16.msra.mxu3 %v3701_v22  ;;  %v4966_v2 = vld [vmem:[#allocation12 + $0x164] sm:$0xf]  ;;  %v3798_v5 = vld [vmem:[#allocation12 + $0x170] sm:$0xf0]  ;;  %v3636_v7 = vld [vmem:[#allocation12 + $0x20] sm:$0xf] }
  0x58   :  { %v4928_v8 = vld [vmem:[#allocation12 + $0x2c] sm:$0xf0]  ;;  %v4926_v9 = vld [vmem:[#allocation12 + $0x24] sm:$0xf]  ;;  %v3780_v14 = vld [vmem:[#allocation12 + $0x140] sm:$0xf] }
  0x59   :  { %443 = vmatpush.bf16.msra.mxu1 %v3565_v49  ;;  %v3673_v49 = vor.u32 %v4934_v46, %v3670_v48  ;;  %v3637_v11 = vor.u32 %v4928_v8, %v3636_v7  ;;  %v4964_v15 = vld [vmem:[#allocation12 + $0x14c] sm:$0xf0]  ;;  %v3782_v19 = vld [vmem:[#allocation12 + $0x150] sm:$0xf0]  ;;  %v3620_v22 = vld [vmem:[#allocation12] sm:$0xf] }
  0x5a   :  { %325 = vmatpush.bf16.msra.mxu0 %v4898_v43  ;;  %456 = vmatpush.bf16.msra.mxu2 %v3569_v51  ;;  %v3833_v43 = vor.u32 %v4974_v40, %v3830_v42  ;;  %v4972_v51 = vld [vmem:[#allocation12 + $0x18c] sm:$0xf0]  ;;  %v3622_v27 = vld [vmem:[#allocation12 + $0x10] sm:$0xf0]  ;;  %v4953_v29 = vld [vmem:[#allocation12 + $0xf4] sm:$0xf0] }
  0x5b   :  { %951 = vmatpush.bf16.msra.mxu3 %v3685_v33  ;;  %v3813_v53 = vor.u32 %v4972_v51, %v3812_v50  ;;  %v4924_v23 = vld [vmem:[#allocation12 + $0xc] sm:$0xf0]  ;;  %v4951_v32 = vld [vmem:[#allocation12 + $0xec] sm:$0xf]  ;;  %v3742_v33 = vld [vmem:[#allocation12 + $0xf8] sm:$0xf0] }
  0x5c   :  { %v3621_v26 = vor.u32 %v4924_v23, %v3620_v22  ;;  %v3764_v34 = vld [vmem:[#allocation12 + $0x120] sm:$0xf]  ;;  %v3745_v38 = vor.u32 %v4951_v32, %v3742_v33  ;;  %v4960_v39 = vld [vmem:[#allocation12 + $0x12c] sm:$0xf0]  ;;  %v4958_v40 = vld [vmem:[#allocation12 + $0x124] sm:$0xf] }
  0x5d   :  { %326 = vmatmul.bf16.vlgmr.msra.gmra.mxu0 %v249_v45  ;;  %444 = vmatpush.bf16.msra.mxu1 %v3557_v55  ;;  %v4936_v45 = vld [vmem:[#allocation12 + $0x6c] sm:$0xf0]  ;;  %v5797_v55 = vpop.eup %5266  ;;  %v3765_v42 = vor.u32 %v4960_v39, %v3764_v34  ;;  %v4949_v48 = vld [vmem:[#allocation12 + $0xd4] sm:$0xf0]  ;;  %v4947_v51 = vld [vmem:[#allocation12 + $0xcc] sm:$0xf] }
  0x5e   :  { %457 = vmatpush.bf16.msra.mxu2 %v3561_v57  ;;  %961 = vmatpush.bf16.msrb.mxu0 %v3861_v16  ;;  %v3669_v47 = vor.u32 %v4936_v45, %v3668_v44  ;;  %v3652_v57 = vld [vmem:[#allocation12 + $0x40] sm:$0xf]  ;;  %v476_v3 = vmul.f32 8.0, %v5797_v55  ;;  %v4962_v16 = vld [vmem:[#allocation12 + $0x144] sm:$0xf]  ;;  %vm480_vm1 = vweird.f32 %v5797_v55 }
  0x5f   :  { %v3785_v21 = vor.u32 %v4962_v16, %v3782_v19  ;;  %v3726_v52 = vld [vmem:[#allocation12 + $0xd8] sm:$0xf0]  ;;  %v4983_v7 = vld [vmem:[#allocation12 + $0x1ec] sm:$0xf]  ;;  %v3692_v32 = vld [vmem:[#allocation12 + $0x88] sm:$0xf] }
  0x60   :  { %952 = vmatpush.bf16.msra.mxu3 %v3669_v47  ;;  %v477_v17 = vsub.f32 1.0, %v476_v3  ;;  %v3724_v47 = vld [vmem:[#allocation12 + $0xc8] sm:$0xf]  ;;  %v3870_v8 = vld [vmem:[#allocation12 + $0x1f8] sm:$0xf0] }
  0x61   :  { %974 = vmatpush.bf16.msrb.mxu1 %v3737_v6  ;;  %v3801_v6 = vor.u32 %v4966_v2, %v3798_v5  ;;  %v3725_v50 = vor.u32 %v4949_v48, %v3724_v47  ;;  %v4985_v2 = vld [vmem:[#allocation12 + $0x1f4] sm:$0xf0]  ;;  %v3710_v19 = vld [vmem:[#allocation12 + $0xb8] sm:$0xf0]  ;;  %v4975_v47 = vld [vmem:[#allocation12 + $0x1ac] sm:$0xf] }
  0x62   :  { %987 = vmatpush.bf16.msrb.mxu2 %v3865_v18  ;;  %962 = vmatpush.bf16.msrb.mxu0 %v3845_v28  ;;  %v3781_v18 = vor.u32 %v4964_v15, %v3780_v14  ;;  %v3740_v28 = vld [vmem:[#allocation12 + $0xe8] sm:$0xf]  ;;  %v4943_v14 = vld [vmem:[#allocation12 + $0xac] sm:$0xf]  ;;  %v4941_v33 = vld [vmem:[#allocation12 + $0x94] sm:$0xf0] }
  0x63   :  { %v3741_v31 = vor.u32 %v4953_v29, %v3740_v28  ;;  %v3713_v23 = vor.u32 %v4943_v14, %v3710_v19  ;;  %v3838_v48 = vld [vmem:[#allocation12 + $0x1b8] sm:$0xf0]  ;;  %v4967_v19 = vld [vmem:[#allocation12 + $0x16c] sm:$0xf] }
  0x65   :  { %975 = vmatpush.bf16.msrb.mxu1 %v3721_v12  ;;  %v3638_v12 = vld [vmem:[#allocation12 + $0x30] sm:$0xf0] }
  0x66   :  { %988 = vmatpush.bf16.msrb.mxu2 %v3849_v30  ;;  %963 = vmatpush.bf16.msrb.mxu0 %v3829_v41  ;;  %v3641_v13 = vor.u32 %v4926_v9, %v3638_v12  ;;  %v478_v41 = vmul.f32 %v5797_v55, %v477_v17  ;;  %v3708_v12 = vld [vmem:[#allocation12 + $0xa8] sm:$0xf] }
  0x69   :  { %976 = vmatpush.bf16.msrb.mxu1 %v3705_v24  ;;  %v4922_v24 = vld [vmem:[#allocation12 + $0x4] sm:$0xf] }
  0x6a   :  { %989 = vmatpush.bf16.msrb.mxu2 %v3833_v43  ;;  %964 = vmatpush.bf16.msrb.mxu0 %v3813_v53  ;;  %v3625_v30 = vor.u32 %v4922_v24, %v3622_v27  ;;  %v3766_v43 = vld [vmem:[#allocation12 + $0x130] sm:$0xf0]  ;;  %v3748_v53 = vld [vmem:[#allocation12 + $0x100] sm:$0xf]  ;;  %v4981_v24 = vld [vmem:[#allocation12 + $0x1d4] sm:$0xf0] }
  0x6b   :  { %v3769_v46 = vor.u32 %v4958_v40, %v3766_v43  ;;  %v3854_v27 = vld [vmem:[#allocation12 + $0x1d8] sm:$0xf0]  ;;  %v3836_v43 = vld [vmem:[#allocation12 + $0x1a8] sm:$0xf] }
  0x6d   :  { %977 = vmatpush.bf16.msrb.mxu1 %v3689_v37 }
  0x6e   :  { %990 = vmatpush.bf16.msrb.mxu2 %v3817_v56 }
  0x71   :  { %978 = vmatpush.bf16.msrb.mxu1 %v3673_v49 }
  0x72   :  { %991 = vmatpush.bf16.msrb.mxu2 %v3801_v6 }
  0x76   :  { %992 = vmatpush.bf16.msrb.mxu2 %v3785_v21 }
  0x7a   :  { %993 = vmatpush.bf16.msrb.mxu2 %v3769_v46 }
  0xda   :  { %v327_v59 = vpop.f32.mrf.mxu0 }
  0xdb   :  { %v328_v60 = vadd.f32 %v5265_v58, %v327_v59  ;;  %v4932_v58 = vld [vmem:[#allocation12 + $0x4c] sm:$0xf0]  ;;  %v5799_v59 = vld [vmem:[#allocation7] sm:$0x3] }
  0xdc   :  { %v353_v10 = vperm.slane %v5799_v59, 0  ;;  %v354_v37 = vperm.slane %v5799_v59, 1  ;;  %v4956_v59 = vld [vmem:[#allocation12 + $0x10c] sm:$0xf0] }
  0xdd   :  { %v332_v61 = vmul.f32 0.2, %v328_v60  ;;  %vm331_vm0 = vcmp.gt.f32.partialorder %v328_v60, 0.0 }
  0xdf   :  { %v333_v62 = vsel %vm331_vm0, %v328_v60, %v332_v61  ;;  %v3653_v60 = vor.u32 %v4932_v58, %v3652_v57  ;;  %v4930_v61 = vld [vmem:[#allocation12 + $0x44] sm:$0xf]  ;;  %v3729_v58 = vor.u32 %v4947_v51, %v3726_v52  ;;  %v3676_v52 = vld [vmem:[#allocation12 + $0x68] sm:$0xf] }
  0xe0   :  { %v334_v63 = vpack.c.bf16 %v333_v62, %v333_v62  ;;  %v3654_v62 = vld [vmem:[#allocation12 + $0x50] sm:$0xf0] }
  0xe1   :  { %953 = vmatpush.bf16.msra.mxu3 %v3653_v60  ;;  %v4954_v60 = vld [vmem:[#allocation12 + $0x104] sm:$0xf] }
  0xe2   :  { %v329_v0 = vpop.f32.mrf.mxu0  ;;  %445 = vmatmul.bf16.vlgmr.msra.gmra.mxu1 %v334_v63  ;;  %458 = vmatmul.bf16.vlgmr.msra.gmra.mxu2 %v334_v63  ;;  %v3657_v63 = vor.u32 %v4930_v61, %v3654_v62  ;;  %v479_v61 = vadd.f32 %v5797_v55, %v478_v41 }
  0xe3   :  { %v3796_v0 = vld [vmem:[#allocation12 + $0x160] sm:$0xf] }
  0xe4   :  { %v3797_v4 = vor.u32 %v4968_v1, %v3796_v0  ;;  %979 = vmatpush.bf16.msrb.mxu1 %v3657_v63  ;;  %v3749_v63 = vor.u32 %v4956_v59, %v3748_v53  ;;  %v3750_v0 = vld [vmem:[#allocation12 + $0x110] sm:$0xf0]  ;;  %v3868_v1 = vld [vmem:[#allocation12 + $0x1e8] sm:$0xf]  ;;  %v5822_v21 = vsel %vm480_vm1, %v5797_v55, %v479_v61  ;;  %v4937_v53 = vld [vmem:[#allocation12 + $0x74] sm:$0xf0] }
  0xe5   :  { %954 = vmatpush.bf16.msra.mxu3 %v3637_v11  ;;  %v3753_v9 = vor.u32 %v4954_v60, %v3750_v0  ;;  %v3873_v11 = vor.u32 %v4983_v7, %v3870_v8  ;;  %v4935_v59 = vld [vmem:[#allocation12 + $0x6c] sm:$0xf]  ;;  %v3678_v60 = vld [vmem:[#allocation12 + $0x78] sm:$0xf0]  ;;  %v3820_v61 = vld [vmem:[#allocation12 + $0x188] sm:$0xf] }
  0xe6   :  { %965 = vmatpush.bf16.msrb.mxu0 %v3797_v4  ;;  %v3681_v0 = vor.u32 %v4935_v59, %v3678_v60  ;;  %v4933_v7 = vld [vmem:[#allocation12 + $0x54] sm:$0xf0]  ;;  %v3756_v59 = vld [vmem:[#allocation12 + $0x108] sm:$0xf] }
  0xe7   :  { %994 = vmatpush.bf16.msrb.mxu2 %v3753_v9  ;;  %v4957_v60 = vld [vmem:[#allocation12 + $0x114] sm:$0xf0] }
  0xe8   :  { %980 = vmatpush.bf16.msrb.mxu1 %v3641_v13  ;;  %v4945_v13 = vld [vmem:[#allocation12 + $0xb4] sm:$0xf0] }
  0xe9   :  { %955 = vmatpush.bf16.msra.mxu3 %v3621_v26  ;;  %v3709_v22 = vor.u32 %v4945_v13, %v3708_v12  ;;  %v4979_v26 = vld [vmem:[#allocation12 + $0x1cc] sm:$0xf]  ;;  %v3662_v12 = vld [vmem:[#allocation12 + $0x58] sm:$0xf0] }
  0xea   :  { %966 = vmatpush.bf16.msrb.mxu0 %v3781_v18  ;;  %v3857_v55 = vor.u32 %v4979_v26, %v3854_v27  ;;  %v3644_v26 = vld [vmem:[#allocation12 + $0x28] sm:$0xf]  ;;  %v4929_v27 = vld [vmem:[#allocation12 + $0x34] sm:$0xf0] }
  0xeb   :  { %1039 = vmatpush.bf16.msra.mxu2 %v3873_v11  ;;  %v4931_v11 = vld [vmem:[#allocation12 + $0x4c] sm:$0xf] }
  0xec   :  { %981 = vmatpush.bf16.msrb.mxu1 %v3625_v30 }
  0xed   :  { %1000 = vmatpush.bf16.msrb.mxu3 %v3741_v31 }
  0xee   :  { %967 = vmatpush.bf16.msrb.mxu0 %v3765_v42 }
  0xef   :  { %1040 = vmatpush.bf16.msra.mxu2 %v3857_v55  ;;  %v3790_v55 = vld [vmem:[#allocation12 + $0x158] sm:$0xf0] }
  0xf0   :  { %1026 = vmatpush.bf16.msra.mxu1 %v3745_v38  ;;  %v3694_v38 = vld [vmem:[#allocation12 + $0x98] sm:$0xf0] }
  0xf1   :  { %1001 = vmatpush.bf16.msrb.mxu3 %v3725_v50 }
  0xf2   :  { %968 = vmatpush.bf16.msrb.mxu0 %v3749_v63 }
  0xf4   :  { %1027 = vmatpush.bf16.msra.mxu1 %v3729_v58  ;;  %v3677_v58 = vor.u32 %v4937_v53, %v3676_v52  ;;  %v504_v52 = vld [vmem:[#allocation9] sm:$0x3] }
  0xf5   :  { %1002 = vmatpush.bf16.msrb.mxu3 %v3709_v22 }
  0xf8   :  { %1028 = vmatpush.bf16.msra.mxu1 %v3713_v23  ;;  %v3806_v23 = vld [vmem:[#allocation12 + $0x178] sm:$0xf0] }
 0x15f   :  { %v446_v20 = vpop.f32.mrf.mxu1 }
 0x160   :  { %v5803_v25 = vadd.f32 %v446_v20, %v353_v10  ;;  %v3869_v10 = vor.u32 %v4985_v2, %v3868_v1  ;;  %v3852_v20 = vld [vmem:[#allocation12 + $0x1c8] sm:$0xf]  ;;  %v4973_v1 = vld [vmem:[#allocation12 + $0x194] sm:$0xf0]  ;;  %v4971_v2 = vld [vmem:[#allocation12 + $0x18c] sm:$0xf] }
 0x162   :  { %v463_v35 = vrot.slane %v5803_v25, 4  ;;  %v484_v36 = vmul.f32 %v5803_v25, %v5803_v25  ;;  %1013 = vmatpush.bf16.msra.mxu0 %v3869_v10 }
 0x164   :  { %v464_v44 = vadd.f32 %v463_v35, %v5803_v25  ;;  %v486_v45 = vrot.slane %v484_v36, 4  ;;  %v3853_v35 = vor.u32 %v4981_v24, %v3852_v20  ;;  %v3809_v24 = vor.u32 %v4967_v19, %v3806_v23 }
 0x165   :  { %v459_v49 = vpop.f32.mrf.mxu2 }
 0x166   :  { %v465_v54 = vrot.slane %v464_v44, 2  ;;  %v487_v56 = vadd.f32 %v486_v45, %v484_v36  ;;  %v5811_v57 = vadd.f32 %v459_v49, %v354_v37  ;;  %v3693_v36 = vor.u32 %v4941_v33, %v3692_v32  ;;  %v4939_v37 = vld [vmem:[#allocation12 + $0x8c] sm:$0xf]  ;;  %1014 = vmatpush.bf16.msra.mxu0 %v3853_v35  ;;  %v3788_v32 = vld [vmem:[#allocation12 + $0x148] sm:$0xf] }
 0x167   :  { %v448_v62 = vpop.f32.mrf.mxu1  ;;  %v3697_v45 = vor.u32 %v4939_v37, %v3694_v38  ;;  %v4965_v33 = vld [vmem:[#allocation12 + $0x154] sm:$0xf0]  ;;  %v4963_v35 = vld [vmem:[#allocation12 + $0x14c] sm:$0xf] }
 0x168   :  { %v466_v3 = vadd.f32 %v465_v54, %v464_v44  ;;  %v488_v4 = vrot.slane %v487_v56, 2  ;;  %v469_v5 = vrot.slane %v5811_v57, 4  ;;  %v485_v6 = vmul.f32 %v5811_v57, %v5811_v57  ;;  %v4977_v44 = vld [vmem:[#allocation12 + $0x1b4] sm:$0xf0]  ;;  %1003 = vmatpush.bf16.msrb.mxu3 %v3693_v36  ;;  %v3628_v36 = vld [vmem:[#allocation12 + $0x8] sm:$0xf] }
 0x169   :  { %v3837_v46 = vor.u32 %v4977_v44, %v3836_v43  ;;  %1029 = vmatpush.bf16.msra.mxu1 %v3697_v45  ;;  %v3789_v38 = vor.u32 %v4965_v33, %v3788_v32  ;;  %v3793_v43 = vor.u32 %v4963_v35, %v3790_v55  ;;  %v3630_v44 = vld [vmem:[#allocation12 + $0x18] sm:$0xf0]  ;;  %v3772_v45 = vld [vmem:[#allocation12 + $0x128] sm:$0xf]  ;;  %v4068_v32 = vld [vmem:[#allocation18 + $0x180] sm:$0xf] }
 0x16a   :  { %v467_v15 = vrot.slane %v466_v3, 1  ;;  %v489_v16 = vadd.f32 %v488_v4, %v487_v56  ;;  %v470_v17 = vadd.f32 %v469_v5, %v5811_v57  ;;  %v492_v18 = vrot.slane %v485_v6, 4  ;;  %v5038_v33 = vld [vmem:[#allocation18 + $0x19c] sm:$0xf0] }
 0x16b   :  { %v3841_v56 = vor.u32 %v4975_v47, %v3838_v48  ;;  %1015 = vmatpush.bf16.msra.mxu0 %v3837_v46  ;;  %v3821_v5 = vor.u32 %v4973_v1, %v3820_v61  ;;  %v4961_v46 = vld [vmem:[#allocation12 + $0x134] sm:$0xf0]  ;;  %v4069_v35 = vor.u32 %v5038_v33, %v4068_v32  ;;  %v5110_v55 = vld [vmem:[#allocation18 + $0x3dc] sm:$0xf0]  ;;  %v5042_v32 = vld [vmem:[#allocation18 + $0x1c4] sm:$0xf] }
 0x16c   :  { %v468_v28 = vadd.f32 %v467_v15, %v466_v3  ;;  %v490_v29 = vrot.slane %v489_v16, 1  ;;  %v471_v30 = vrot.slane %v470_v17, 2  ;;  %v493_v31 = vadd.f32 %v492_v18, %v485_v6  ;;  %v3822_v3 = vld [vmem:[#allocation12 + $0x198] sm:$0xf0]  ;;  %v3660_v6 = vld [vmem:[#allocation12 + $0x48] sm:$0xf]  ;;  %1004 = vmatpush.bf16.msrb.mxu3 %v3677_v58 }
 0x16d   :  { %v461_v34 = vpop.f32.mrf.mxu2  ;;  %1041 = vmatpush.bf16.msra.mxu2 %v3841_v56  ;;  %v3825_v10 = vor.u32 %v4971_v2, %v3822_v3  ;;  %1030 = vmatpush.bf16.msra.mxu1 %v3681_v0  ;;  %v3661_v14 = vor.u32 %v4933_v7, %v3660_v6  ;;  %v3665_v15 = vor.u32 %v4931_v11, %v3662_v12  ;;  %v4969_v18 = vld [vmem:[#allocation12 + $0x174] sm:$0xf0]  ;;  %v3758_v0 = vld [vmem:[#allocation12 + $0x118] sm:$0xf0]  ;;  %v4102_v33 = vld [vmem:[#allocation18 + $0x1e0] sm:$0xf0] }
 0x16e   :  { %v5825_v39 = vmul.f32 %v5822_v21, %v468_v28  ;;  %v491_v40 = vadd.f32 %v490_v29, %v489_v16  ;;  %v472_v41 = vadd.f32 %v471_v30, %v470_v17  ;;  %v494_v42 = vrot.slane %v493_v31, 2  ;;  %v3804_v17 = vld [vmem:[#allocation12 + $0x168] sm:$0xf]  ;;  %v4927_v28 = vld [vmem:[#allocation12 + $0x2c] sm:$0xf] }
 0x16f   :  { %1016 = vmatpush.bf16.msra.mxu0 %v3821_v5  ;;  %v3805_v22 = vor.u32 %v4969_v18, %v3804_v17  ;;  %v3645_v30 = vor.u32 %v4929_v27, %v3644_v26  ;;  %v538_v3 = vld [vmem:[#allocation10] sm:$0x3] }
 0x170   :  { %v498_v49 = vmul.f32 %v491_v40, %v5822_v21  ;;  %v500_v50 = vmul.f32 %v5825_v39, %v5825_v39  ;;  %v473_v51 = vrot.slane %v472_v41, 1  ;;  %v495_v54 = vadd.f32 %v494_v42, %v493_v31  ;;  %1005 = vmatpush.bf16.msrb.mxu3 %v3661_v14  ;;  %v3646_v31 = vld [vmem:[#allocation12 + $0x38] sm:$0xf0]  ;;  %v4925_v40 = vld [vmem:[#allocation12 + $0x14] sm:$0xf0] }
 0x171   :  { %1042 = vmatpush.bf16.msra.mxu2 %v3825_v10  ;;  %1031 = vmatpush.bf16.msra.mxu1 %v3665_v15  ;;  %v3649_v34 = vor.u32 %v4927_v28, %v3646_v31  ;;  %v3629_v48 = vor.u32 %v4925_v40, %v3628_v36  ;;  %v505_v61 = vsub.f32 %v5803_v25, %v5825_v39  ;;  %v540_v25 = vperm.slane %v538_v3, 0  ;;  %v4324_v40 = vld [vmem:[#allocation18 + $0x380] sm:$0xf] }
 0x172   :  { %v502_v62 = vsub.f32 %v498_v49, %v500_v50  ;;  %v474_v63 = vadd.f32 %v473_v51, %v472_v41  ;;  %v496_v4 = vrot.slane %v495_v54, 1  ;;  %v4923_v41 = vld [vmem:[#allocation12 + $0xc] sm:$0xf]  ;;  %v3774_v50 = vld [vmem:[#allocation12 + $0x138] sm:$0xf0]  ;;  %v509_v15 = vperm.slane %v504_v52, 1 }
 0x173   :  { %1017 = vmatpush.bf16.msra.mxu0 %v3805_v22  ;;  %v4959_v49 = vld [vmem:[#allocation12 + $0x12c] sm:$0xf]  ;;  %v3633_v51 = vor.u32 %v4923_v41, %v3630_v44 }
 0x174   :  { %v5830_v8 = vadd.f32 0.9, %v502_v62  ;;  %v5833_v9 = vmul.f32 %v5822_v21, %v474_v63  ;;  %v497_v13 = vadd.f32 %v496_v4, %v495_v54  ;;  %1006 = vmatpush.bf16.msrb.mxu3 %v3645_v30  ;;  %v3773_v54 = vor.u32 %v4961_v46, %v3772_v45  ;;  %v4955_v63 = vld [vmem:[#allocation12 + $0x10c] sm:$0xf] }
 0x175   :  { %1043 = vmatpush.bf16.msra.mxu2 %v3809_v24  ;;  %1032 = vmatpush.bf16.msra.mxu1 %v3649_v34  ;;  %v3777_v56 = vor.u32 %v4959_v49, %v3774_v50  ;;  %v508_v62 = vperm.slane %v504_v52, 0  ;;  %v3757_v4 = vor.u32 %v4957_v60, %v3756_v59  ;;  %v3761_v6 = vor.u32 %v4955_v63, %v3758_v0  ;;  %v5046_v30 = vld [vmem:[#allocation18 + $0x1dc] sm:$0xf0] }
 0x176   :  { %5268 = vrsqrt.f32 %v5830_v8  ;;  %v501_v16 = vmul.f32 %v5833_v9, %v5833_v9  ;;  %v499_v20 = vmul.f32 %v497_v13, %v5822_v21  ;;  %vm522_vm3 = vweird.f32 %v5830_v8  ;;  %v4356_v34 = vld [vmem:[#allocation18 + $0x3c0] sm:$0xf] }
 0x177   :  { %1018 = vmatpush.bf16.msra.mxu0 %v3789_v38  ;;  %v512_v10 = vmul.f32 %v508_v62, %v505_v61  ;;  %v506_v14 = vsub.f32 %v5811_v57, %v5833_v9  ;;  %v4357_v36 = vor.u32 %v5110_v55, %v4356_v34  ;;  %v5030_v38 = vld [vmem:[#allocation18 + $0x15c] sm:$0xf0]  ;;  %v5850_v34 = vld [vmem:[#allocation13] sm:$0xf] }
 0x178   :  { %v503_v29 = vsub.f32 %v499_v20, %v501_v16  ;;  %1007 = vmatpush.bf16.msrb.mxu3 %v3629_v48  ;;  %v541_v20 = vperm.slane %v538_v3, 1  ;;  %v4004_v44 = vld [vmem:[#allocation18 + $0x100] sm:$0xf] }
 0x179   :  { %1044 = vmatpush.bf16.msra.mxu2 %v3793_v43  ;;  %1033 = vmatpush.bf16.msra.mxu1 %v3633_v51  ;;  %v513_v19 = vmul.f32 %v509_v15, %v506_v14  ;;  %v5022_v45 = vld [vmem:[#allocation18 + $0x11c] sm:$0xf0] }
 0x17a   :  { %v5839_v37 = vadd.f32 0.9, %v503_v29  ;;  %v4100_v29 = vld [vmem:[#allocation18 + $0x1c0] sm:$0xf] }
 0x17b   :  { %1019 = vmatpush.bf16.msra.mxu0 %v3773_v54  ;;  %v4101_v31 = vor.u32 %v5046_v30, %v4100_v29  ;;  %v4292_v46 = vld [vmem:[#allocation18 + $0x340] sm:$0xf] }
 0x17c   :  { %v5269_v42 = vpop.eup %5268  ;;  %5270 = vrsqrt.f32 %v5839_v37  ;;  %vm532_vm6 = vweird.f32 %v5839_v37  ;;  %v5094_v48 = vld [vmem:[#allocation18 + $0x35c] sm:$0xf0] }
 0x17d   :  { %v517_v47 = vmul.f32 %v5269_v42, %v5830_v8  ;;  %vm523_vm2 = vweird.f32 %v5269_v42  ;;  %1045 = vmatpush.bf16.msra.mxu2 %v3777_v56  ;;  %v4293_v49 = vor.u32 %v5094_v48, %v4292_v46  ;;  %v3972_v50 = vld [vmem:[#allocation18 + $0xc0] sm:$0xf]  ;;  %v4070_v46 = vld [vmem:[#allocation18 + $0x1a0] sm:$0xf0] }
 0x17e   :  { %vm524_vm4 = vmor %vm522_vm3, %vm523_vm2  ;;  %v5014_v51 = vld [vmem:[#allocation18 + $0xdc] sm:$0xf0] }
 0x17f   :  { %v518_v53 = vmul.f32 %v5269_v42, %v517_v47  ;;  %1020 = vmatpush.bf16.msra.mxu0 %v3757_v4  ;;  %v4005_v47 = vor.u32 %v5022_v45, %v4004_v44  ;;  %v4260_v52 = vld [vmem:[#allocation18 + $0x300] sm:$0xf]  ;;  %v5034_v45 = vld [vmem:[#allocation18 + $0x184] sm:$0xf] }
 0x180   :  { %v5086_v54 = vld [vmem:[#allocation18 + $0x31c] sm:$0xf0] }
 0x181   :  { %v519_v58 = vmul.f32 0.5, %v518_v53  ;;  %1046 = vmatpush.bf16.msra.mxu2 %v3761_v6  ;;  %v3973_v53 = vor.u32 %v5014_v51, %v3972_v50  ;;  %v4612_v56 = vld [vmem:[#allocation18 + $0x5c0] sm:$0xf]  ;;  %v4261_v59 = vor.u32 %v5086_v54, %v4260_v52  ;;  %v5106_v50 = vld [vmem:[#allocation18 + $0x3c4] sm:$0xf] }
 0x182   :  { %v5271_v1 = vpop.eup %5270  ;;  %v3940_v61 = vld [vmem:[#allocation18 + $0x80] sm:$0xf]  ;;  %v4358_v51 = vld [vmem:[#allocation18 + $0x3e0] sm:$0xf0] }
 0x183   :  { %v520_v2 = vsub.f32 1.5, %v519_v58  ;;  %v527_v5 = vmul.f32 %v5271_v1, %v5839_v37  ;;  %vm533_vm5 = vweird.f32 %v5271_v1  ;;  %v4036_v37 = vld [vmem:[#allocation18 + $0x140] sm:$0xf]  ;;  %v4361_v52 = vor.u32 %v5106_v50, %v4358_v51 }
 0x184   :  { %vm534_vm8 = vmor %vm532_vm6, %vm533_vm5  ;;  %v4037_v41 = vor.u32 %v5030_v38, %v4036_v37  ;;  %v5174_v58 = vld [vmem:[#allocation18 + $0x5dc] sm:$0xf0] }
 0x185   :  { %v521_v7 = vmul.f32 %v5269_v42, %v520_v2  ;;  %v528_v11 = vmul.f32 %v5271_v1, %v527_v5  ;;  %v4613_v60 = vor.u32 %v5174_v58, %v4612_v56  ;;  %v5006_v62 = vld [vmem:[#allocation18 + $0x9c] sm:$0xf0] }
 0x186   :  { %v4228_v63 = vld [vmem:[#allocation18 + $0x2c0] sm:$0xf]  ;;  %v3941_v0 = vor.u32 %v5006_v62, %v3940_v61  ;;  %v4038_v61 = vld [vmem:[#allocation18 + $0x160] sm:$0xf0] }
 0x187   :  { %v525_v39 = vsel %vm524_vm4, %v5269_v42, %v521_v7  ;;  %v529_v13 = vmul.f32 0.5, %v528_v11  ;;  %v5102_v42 = vld [vmem:[#allocation18 + $0x39c] sm:$0xf0] }
 0x188   :  { %v536_v12 = vmul.f32 %v525_v39, %v512_v10  ;;  %v4325_v43 = vor.u32 %v5102_v42, %v4324_v40  ;;  %v4580_v2 = vld [vmem:[#allocation18 + $0x580] sm:$0xf] }
 0x189   :  { %v530_v16 = vsub.f32 1.5, %v529_v13  ;;  %v5166_v3 = vld [vmem:[#allocation18 + $0x59c] sm:$0xf0] }
 0x18a   :  { %v544_v17 = vadd.f32 %v540_v25, %v536_v12  ;;  %v4581_v5 = vor.u32 %v5166_v3, %v4580_v2  ;;  %v4868_v6 = vld [vmem:[#allocation18 + $0x7c0] sm:$0xf] }
 0x18b   :  { %v531_v18 = vmul.f32 %v5271_v1, %v530_v16  ;;  %v5238_v7 = vld [vmem:[#allocation18 + $0x7dc] sm:$0xf0] }
 0x18c   :  { %vm546_vm7 = vcmp.gt.f32.partialorder %v544_v17, 0.0  ;;  %v548_v8 = vmul.f32 0.2, %v544_v17  ;;  %v4869_v10 = vor.u32 %v5238_v7, %v4868_v6  ;;  %v3908_v11 = vld [vmem:[#allocation18 + $0x40] sm:$0xf] }
 0x18d   :  { %v535_v22 = vsel %vm534_vm8, %v5271_v1, %v531_v18  ;;  %v5078_v1 = vld [vmem:[#allocation18 + $0x2dc] sm:$0xf0] }
 0x18e   :  { %v550_v23 = vsel %vm546_vm7, %v544_v17, %v548_v8  ;;  %v537_v24 = vmul.f32 %v535_v22, %v513_v19  ;;  %v4229_v4 = vor.u32 %v5078_v1, %v4228_v63  ;;  %v4998_v25 = vld [vmem:[#allocation18 + $0x5c] sm:$0xf0]  ;;  %v4326_v1 = vld [vmem:[#allocation18 + $0x3a0] sm:$0xf0] }
 0x18f   :  { %v552_v26 = vpack.c.bf16 %v550_v23, %v550_v23  ;;  %v3909_v39 = vor.u32 %v4998_v25, %v3908_v11  ;;  %v4196_v12 = vld [vmem:[#allocation18 + $0x280] sm:$0xf] }
 0x190   :  { %v545_v27 = vadd.f32 %v541_v20, %v537_v24  ;;  %v5070_v13 = vld [vmem:[#allocation18 + $0x29c] sm:$0xf0] }
 0x191   :  { %956 = vmatmul.bf16.vlgmr.msra.gmra.mxu3 %v552_v26  ;;  %982 = vmatmul.bf16.vlgmr.msrb.gmra.mxu1 %v552_v26  ;;  %v4548_v14 = vld [vmem:[#allocation18 + $0x540] sm:$0xf]  ;;  %v4197_v15 = vor.u32 %v5070_v13, %v4196_v12  ;;  %v4006_v12 = vld [vmem:[#allocation18 + $0x120] sm:$0xf0]  ;;  %v621_v13 = vperm.slane %v5850_v34, 1 }
 0x192   :  { %vm547_vm9 = vcmp.gt.f32.partialorder %v545_v27, 0.0  ;;  %v549_v57 = vmul.f32 0.2, %v545_v27  ;;  %2770 = vmatpush.bf16.msra.mxu3 %v4101_v31  ;;  %2796 = vmatpush.bf16.msrb.mxu1 %v4613_v60  ;;  %v5158_v16 = vld [vmem:[#allocation18 + $0x55c] sm:$0xf0] }
 0x193   :  { %v4836_v17 = vld [vmem:[#allocation18 + $0x780] sm:$0xf]  ;;  %v4549_v8 = vor.u32 %v5158_v16, %v4548_v14  ;;  %v5026_v60 = vld [vmem:[#allocation18 + $0x144] sm:$0xf] }
 0x194   :  { %v551_v9 = vsel %vm547_vm9, %v545_v27, %v549_v57  ;;  %v5230_v18 = vld [vmem:[#allocation18 + $0x79c] sm:$0xf0]  ;;  %v4041_v63 = vor.u32 %v5026_v60, %v4038_v61  ;;  %v4230_v61 = vld [vmem:[#allocation18 + $0x2e0] sm:$0xf0] }
 0x195   :  { %v553_v28 = vpack.c.bf16 %v551_v9, %v551_v9  ;;  %v4837_v19 = vor.u32 %v5230_v18, %v4836_v17  ;;  %v3876_v20 = vld [vmem:[#allocation18] sm:$0xf]  ;;  %v5090_v17 = vld [vmem:[#allocation18 + $0x344] sm:$0xf] }
 0x196   :  { %2771 = vmatpush.bf16.msra.mxu3 %v4069_v35  ;;  %2797 = vmatpush.bf16.msrb.mxu1 %v4581_v5  ;;  %v4990_v22 = vld [vmem:[#allocation18 + $0x1c] sm:$0xf0]  ;;  %v4105_v35 = vor.u32 %v5042_v32, %v4102_v33  ;;  %v4294_v18 = vld [vmem:[#allocation18 + $0x360] sm:$0xf0] }
 0x197   :  { %969 = vmatmul.bf16.vlgmr.msrb.gmra.mxu0 %v553_v28  ;;  %995 = vmatmul.bf16.vlgmr.msrb.gmra.mxu2 %v553_v28  ;;  %v3877_v23 = vor.u32 %v4990_v22, %v3876_v20  ;;  %v4164_v24 = vld [vmem:[#allocation18 + $0x240] sm:$0xf] }
 0x198   :  { %2783 = vmatpush.bf16.msrb.mxu0 %v4357_v36  ;;  %2809 = vmatpush.bf16.msrb.mxu2 %v4869_v10  ;;  %v4516_v27 = vld [vmem:[#allocation18 + $0x500] sm:$0xf] }
 0x199   :  { %v5150_v9 = vld [vmem:[#allocation18 + $0x51c] sm:$0xf0] }
 0x19a   :  { %2772 = vmatpush.bf16.msra.mxu3 %v4037_v41  ;;  %2798 = vmatpush.bf16.msrb.mxu1 %v4549_v8  ;;  %v5222_v29 = vld [vmem:[#allocation18 + $0x75c] sm:$0xf0]  ;;  %v4517_v30 = vor.u32 %v5150_v9, %v4516_v27 }
 0x19b   :  { %v4132_v55 = vld [vmem:[#allocation18 + $0x200] sm:$0xf] }
 0x19c   :  { %2784 = vmatpush.bf16.msrb.mxu0 %v4325_v43  ;;  %2810 = vmatpush.bf16.msrb.mxu2 %v4837_v19  ;;  %v5054_v36 = vld [vmem:[#allocation18 + $0x21c] sm:$0xf0]  ;;  %v4297_v19 = vor.u32 %v5090_v17, %v4294_v18  ;;  %v5066_v18 = vld [vmem:[#allocation18 + $0x284] sm:$0xf] }
 0x19d   :  { %v4133_v37 = vor.u32 %v5054_v36, %v4132_v55  ;;  %v4484_v38 = vld [vmem:[#allocation18 + $0x4c0] sm:$0xf]  ;;  %v4262_v36 = vld [vmem:[#allocation18 + $0x320] sm:$0xf0] }
 0x19e   :  { %2773 = vmatpush.bf16.msra.mxu3 %v4005_v47  ;;  %2799 = vmatpush.bf16.msrb.mxu1 %v4517_v30  ;;  %v5142_v40 = vld [vmem:[#allocation18 + $0x4dc] sm:$0xf0]  ;;  %v620_v47 = vperm.slane %v5850_v34, 0  ;;  %v3974_v30 = vld [vmem:[#allocation18 + $0xe0] sm:$0xf0] }
 0x19f   :  { %v4772_v41 = vld [vmem:[#allocation18 + $0x700] sm:$0xf]  ;;  %v4485_v43 = vor.u32 %v5142_v40, %v4484_v38 }
 0x1a0   :  { %2785 = vmatpush.bf16.msrb.mxu0 %v4293_v49  ;;  %v5214_v44 = vld [vmem:[#allocation18 + $0x71c] sm:$0xf0]  ;;  %v4073_v49 = vor.u32 %v5034_v45, %v4070_v46 }
 0x1a1   :  { %1008 = vmatmul.bf16.vlgmr.msrb.gmra.mxu3 %v552_v26  ;;  %1034 = vmatmul.bf16.vlgmr.msra.gmra.mxu1 %v552_v26  ;;  %v5062_v26 = vld [vmem:[#allocation18 + $0x25c] sm:$0xf0]  ;;  %v4773_v48 = vor.u32 %v5214_v44, %v4772_v41 }
 0x1a2   :  { %2774 = vmatpush.bf16.msra.mxu3 %v3973_v53  ;;  %v4165_v57 = vor.u32 %v5062_v26, %v4164_v24  ;;  %v4452_v53 = vld [vmem:[#allocation18 + $0x480] sm:$0xf]  ;;  %2800 = vmatpush.bf16.msrb.mxu1 %v4485_v43  ;;  %v4614_v43 = vld [vmem:[#allocation18 + $0x5e0] sm:$0xf0] }
 0x1a3   :  { %v5134_v54 = vld [vmem:[#allocation18 + $0x49c] sm:$0xf0] }
 0x1a4   :  { %2786 = vmatpush.bf16.msrb.mxu0 %v4261_v59  ;;  %v4740_v56 = vld [vmem:[#allocation18 + $0x6c0] sm:$0xf]  ;;  %v4453_v58 = vor.u32 %v5134_v54, %v4452_v53  ;;  %v3942_v54 = vld [vmem:[#allocation18 + $0xa0] sm:$0xf0] }
 0x1a5   :  { %v5206_v59 = vld [vmem:[#allocation18 + $0x6dc] sm:$0xf0] }
 0x1a6   :  { %2775 = vmatpush.bf16.msra.mxu3 %v3941_v0  ;;  %v4741_v62 = vor.u32 %v5206_v59, %v4740_v56  ;;  %v5098_v0 = vld [vmem:[#allocation18 + $0x384] sm:$0xf]  ;;  %v5126_v5 = vld [vmem:[#allocation18 + $0x45c] sm:$0xf0]  ;;  %2801 = vmatpush.bf16.msrb.mxu1 %v4453_v58 }
 0x1a7   :  { %1021 = vmatmul.bf16.vlgmr.msra.gmra.mxu0 %v553_v28  ;;  %1047 = vmatmul.bf16.vlgmr.msra.gmra.mxu2 %v553_v28  ;;  %v4804_v28 = vld [vmem:[#allocation18 + $0x740] sm:$0xf]  ;;  %v4329_v2 = vor.u32 %v5098_v0, %v4326_v1  ;;  %v5074_v56 = vld [vmem:[#allocation18 + $0x2c4] sm:$0xf] }
 0x1a8   :  { %2787 = vmatpush.bf16.msrb.mxu0 %v4229_v4  ;;  %v4805_v31 = vor.u32 %v5222_v29, %v4804_v28  ;;  %v4420_v4 = vld [vmem:[#allocation18 + $0x440] sm:$0xf]  ;;  %v5010_v29 = vld [vmem:[#allocation18 + $0xc4] sm:$0xf]  ;;  %v4233_v0 = vor.u32 %v5074_v56, %v4230_v61 }
 0x1a9   :  { %v4708_v6 = vld [vmem:[#allocation18 + $0x680] sm:$0xf]  ;;  %v4421_v11 = vor.u32 %v5126_v5, %v4420_v4  ;;  %v3977_v55 = vor.u32 %v5010_v29, %v3974_v30  ;;  %v5162_v1 = vld [vmem:[#allocation18 + $0x584] sm:$0xf]  ;;  %v622_v5 = vperm.slane %v5850_v34, 2 }
 0x1aa   :  { %2776 = vmatpush.bf16.msra.mxu3 %v3909_v39  ;;  %2811 = vmatpush.bf16.msrb.mxu2 %v4805_v31  ;;  %v5198_v25 = vld [vmem:[#allocation18 + $0x69c] sm:$0xf0]  ;;  %v5018_v39 = vld [vmem:[#allocation18 + $0x104] sm:$0xf] }
 0x1ab   :  { %v4009_v16 = vor.u32 %v5018_v39, %v4006_v12  ;;  %v4388_v20 = vld [vmem:[#allocation18 + $0x400] sm:$0xf]  ;;  %2802 = vmatpush.bf16.msrb.mxu1 %v4421_v11  ;;  %v5082_v31 = vld [vmem:[#allocation18 + $0x304] sm:$0xf] }
 0x1ac   :  { %2788 = vmatpush.bf16.msrb.mxu0 %v4197_v15  ;;  %v4709_v15 = vor.u32 %v5198_v25, %v4708_v6  ;;  %v5118_v22 = vld [vmem:[#allocation18 + $0x41c] sm:$0xf0]  ;;  %v4265_v41 = vor.u32 %v5082_v31, %v4262_v36  ;;  %v4994_v12 = vld [vmem:[#allocation18 + $0x44] sm:$0xf] }
 0x1ad   :  { %v4389_v26 = vor.u32 %v5118_v22, %v4388_v20  ;;  %v4676_v27 = vld [vmem:[#allocation18 + $0x640] sm:$0xf] }
 0x1ae   :  { %2777 = vmatpush.bf16.msra.mxu3 %v3877_v23  ;;  %2812 = vmatpush.bf16.msrb.mxu2 %v4773_v48  ;;  %v4644_v44 = vld [vmem:[#allocation18 + $0x600] sm:$0xf] }
 0x1af   :  { %2803 = vmatpush.bf16.msrb.mxu1 %v4389_v26  ;;  %v5182_v48 = vld [vmem:[#allocation18 + $0x61c] sm:$0xf0] }
 0x1b0   :  { %2789 = vmatpush.bf16.msrb.mxu0 %v4165_v57  ;;  %v5190_v57 = vld [vmem:[#allocation18 + $0x65c] sm:$0xf0]  ;;  %v4645_v53 = vor.u32 %v5182_v48, %v4644_v44 }
 0x1b1   :  { %v4677_v28 = vor.u32 %v5190_v57, %v4676_v27  ;;  %v5154_v27 = vld [vmem:[#allocation18 + $0x544] sm:$0xf] }
 0x1b2   :  { %2822 = vmatpush.bf16.msrb.mxu3 %v4105_v35  ;;  %2813 = vmatpush.bf16.msrb.mxu2 %v4741_v62  ;;  %v4550_v57 = vld [vmem:[#allocation18 + $0x560] sm:$0xf0] }
 0x1b3   :  { %v4553_v31 = vor.u32 %v5154_v27, %v4550_v57 }
 0x1b4   :  { %2790 = vmatpush.bf16.msrb.mxu0 %v4133_v37  ;;  %v5170_v37 = vld [vmem:[#allocation18 + $0x5c4] sm:$0xf] }
 0x1b6   :  { %2823 = vmatpush.bf16.msrb.mxu3 %v4073_v49  ;;  %2814 = vmatpush.bf16.msrb.mxu2 %v4709_v15  ;;  %v5002_v49 = vld [vmem:[#allocation18 + $0x84] sm:$0xf] }
 0x1b7   :  { %v3945_v60 = vor.u32 %v5002_v49, %v3942_v54  ;;  %v4806_v54 = vld [vmem:[#allocation18 + $0x760] sm:$0xf0] }
 0x1b8   :  { %2835 = vmatpush.bf16.msra.mxu0 %v4361_v52 }
 0x1ba   :  { %2824 = vmatpush.bf16.msrb.mxu3 %v4041_v63  ;;  %2815 = vmatpush.bf16.msrb.mxu2 %v4677_v28 }
 0x1bc   :  { %2836 = vmatpush.bf16.msra.mxu0 %v4329_v2  ;;  %v4582_v2 = vld [vmem:[#allocation18 + $0x5a0] sm:$0xf0] }
 0x1bd   :  { %v4585_v6 = vor.u32 %v5162_v1, %v4582_v2 }
 0x1be   :  { %2825 = vmatpush.bf16.msrb.mxu3 %v4009_v16  ;;  %2816 = vmatpush.bf16.msrb.mxu2 %v4645_v53  ;;  %v5218_v53 = vld [vmem:[#allocation18 + $0x744] sm:$0xf] }
 0x1c0   :  { %2837 = vmatpush.bf16.msra.mxu0 %v4297_v19  ;;  %v4198_v19 = vld [vmem:[#allocation18 + $0x2a0] sm:$0xf0] }
 0x1c1   :  { %v4201_v26 = vor.u32 %v5066_v18, %v4198_v19  ;;  %v5210_v18 = vld [vmem:[#allocation18 + $0x704] sm:$0xf] }
 0x1c2   :  { %2826 = vmatpush.bf16.msrb.mxu3 %v3977_v55  ;;  %v4774_v19 = vld [vmem:[#allocation18 + $0x720] sm:$0xf0] }
 0x1c4   :  { %2838 = vmatpush.bf16.msra.mxu0 %v4265_v41  ;;  %v5058_v41 = vld [vmem:[#allocation18 + $0x244] sm:$0xf] }
 0x1c6   :  { %2827 = vmatpush.bf16.msrb.mxu3 %v3945_v60 }
 0x1c8   :  { %2839 = vmatpush.bf16.msra.mxu0 %v4233_v0 }
 0x1cc   :  { %2840 = vmatpush.bf16.msra.mxu0 %v4201_v26 }
 0x20e   :  { %v983_v42 = vpop.f32.mrf.mxu1 }
 0x20f   :  { %v984_v9 = vadd.f32 %v983_v42, %v621_v13  ;;  %v3910_v13 = vld [vmem:[#allocation18 + $0x60] sm:$0xf0] }
 0x210   :  { %v3913_v17 = vor.u32 %v4994_v12, %v3910_v13  ;;  %v5138_v13 = vld [vmem:[#allocation18 + $0x4c4] sm:$0xf] }
 0x212   :  { %2828 = vmatpush.bf16.msrb.mxu3 %v3913_v17 }
 0x214   :  { %v957_v3 = vpop.f32.mrf.mxu3  ;;  %v970_v10 = vpop.f32.mrf.mxu0 }
 0x215   :  { %v958_v7 = vadd.f32 %v957_v3, %v620_v47  ;;  %v4617_v47 = vor.u32 %v5170_v37, %v4614_v43 }
 0x216   :  { %v985_v14 = vpop.f32.mrf.mxu1 }
 0x217   :  { %v5854_v8 = vadd.f32 %v970_v10, %v958_v7  ;;  %2848 = vmatpush.bf16.msra.mxu1 %v4617_v47  ;;  %v5234_v7 = vld [vmem:[#allocation18 + $0x7c4] sm:$0xf] }
 0x218   :  { %v4870_v10 = vld [vmem:[#allocation18 + $0x7e0] sm:$0xf0] }
 0x219   :  { %v1052_v23 = vrot.slane %v5854_v8, 4  ;;  %v1080_v24 = vmul.f32 %v5854_v8, %v5854_v8  ;;  %v4873_v39 = vor.u32 %v5234_v7, %v4870_v10  ;;  %v4518_v47 = vld [vmem:[#allocation18 + $0x520] sm:$0xf0] }
 0x21a   :  { %v996_v35 = vpop.f32.mrf.mxu2  ;;  %v5050_v10 = vld [vmem:[#allocation18 + $0x204] sm:$0xf] }
 0x21b   :  { %v1053_v32 = vadd.f32 %v1052_v23, %v5854_v8  ;;  %v1084_v33 = vrot.slane %v1080_v24, 4  ;;  %v5860_v38 = vadd.f32 %v996_v35, %v984_v9  ;;  %2849 = vmatpush.bf16.msra.mxu1 %v4585_v6  ;;  %v623_v23 = vperm.slane %v5850_v34, 3  ;;  %2861 = vmatpush.bf16.msra.mxu2 %v4873_v39  ;;  %v4986_v35 = vld [vmem:[#allocation18 + $0x4] sm:$0xf] }
 0x21c   :  { %v959_v40 = vpop.f32.mrf.mxu3  ;;  %v972_v46 = vpop.f32.mrf.mxu0 }
 0x21d   :  { %v1054_v42 = vrot.slane %v1053_v32, 2  ;;  %v1085_v45 = vadd.f32 %v1084_v33, %v1080_v24  ;;  %v1058_v50 = vrot.slane %v5860_v38, 4  ;;  %v1081_v51 = vmul.f32 %v5860_v38, %v5860_v38  ;;  %v4838_v33 = vld [vmem:[#allocation18 + $0x7a0] sm:$0xf0] }
 0x21e   :  { %v5865_v52 = vpop.f32.mrf.mxu1  ;;  %v3878_v40 = vld [vmem:[#allocation18 + $0x20] sm:$0xf0] }
 0x21f   :  { %v1055_v58 = vadd.f32 %v1054_v42, %v1053_v32  ;;  %v1086_v59 = vrot.slane %v1085_v45, 2  ;;  %v1059_v62 = vadd.f32 %v1058_v50, %v5860_v38  ;;  %v1090_v63 = vrot.slane %v1081_v51, 4  ;;  %v5226_v32 = vld [vmem:[#allocation18 + $0x784] sm:$0xf]  ;;  %2850 = vmatpush.bf16.msra.mxu1 %v4553_v31 }
 0x220   :  { %v4841_v34 = vor.u32 %v5226_v32, %v4838_v33  ;;  %v5146_v46 = vld [vmem:[#allocation18 + $0x504] sm:$0xf]  ;;  %v3881_v50 = vor.u32 %v4986_v35, %v3878_v40 }
 0x221   :  { %v1056_v3 = vrot.slane %v1055_v58, 1  ;;  %v1087_v4 = vadd.f32 %v1086_v59, %v1085_v45  ;;  %v1060_v11 = vrot.slane %v1059_v62, 2  ;;  %v1091_v25 = vadd.f32 %v1090_v63, %v1081_v51  ;;  %v4166_v45 = vld [vmem:[#allocation18 + $0x260] sm:$0xf0] }
 0x222   :  { %v998_v16 = vpop.f32.mrf.mxu2  ;;  %2862 = vmatpush.bf16.msra.mxu2 %v4841_v34  ;;  %v4169_v51 = vor.u32 %v5058_v41, %v4166_v45  ;;  %2829 = vmatpush.bf16.msrb.mxu3 %v3881_v50  ;;  %v4521_v63 = vor.u32 %v5146_v46, %v4518_v47  ;;  %v5130_v33 = vld [vmem:[#allocation18 + $0x484] sm:$0xf] }
 0x223   :  { %v1057_v14 = vadd.f32 %v1056_v3, %v1055_v58  ;;  %v1088_v15 = vrot.slane %v1087_v4, 1  ;;  %v1061_v20 = vadd.f32 %v1060_v11, %v1059_v62  ;;  %v1092_v22 = vrot.slane %v1091_v25, 2  ;;  %v4134_v11 = vld [vmem:[#allocation18 + $0x220] sm:$0xf0] }
 0x224   :  { %v1009_v24 = vpop.f32.mrf.mxu3  ;;  %v1022_v30 = vpop.f32.mrf.mxu0  ;;  %v1036_v58 = vadd.f32 %v5865_v52, %v623_v23  ;;  %2841 = vmatpush.bf16.msra.mxu0 %v4169_v51  ;;  %2851 = vmatpush.bf16.msra.mxu1 %v4521_v63  ;;  %v4137_v27 = vor.u32 %v5050_v10, %v4134_v11  ;;  %v4454_v35 = vld [vmem:[#allocation18 + $0x4a0] sm:$0xf0] }
 0x225   :  { %v5871_v9 = vmul.f32 %v1057_v14, %v5822_v21  ;;  %v1089_v28 = vadd.f32 %v1088_v15, %v1087_v4  ;;  %v1010_v29 = vadd.f32 %v1009_v24, %v622_v5  ;;  %v1062_v55 = vrot.slane %v1061_v20, 1  ;;  %v4486_v14 = vld [vmem:[#allocation18 + $0x4e0] sm:$0xf0] }
 0x226   :  { %v1093_v36 = vadd.f32 %v1092_v22, %v1091_v25  ;;  %v1037_v37 = vpop.f32.mrf.mxu1  ;;  %v4809_v4 = vor.u32 %v5218_v53, %v4806_v54  ;;  %v5202_v40 = vld [vmem:[#allocation18 + $0x6c4] sm:$0xf] }
 0x227   :  { %v1108_v43 = vmul.f32 %v1089_v28, %v5822_v21  ;;  %v1112_v44 = vmul.f32 %v5871_v9, %v5871_v9  ;;  %v5876_v42 = vadd.f32 %v1022_v30, %v1010_v29  ;;  %v1063_v48 = vadd.f32 %v1062_v55, %v1061_v20  ;;  %v4742_v41 = vld [vmem:[#allocation18 + $0x6e0] sm:$0xf0] }
 0x228   :  { %v1094_v49 = vrot.slane %v1093_v36, 1  ;;  %2863 = vmatpush.bf16.msra.mxu2 %v4809_v4  ;;  %v4489_v29 = vor.u32 %v5138_v13, %v4486_v14  ;;  %v4777_v30 = vor.u32 %v5210_v18, %v4774_v19  ;;  %2842 = vmatpush.bf16.msra.mxu0 %v4137_v27  ;;  %v4745_v54 = vor.u32 %v5202_v40, %v4742_v41  ;;  %v4422_v63 = vld [vmem:[#allocation18 + $0x460] sm:$0xf0] }
 0x229   :  { %v1116_v56 = vsub.f32 %v1108_v43, %v1112_v44  ;;  %v1064_v59 = vrot.slane %v5876_v42, 4  ;;  %v1082_v60 = vmul.f32 %v5876_v42, %v5876_v42  ;;  %v5883_v61 = vmul.f32 %v1063_v48, %v5822_v21  ;;  %v5903_v43 = vld [vmem:[#allocation15] sm:$0xf]  ;;  %v5114_v18 = vld [vmem:[#allocation18 + $0x404] sm:$0xf] }
 0x22a   :  { %v1095_v62 = vadd.f32 %v1094_v49, %v1093_v36  ;;  %v1048_v3 = vpop.f32.mrf.mxu2  ;;  %2852 = vmatpush.bf16.msra.mxu1 %v4489_v29  ;;  %v4457_v49 = vor.u32 %v5130_v33, %v4454_v35  ;;  %v4390_v19 = vld [vmem:[#allocation18 + $0x420] sm:$0xf0] }
 0x22b   :  { %v5885_v0 = vadd.f32 0.9, %v1116_v56  ;;  %v1065_v1 = vadd.f32 %v1064_v59, %v5876_v42  ;;  %v1096_v2 = vrot.slane %v1082_v60, 4  ;;  %v1113_v5 = vmul.f32 %v5883_v61, %v5883_v61 }
 0x22c   :  { %v1109_v52 = vmul.f32 %v1095_v62, %v5822_v21  ;;  %v5891_v6 = vadd.f32 %v1048_v3, %v1036_v58  ;;  %v1011_v7 = vpop.f32.mrf.mxu3  ;;  %v1024_v12 = vpop.f32.mrf.mxu0  ;;  %2864 = vmatpush.bf16.msra.mxu2 %v4777_v30  ;;  %v1126_v56 = vperm.slane %v5903_v43, 0  ;;  %v1127_v58 = vperm.slane %v5903_v43, 1  ;;  %v5122_v62 = vld [vmem:[#allocation18 + $0x444] sm:$0xf] }
 0x22d   :  { %5272 = vrsqrt.f32 %v5885_v0  ;;  %v1066_v25 = vrot.slane %v1065_v1, 2  ;;  %v1097_v39 = vadd.f32 %v1096_v2, %v1082_v60  ;;  %v1121_v7 = vsub.f32 %v5854_v8, %v5871_v9 }
 0x22e   :  { %v1117_v15 = vsub.f32 %v1109_v52, %v1113_v5  ;;  %v1070_v16 = vrot.slane %v5891_v6, 4  ;;  %v1083_v17 = vmul.f32 %v5891_v6, %v5891_v6  ;;  %2853 = vmatpush.bf16.msra.mxu1 %v4457_v49  ;;  %v5194_v52 = vld [vmem:[#allocation18 + $0x684] sm:$0xf]  ;;  %v4425_v14 = vor.u32 %v5122_v62, %v4422_v63  ;;  %v5111_v62 = vld [vmem:[#allocation18 + $0x3e4] sm:$0xf0] }
 0x22f   :  { %v1067_v20 = vadd.f32 %v1066_v25, %v1065_v1  ;;  %v1098_v22 = vrot.slane %v1097_v39, 2  ;;  %v4710_v5 = vld [vmem:[#allocation18 + $0x6a0] sm:$0xf0]  ;;  %vm1148_vm11 = vweird.f32 %v5885_v0  ;;  %v4393_v30 = vor.u32 %v5114_v18, %v4390_v19  ;;  %v5103_v18 = vld [vmem:[#allocation18 + $0x3a4] sm:$0xf0] }
 0x230   :  { %v5897_v23 = vadd.f32 0.9, %v1117_v15  ;;  %v1071_v24 = vadd.f32 %v1070_v16, %v5891_v6  ;;  %v1102_v26 = vrot.slane %v1083_v17, 4  ;;  %2865 = vmatpush.bf16.msra.mxu2 %v4745_v54 }
 0x231   :  { %v1068_v57 = vrot.slane %v1067_v20, 1  ;;  %v1099_v28 = vadd.f32 %v1098_v22, %v1097_v39  ;;  %v5920_v39 = vld [vmem:[#allocation16] sm:$0xf]  ;;  %v5186_v22 = vld [vmem:[#allocation18 + $0x644] sm:$0xf] }
 0x232   :  { %5274 = vrsqrt.f32 %v5897_v23  ;;  %v1072_v31 = vrot.slane %v1071_v24, 2  ;;  %v1103_v32 = vadd.f32 %v1102_v26, %v1083_v17  ;;  %v1050_v34 = vpop.f32.mrf.mxu2  ;;  %v4713_v17 = vor.u32 %v5194_v52, %v4710_v5  ;;  %2854 = vmatpush.bf16.msra.mxu1 %v4425_v14 }
 0x233   :  { %v5901_v55 = vpop.eup %5272  ;;  %v1069_v36 = vadd.f32 %v1068_v57, %v1067_v20  ;;  %v1100_v37 = vrot.slane %v1099_v28, 1  ;;  %v1134_v26 = vmul.f32 %v1126_v56, %v1121_v7  ;;  %v1188_v27 = vperm.slane %v5920_v39, 0 }
 0x234   :  { %v1143_v44 = vmul.f32 %v5901_v55, %v5885_v0  ;;  %v1073_v45 = vadd.f32 %v1072_v31, %v1071_v24  ;;  %v1104_v46 = vrot.slane %v1103_v32, 2  ;;  %vm1149_vm10 = vweird.f32 %v5901_v55  ;;  %v4678_v24 = vld [vmem:[#allocation18 + $0x660] sm:$0xf0]  ;;  %2866 = vmatpush.bf16.msra.mxu2 %v4713_v17  ;;  %v4332_v17 = vld [vmem:[#allocation18 + $0x388] sm:$0xf] }
 0x235   :  { %v5908_v47 = vmul.f32 %v1069_v36, %v5822_v21  ;;  %v1101_v48 = vadd.f32 %v1100_v37, %v1099_v28  ;;  %vm1150_vm12 = vmor %vm1148_vm11, %vm1149_vm10  ;;  %v1122_v28 = vsub.f32 %v5860_v38, %v5883_v61  ;;  %v5178_v31 = vld [vmem:[#allocation18 + $0x604] sm:$0xf]  ;;  %v4681_v36 = vor.u32 %v5186_v22, %v4678_v24  ;;  %v4108_v61 = vld [vmem:[#allocation18 + $0x1c8] sm:$0xf] }
 0x236   :  { %v1144_v50 = vmul.f32 %v5901_v55, %v1143_v44  ;;  %v1074_v51 = vrot.slane %v1073_v45, 1  ;;  %v1105_v53 = vadd.f32 %v1104_v46, %v1103_v32  ;;  %v4646_v32 = vld [vmem:[#allocation18 + $0x620] sm:$0xf0]  ;;  %2855 = vmatpush.bf16.msra.mxu1 %v4393_v30  ;;  %vm1158_vm14 = vweird.f32 %v5897_v23  ;;  %v5047_v44 = vld [vmem:[#allocation18 + $0x1e4] sm:$0xf0] }
 0x237   :  { %v1110_v59 = vmul.f32 %v1101_v48, %v5822_v21  ;;  %v1114_v60 = vmul.f32 %v5908_v47, %v5908_v47  ;;  %v1135_v41 = vmul.f32 %v1127_v58, %v1122_v28  ;;  %v1189_v38 = vperm.slane %v5920_v39, 1  ;;  %v4076_v58 = vld [vmem:[#allocation18 + $0x188] sm:$0xf] }
 0x238   :  { %v5275_v1 = vpop.eup %5274  ;;  %v1145_v2 = vmul.f32 0.5, %v1144_v50  ;;  %v1075_v3 = vadd.f32 %v1074_v51, %v1073_v45  ;;  %v1106_v4 = vrot.slane %v1105_v53, 1  ;;  %2867 = vmatpush.bf16.msra.mxu2 %v4681_v36  ;;  %v1129_v24 = vperm.slane %v5903_v43, 3  ;;  %v4300_v28 = vld [vmem:[#allocation18 + $0x348] sm:$0xf] }
 0x239   :  { %v1153_v10 = vmul.f32 %v5275_v1, %v5897_v23  ;;  %v1118_v11 = vsub.f32 %v1110_v59, %v1114_v60  ;;  %vm1159_vm13 = vweird.f32 %v5275_v1  ;;  %v5039_v59 = vld [vmem:[#allocation18 + $0x1a4] sm:$0xf0] }
 0x23a   :  { %v1146_v25 = vsub.f32 1.5, %v1145_v2  ;;  %v5923_v12 = vmul.f32 %v1075_v3, %v5822_v21  ;;  %v1107_v13 = vadd.f32 %v1106_v4, %v1105_v53  ;;  %vm1160_vm15 = vmor %vm1158_vm14, %vm1159_vm13  ;;  %v4109_v53 = vor.u32 %v5047_v44, %v4108_v61  ;;  %v4364_v60 = vld [vmem:[#allocation18 + $0x3c8] sm:$0xf] }
 0x23b   :  { %v1154_v15 = vmul.f32 %v5275_v1, %v1153_v10  ;;  %v5925_v16 = vadd.f32 0.9, %v1118_v11  ;;  %v1128_v4 = vperm.slane %v5903_v43, 2  ;;  %v4077_v5 = vor.u32 %v5039_v59, %v4076_v58  ;;  %v4876_v58 = vld [vmem:[#allocation18 + $0x7c8] sm:$0xf] }
 0x23c   :  { %v1147_v8 = vmul.f32 %v5901_v55, %v1146_v25  ;;  %v1111_v9 = vmul.f32 %v1107_v13, %v5822_v21  ;;  %v1115_v20 = vmul.f32 %v5923_v12, %v5923_v12  ;;  %v4365_v11 = vor.u32 %v5111_v62, %v4364_v60  ;;  %v4044_v25 = vld [vmem:[#allocation18 + $0x148] sm:$0xf] }
 0x23d   :  { %v1155_v57 = vmul.f32 0.5, %v1154_v15  ;;  %5276 = vrsqrt.f32 %v5925_v16  ;;  %v5031_v13 = vld [vmem:[#allocation18 + $0x164] sm:$0xf0]  ;;  %vm1168_vm3 = vweird.f32 %v5925_v16  ;;  %v1124_v22 = vsub.f32 %v5891_v6, %v5923_v12 }
 0x23e   :  { %v1151_v0 = vsel %vm1150_vm12, %v5901_v55, %v1147_v8  ;;  %v1119_v29 = vsub.f32 %v1111_v9, %v1115_v20  ;;  %v4649_v55 = vor.u32 %v5178_v31, %v4646_v32  ;;  %v4045_v9 = vor.u32 %v5031_v13, %v4044_v25  ;;  %v4268_v6 = vld [vmem:[#allocation18 + $0x308] sm:$0xf] }
 0x23f   :  { %v1182_v33 = vmul.f32 %v1151_v0, %v1134_v26  ;;  %v1156_v35 = vsub.f32 1.5, %v1155_v57  ;;  %v4333_v26 = vor.u32 %v5103_v18, %v4332_v17  ;;  %v5023_v57 = vld [vmem:[#allocation18 + $0x124] sm:$0xf0]  ;;  %v1137_v12 = vmul.f32 %v1129_v24, %v1124_v22 }
 0x240   :  { %v5939_v37 = vadd.f32 0.9, %v1119_v29  ;;  %2868 = vmatpush.bf16.msra.mxu2 %v4649_v55  ;;  %v5095_v29 = vld [vmem:[#allocation18 + $0x364] sm:$0xf0]  ;;  %v1191_v43 = vperm.slane %v5920_v39, 3 }
 0x241   :  { %v1196_v34 = vadd.f32 %v1188_v27, %v1182_v33  ;;  %v1157_v40 = vmul.f32 %v5275_v1, %v1156_v35  ;;  %v4012_v27 = vld [vmem:[#allocation18 + $0x108] sm:$0xf]  ;;  %v4301_v36 = vor.u32 %v5095_v29, %v4300_v28 }
 0x242   :  { %5278 = vrsqrt.f32 %v5939_v37  ;;  %vm1178_vm6 = vweird.f32 %v5939_v37  ;;  %v4013_v32 = vor.u32 %v5023_v57, %v4012_v27  ;;  %v3980_v33 = vld [vmem:[#allocation18 + $0xc8] sm:$0xf]  ;;  %v5043_v57 = vld [vmem:[#allocation18 + $0x1cc] sm:$0xf] }
 0x243   :  { %v5277_v45 = vpop.eup %5276  ;;  %vm1200_vm0 = vcmp.gt.f32.partialorder %v1196_v34, 0.0  ;;  %v1204_v46 = vmul.f32 0.2, %v1196_v34  ;;  %v1161_v48 = vsel %vm1160_vm15, %v5275_v1, %v1157_v40  ;;  %v1123_v1 = vsub.f32 %v5876_v42, %v5908_v47  ;;  %v5015_v35 = vld [vmem:[#allocation18 + $0xe4] sm:$0xf0] }
 0x244   :  { %v1183_v49 = vmul.f32 %v1161_v48, %v1135_v41  ;;  %v1163_v50 = vmul.f32 %v5277_v45, %v5925_v16  ;;  %vm1169_vm2 = vweird.f32 %v5277_v45  ;;  %v1190_v47 = vperm.slane %v5920_v39, 2  ;;  %v5175_v40 = vld [vmem:[#allocation18 + $0x5e4] sm:$0xf0] }
 0x245   :  { %v1208_v51 = vsel %vm1200_vm0, %v1196_v34, %v1204_v46  ;;  %v1136_v42 = vmul.f32 %v1128_v4, %v1123_v1  ;;  %vm1170_vm4 = vmor %vm1168_vm3, %vm1169_vm2  ;;  %v4620_v34 = vld [vmem:[#allocation18 + $0x5c8] sm:$0xf] }
 0x246   :  { %v5945_v23 = vpack.c.bf16 %v1208_v51, %v1208_v51  ;;  %v1197_v54 = vadd.f32 %v1189_v38, %v1183_v49  ;;  %v1164_v56 = vmul.f32 %v5277_v45, %v1163_v50  ;;  %v5087_v38 = vld [vmem:[#allocation18 + $0x324] sm:$0xf0] }
 0x247   :  { %v3948_v46 = vld [vmem:[#allocation18 + $0x88] sm:$0xf]  ;;  %v4269_v50 = vor.u32 %v5087_v38, %v4268_v6 }
 0x248   :  { %v5279_v63 = vpop.eup %5278  ;;  %vm1201_vm1 = vcmp.gt.f32.partialorder %v1197_v54, 0.0  ;;  %v1205_v2 = vmul.f32 0.2, %v1197_v54  ;;  %v1165_v3 = vmul.f32 0.5, %v1164_v56  ;;  %2778 = vmatmul.bf16.vlgmr.msra.gmra.mxu3 %v5945_v23  ;;  %v5007_v39 = vld [vmem:[#allocation18 + $0xa4] sm:$0xf0] }
 0x249   :  { %v1173_v52 = vmul.f32 %v5279_v63, %v5939_v37  ;;  %2874 = vmatpush.bf16.msra.mxu3 %v4109_v53  ;;  %vm1179_vm5 = vweird.f32 %v5279_v63  ;;  %v3981_v37 = vor.u32 %v5015_v35, %v3980_v33  ;;  %v4236_v51 = vld [vmem:[#allocation18 + $0x2c8] sm:$0xf] }
 0x24a   :  { %v1209_v7 = vsel %vm1201_vm1, %v1197_v54, %v1205_v2  ;;  %v1166_v10 = vsub.f32 1.5, %v1165_v3  ;;  %vm1180_vm7 = vmor %vm1178_vm6, %vm1179_vm5  ;;  %v5079_v53 = vld [vmem:[#allocation18 + $0x2e4] sm:$0xf0] }
 0x24b   :  { %v5952_v14 = vpack.c.bf16 %v1209_v7, %v1209_v7  ;;  %v1174_v15 = vmul.f32 %v5279_v63, %v1173_v52  ;;  %v4588_v54 = vld [vmem:[#allocation18 + $0x588] sm:$0xf]  ;;  %v4237_v2 = vor.u32 %v5079_v53, %v4236_v51  ;;  %v4046_v51 = vld [vmem:[#allocation18 + $0x168] sm:$0xf0] }
 0x24c   :  { %v1167_v19 = vmul.f32 %v5277_v45, %v1166_v10  ;;  %v5167_v56 = vld [vmem:[#allocation18 + $0x5a4] sm:$0xf0]  ;;  %v5099_v53 = vld [vmem:[#allocation18 + $0x38c] sm:$0xf] }
 0x24d   :  { %v1175_v8 = vmul.f32 0.5, %v1174_v15  ;;  %2791 = vmatmul.bf16.vlgmr.msrb.gmra.mxu0 %v5952_v14  ;;  %2875 = vmatpush.bf16.msra.mxu3 %v4077_v5  ;;  %v5239_v60 = vld [vmem:[#allocation18 + $0x7e4] sm:$0xf0]  ;;  %v4589_v52 = vor.u32 %v5167_v56, %v4588_v54  ;;  %v4334_v54 = vld [vmem:[#allocation18 + $0x3a8] sm:$0xf0] }
 0x24e   :  { %v1171_v20 = vsel %vm1170_vm4, %v5277_v45, %v1167_v19  ;;  %2887 = vmatpush.bf16.msrb.mxu0 %v4365_v11  ;;  %v4621_v45 = vor.u32 %v5175_v40, %v4620_v34  ;;  %v3916_v3 = vld [vmem:[#allocation18 + $0x48] sm:$0xf]  ;;  %v4877_v5 = vor.u32 %v5239_v60, %v4876_v58  ;;  %v4078_v34 = vld [vmem:[#allocation18 + $0x1a8] sm:$0xf0] }
 0x24f   :  { %v1184_v16 = vmul.f32 %v1171_v20, %v1136_v42  ;;  %v1176_v0 = vsub.f32 1.5, %v1175_v8  ;;  %v4999_v1 = vld [vmem:[#allocation18 + $0x64] sm:$0xf0]  ;;  %v5107_v40 = vld [vmem:[#allocation18 + $0x3cc] sm:$0xf] }
 0x250   :  { %v4204_v7 = vld [vmem:[#allocation18 + $0x288] sm:$0xf]  ;;  %v3917_v17 = vor.u32 %v4999_v1, %v3916_v3  ;;  %v5019_v1 = vld [vmem:[#allocation18 + $0x10c] sm:$0xf] }
 0x251   :  { %v1198_v30 = vadd.f32 %v1190_v47, %v1184_v16  ;;  %v1177_v31 = vmul.f32 %v5279_v63, %v1176_v0  ;;  %2876 = vmatpush.bf16.msra.mxu3 %v4045_v9  ;;  %v5071_v10 = vld [vmem:[#allocation18 + $0x2a4] sm:$0xf0]  ;;  %v4110_v16 = vld [vmem:[#allocation18 + $0x1e8] sm:$0xf0] }
 0x252   :  { %2888 = vmatpush.bf16.msrb.mxu0 %v4333_v26  ;;  %v4556_v11 = vld [vmem:[#allocation18 + $0x548] sm:$0xf]  ;;  %v4205_v18 = vor.u32 %v5071_v10, %v4204_v7  ;;  %v4113_v6 = vor.u32 %v5043_v57, %v4110_v16  ;;  %v4302_v7 = vld [vmem:[#allocation18 + $0x368] sm:$0xf0] }
 0x253   :  { %vm1202_vm8 = vcmp.gt.f32.partialorder %v1198_v30, 0.0  ;;  %v1206_v55 = vmul.f32 0.2, %v1198_v30  ;;  %v1181_v41 = vsel %vm1180_vm7, %v5279_v63, %v1177_v31  ;;  %v3949_v63 = vor.u32 %v5007_v39, %v3948_v46  ;;  %v5159_v25 = vld [vmem:[#allocation18 + $0x564] sm:$0xf0] }
 0x254   :  { %v1185_v61 = vmul.f32 %v1181_v41, %v1137_v12  ;;  %v4844_v13 = vld [vmem:[#allocation18 + $0x788] sm:$0xf]  ;;  %v4557_v47 = vor.u32 %v5159_v25, %v4556_v11  ;;  %v5027_v39 = vld [vmem:[#allocation18 + $0x14c] sm:$0xf] }
 0x255   :  { %v1210_v44 = vsel %vm1202_vm8, %v1198_v30, %v1206_v55  ;;  %2877 = vmatpush.bf16.msra.mxu3 %v4013_v32  ;;  %v5231_v15 = vld [vmem:[#allocation18 + $0x7a4] sm:$0xf0]  ;;  %v4366_v55 = vld [vmem:[#allocation18 + $0x3e8] sm:$0xf0] }
 0x256   :  { %v5962_v48 = vpack.c.bf16 %v1210_v44, %v1210_v44  ;;  %v1199_v49 = vadd.f32 %v1191_v43, %v1185_v61  ;;  %2889 = vmatpush.bf16.msrb.mxu0 %v4301_v36  ;;  %v3884_v19 = vld [vmem:[#allocation18 + $0x8] sm:$0xf]  ;;  %v4845_v8 = vor.u32 %v5231_v15, %v4844_v13  ;;  %v5035_v36 = vld [vmem:[#allocation18 + $0x18c] sm:$0xf]  ;;  %v4369_v46 = vor.u32 %v5107_v40, %v4366_v55 }
 0x257   :  { %v4991_v42 = vld [vmem:[#allocation18 + $0x24] sm:$0xf0]  ;;  %v4995_v40 = vld [vmem:[#allocation18 + $0x4c] sm:$0xf] }
 0x258   :  { %vm1203_vm9 = vcmp.gt.f32.partialorder %v1199_v49, 0.0  ;;  %v1207_v59 = vmul.f32 0.2, %v1199_v49  ;;  %2804 = vmatmul.bf16.vlgmr.msrb.gmra.mxu1 %v5962_v48  ;;  %2830 = vmatmul.bf16.vlgmr.msrb.gmra.mxu3 %v5945_v23  ;;  %v4172_v9 = vld [vmem:[#allocation18 + $0x248] sm:$0xf]  ;;  %v3885_v0 = vor.u32 %v4991_v42, %v3884_v19 }
 0x259   :  { %2878 = vmatpush.bf16.msra.mxu3 %v3981_v37  ;;  %2900 = vmatpush.bf16.msrb.mxu1 %v4621_v45  ;;  %v5063_v20 = vld [vmem:[#allocation18 + $0x264] sm:$0xf0]  ;;  %v4081_v45 = vor.u32 %v5035_v36, %v4078_v34  ;;  %v5011_v42 = vld [vmem:[#allocation18 + $0xcc] sm:$0xf] }
 0x25a   :  { %v1211_v62 = vsel %vm1203_vm9, %v1199_v49, %v1207_v59  ;;  %2890 = vmatpush.bf16.msrb.mxu0 %v4269_v50  ;;  %v4524_v22 = vld [vmem:[#allocation18 + $0x508] sm:$0xf]  ;;  %v4173_v28 = vor.u32 %v5063_v20, %v4172_v9  ;;  %v4270_v9 = vld [vmem:[#allocation18 + $0x328] sm:$0xf0] }
 0x25b   :  { %v5966_v4 = vpack.c.bf16 %v1211_v62, %v1211_v62  ;;  %v5151_v24 = vld [vmem:[#allocation18 + $0x524] sm:$0xf0]  ;;  %v4049_v62 = vor.u32 %v5027_v39, %v4046_v51  ;;  %v5171_v20 = vld [vmem:[#allocation18 + $0x5cc] sm:$0xf] }
 0x25c   :  { %v4812_v26 = vld [vmem:[#allocation18 + $0x748] sm:$0xf]  ;;  %v4525_v30 = vor.u32 %v5151_v24, %v4524_v22  ;;  %v4622_v22 = vld [vmem:[#allocation18 + $0x5e8] sm:$0xf0] }
 0x25d   :  { %2817 = vmatmul.bf16.vlgmr.msrb.gmra.mxu2 %v5966_v4  ;;  %2843 = vmatmul.bf16.vlgmr.msra.gmra.mxu0 %v5952_v14  ;;  %v5223_v27 = vld [vmem:[#allocation18 + $0x764] sm:$0xf0]  ;;  %v3918_v55 = vld [vmem:[#allocation18 + $0x68] sm:$0xf0] }
 0x25e   :  { %2879 = vmatpush.bf16.msra.mxu3 %v3949_v63  ;;  %2891 = vmatpush.bf16.msrb.mxu0 %v4237_v2  ;;  %v4140_v29 = vld [vmem:[#allocation18 + $0x208] sm:$0xf]  ;;  %v4813_v31 = vor.u32 %v5223_v27, %v4812_v26  ;;  %v4337_v63 = vor.u32 %v5099_v53, %v4334_v54  ;;  %v4987_v51 = vld [vmem:[#allocation18 + $0xc] sm:$0xf] }
 0x25f   :  { %2901 = vmatpush.bf16.msrb.mxu1 %v4589_v52  ;;  %2913 = vmatpush.bf16.msrb.mxu2 %v4877_v5  ;;  %v5055_v32 = vld [vmem:[#allocation18 + $0x224] sm:$0xf0]  ;;  %v4014_v52 = vld [vmem:[#allocation18 + $0x128] sm:$0xf0] }
 0x260   :  { %v4492_v33 = vld [vmem:[#allocation18 + $0x4c8] sm:$0xf]  ;;  %v4141_v41 = vor.u32 %v5055_v32, %v4140_v29  ;;  %v5091_v5 = vld [vmem:[#allocation18 + $0x34c] sm:$0xf]  ;;  %v4017_v15 = vor.u32 %v5019_v1, %v4014_v52  ;;  %v5048_v1 = vld [vmem:[#allocation18 + $0x1ec] sm:$0xf0] }
 0x261   :  { %v5143_v35 = vld [vmem:[#allocation18 + $0x4e4] sm:$0xf0]  ;;  %v3950_v29 = vld [vmem:[#allocation18 + $0xa8] sm:$0xf0] }
 0x262   :  { %2880 = vmatpush.bf16.msra.mxu3 %v3917_v17  ;;  %2892 = vmatpush.bf16.msrb.mxu0 %v4205_v18  ;;  %v4780_v12 = vld [vmem:[#allocation18 + $0x708] sm:$0xf]  ;;  %v4493_v38 = vor.u32 %v5143_v35, %v4492_v33  ;;  %v4305_v17 = vor.u32 %v5091_v5, %v4302_v7  ;;  %v4238_v32 = vld [vmem:[#allocation18 + $0x2e8] sm:$0xf0] }
 0x263   :  { %2902 = vmatpush.bf16.msrb.mxu1 %v4557_v47  ;;  %2914 = vmatpush.bf16.msrb.mxu2 %v4845_v8  ;;  %v5215_v43 = vld [vmem:[#allocation18 + $0x724] sm:$0xf0]  ;;  %v3982_v47 = vld [vmem:[#allocation18 + $0xe8] sm:$0xf0] }
 0x264   :  { %v4781_v61 = vor.u32 %v5215_v43, %v4780_v12  ;;  %v4460_v44 = vld [vmem:[#allocation18 + $0x488] sm:$0xf]  ;;  %v5083_v8 = vld [vmem:[#allocation18 + $0x30c] sm:$0xf]  ;;  %v3985_v57 = vor.u32 %v5011_v42, %v3982_v47  ;;  %v4084_v42 = vld [vmem:[#allocation18 + $0x190] sm:$0xf] }
 0x265   :  { %v5135_v37 = vld [vmem:[#allocation18 + $0x4a4] sm:$0xf0]  ;;  %v4273_v16 = vor.u32 %v5083_v8, %v4270_v9  ;;  %v5163_v33 = vld [vmem:[#allocation18 + $0x58c] sm:$0xf]  ;;  %v5040_v47 = vld [vmem:[#allocation18 + $0x1ac] sm:$0xf0] }
 0x266   :  { %2881 = vmatpush.bf16.msra.mxu3 %v3885_v0  ;;  %2893 = vmatpush.bf16.msrb.mxu0 %v4173_v28  ;;  %v4748_v49 = vld [vmem:[#allocation18 + $0x6c8] sm:$0xf]  ;;  %v4461_v56 = vor.u32 %v5135_v37, %v4460_v44  ;;  %v5003_v28 = vld [vmem:[#allocation18 + $0x8c] sm:$0xf]  ;;  %v4372_v8 = vld [vmem:[#allocation18 + $0x3d0] sm:$0xf] }
 0x267   :  { %2903 = vmatpush.bf16.msrb.mxu1 %v4525_v30  ;;  %2915 = vmatpush.bf16.msrb.mxu2 %v4813_v31  ;;  %v5207_v50 = vld [vmem:[#allocation18 + $0x6e4] sm:$0xf0]  ;;  %v4625_v30 = vor.u32 %v5171_v20, %v4622_v22  ;;  %v5075_v31 = vld [vmem:[#allocation18 + $0x2cc] sm:$0xf]  ;;  %v3953_v36 = vor.u32 %v5003_v28, %v3950_v29  ;;  %v5112_v9 = vld [vmem:[#allocation18 + $0x3ec] sm:$0xf0] }
 0x268   :  { %2856 = vmatmul.bf16.vlgmr.msra.gmra.mxu1 %v5962_v48  ;;  %v4749_v58 = vor.u32 %v5207_v50, %v4748_v49  ;;  %v4428_v59 = vld [vmem:[#allocation18 + $0x448] sm:$0xf]  ;;  %v4590_v35 = vld [vmem:[#allocation18 + $0x5a8] sm:$0xf0]  ;;  %v4241_v34 = vor.u32 %v5075_v31, %v4238_v32  ;;  %v3921_v50 = vor.u32 %v4995_v40, %v3918_v55  ;;  %v4052_v29 = vld [vmem:[#allocation18 + $0x150] sm:$0xf] }
 0x269   :  { %2882 = vmatmul.bf16.vlgmr.msra.gmra.mxu3 %v5945_v23  ;;  %v5127_v60 = vld [vmem:[#allocation18 + $0x464] sm:$0xf0]  ;;  %v4878_v12 = vld [vmem:[#allocation18 + $0x7e8] sm:$0xf0]  ;;  %v4340_v31 = vld [vmem:[#allocation18 + $0x390] sm:$0xf] }
 0x26a   :  { %2926 = vmatpush.bf16.msrb.mxu3 %v4113_v6  ;;  %2894 = vmatpush.bf16.msrb.mxu0 %v4141_v41  ;;  %v4716_v2 = vld [vmem:[#allocation18 + $0x688] sm:$0xf]  ;;  %v4429_v10 = vor.u32 %v5127_v60, %v4428_v59  ;;  %v5235_v6 = vld [vmem:[#allocation18 + $0x7cc] sm:$0xf]  ;;  %v4593_v41 = vor.u32 %v5163_v33, %v4590_v35  ;;  %v5104_v32 = vld [vmem:[#allocation18 + $0x3ac] sm:$0xf0] }
 0x26b   :  { %2904 = vmatpush.bf16.msrb.mxu1 %v4493_v38  ;;  %2916 = vmatpush.bf16.msrb.mxu2 %v4781_v61  ;;  %v5199_v3 = vld [vmem:[#allocation18 + $0x6a4] sm:$0xf0]  ;;  %v4881_v38 = vor.u32 %v5235_v6, %v4878_v12  ;;  %v5067_v61 = vld [vmem:[#allocation18 + $0x28c] sm:$0xf]  ;;  %v4020_v55 = vld [vmem:[#allocation18 + $0x110] sm:$0xf] }
 0x26c   :  { %v4717_v11 = vor.u32 %v5199_v3, %v4716_v2  ;;  %v4396_v25 = vld [vmem:[#allocation18 + $0x408] sm:$0xf]  ;;  %v4206_v44 = vld [vmem:[#allocation18 + $0x2a8] sm:$0xf0]  ;;  %v4116_v3 = vld [vmem:[#allocation18 + $0x1d0] sm:$0xf] }
 0x26d   :  { %2869 = vmatmul.bf16.vlgmr.msra.gmra.mxu2 %v5966_v4  ;;  %2895 = vmatmul.bf16.vlgmr.msrb.gmra.mxu0 %v5952_v14  ;;  %v5119_v13 = vld [vmem:[#allocation18 + $0x424] sm:$0xf0]  ;;  %v5155_v37 = vld [vmem:[#allocation18 + $0x54c] sm:$0xf]  ;;  %v4209_v39 = vor.u32 %v5067_v61, %v4206_v44  ;;  %v5096_v61 = vld [vmem:[#allocation18 + $0x36c] sm:$0xf0] }
 0x26e   :  { %2927 = vmatpush.bf16.msrb.mxu3 %v4081_v45  ;;  %2939 = vmatpush.bf16.msra.mxu0 %v4369_v46  ;;  %v4684_v18 = vld [vmem:[#allocation18 + $0x648] sm:$0xf]  ;;  %v4397_v24 = vor.u32 %v5119_v13, %v4396_v25  ;;  %v4558_v45 = vld [vmem:[#allocation18 + $0x568] sm:$0xf0] }
 0x26f   :  { %2905 = vmatpush.bf16.msrb.mxu1 %v4461_v56  ;;  %2917 = vmatpush.bf16.msrb.mxu2 %v4749_v58  ;;  %v5191_v19 = vld [vmem:[#allocation18 + $0x664] sm:$0xf0]  ;;  %v5227_v46 = vld [vmem:[#allocation18 + $0x78c] sm:$0xf]  ;;  %v4561_v54 = vor.u32 %v5155_v37, %v4558_v45 }
 0x270   :  { %v4685_v26 = vor.u32 %v5191_v19, %v4684_v18  ;;  %v4652_v27 = vld [vmem:[#allocation18 + $0x608] sm:$0xf]  ;;  %v4846_v49 = vld [vmem:[#allocation18 + $0x7a8] sm:$0xf0] }
 0x271   :  { %v5183_v0 = vld [vmem:[#allocation18 + $0x624] sm:$0xf0]  ;;  %v3886_v53 = vld [vmem:[#allocation18 + $0x28] sm:$0xf0]  ;;  %v4849_v56 = vor.u32 %v5227_v46, %v4846_v49 }
 0x272   :  { %2928 = vmatpush.bf16.msrb.mxu3 %v4049_v62  ;;  %2940 = vmatpush.bf16.msra.mxu0 %v4337_v63  ;;  %v4653_v43 = vor.u32 %v5183_v0, %v4652_v27  ;;  %v5059_v58 = vld [vmem:[#allocation18 + $0x24c] sm:$0xf]  ;;  %v3889_v52 = vor.u32 %v4987_v51, %v3886_v53  ;;  %v3988_v53 = vld [vmem:[#allocation18 + $0xd0] sm:$0xf] }
 0x273   :  { %2906 = vmatpush.bf16.msrb.mxu1 %v4429_v10  ;;  %2918 = vmatpush.bf16.msrb.mxu2 %v4717_v11  ;;  %v4174_v59 = vld [vmem:[#allocation18 + $0x268] sm:$0xf0] }
 0x274   :  { %v5147_v60 = vld [vmem:[#allocation18 + $0x50c] sm:$0xf]  ;;  %v4177_v5 = vor.u32 %v5059_v58, %v4174_v59  ;;  %v5088_v58 = vld [vmem:[#allocation18 + $0x32c] sm:$0xf0] }
 0x275   :  { %v4526_v62 = vld [vmem:[#allocation18 + $0x528] sm:$0xf0]  ;;  %v4628_v59 = vld [vmem:[#allocation18 + $0x5d0] sm:$0xf] }
 0x276   :  { %2929 = vmatpush.bf16.msrb.mxu3 %v4017_v15  ;;  %2941 = vmatpush.bf16.msra.mxu0 %v4305_v17  ;;  %v5219_v63 = vld [vmem:[#allocation18 + $0x74c] sm:$0xf]  ;;  %v4529_v10 = vor.u32 %v5147_v60, %v4526_v62  ;;  %v4117_v17 = vor.u32 %v5048_v1, %v4116_v3  ;;  %v5176_v60 = vld [vmem:[#allocation18 + $0x5ec] sm:$0xf0] }
 0x277   :  { %2907 = vmatpush.bf16.msrb.mxu1 %v4397_v24  ;;  %2919 = vmatpush.bf16.msrb.mxu2 %v4685_v26  ;;  %v4814_v2 = vld [vmem:[#allocation18 + $0x768] sm:$0xf0] }
 0x278   :  { %v5051_v7 = vld [vmem:[#allocation18 + $0x20c] sm:$0xf]  ;;  %v4817_v11 = vor.u32 %v5219_v63, %v4814_v2 }
 0x279   :  { %v4142_v25 = vld [vmem:[#allocation18 + $0x228] sm:$0xf0] }
 0x27a   :  { %2930 = vmatpush.bf16.msrb.mxu3 %v3985_v57  ;;  %2942 = vmatpush.bf16.msra.mxu0 %v4273_v16  ;;  %v5139_v13 = vld [vmem:[#allocation18 + $0x4cc] sm:$0xf]  ;;  %v4145_v20 = vor.u32 %v5051_v7, %v4142_v25  ;;  %v4085_v57 = vor.u32 %v5040_v47, %v4084_v42  ;;  %v4373_v16 = vor.u32 %v5112_v9, %v4372_v8  ;;  %v5008_v7 = vld [vmem:[#allocation18 + $0xac] sm:$0xf0] }
 0x27b   :  { %2952 = vmatpush.bf16.msra.mxu1 %v4625_v30  ;;  %2920 = vmatpush.bf16.msrb.mxu2 %v4653_v43  ;;  %v4494_v15 = vld [vmem:[#allocation18 + $0x4e8] sm:$0xf0]  ;;  %v5032_v30 = vld [vmem:[#allocation18 + $0x16c] sm:$0xf0] }
 0x27c   :  { %2908 = vmatmul.bf16.vlgmr.msrb.gmra.mxu1 %v5962_v48  ;;  %v5211_v18 = vld [vmem:[#allocation18 + $0x70c] sm:$0xf]  ;;  %v4497_v22 = vor.u32 %v5139_v13, %v4494_v15  ;;  %v4053_v43 = vor.u32 %v5032_v30, %v4052_v29  ;;  %v5080_v25 = vld [vmem:[#allocation18 + $0x2ec] sm:$0xf0] }
 0x27d   :  { %v4782_v19 = vld [vmem:[#allocation18 + $0x728] sm:$0xf0]  ;;  %v4596_v13 = vld [vmem:[#allocation18 + $0x590] sm:$0xf] }
 0x27e   :  { %2931 = vmatpush.bf16.msrb.mxu3 %v3953_v36  ;;  %2943 = vmatpush.bf16.msra.mxu0 %v4241_v34  ;;  %v4785_v24 = vor.u32 %v5211_v18, %v4782_v19  ;;  %v5131_v26 = vld [vmem:[#allocation18 + $0x48c] sm:$0xf]  ;;  %v4341_v36 = vor.u32 %v5104_v32, %v4340_v31  ;;  %v5168_v15 = vld [vmem:[#allocation18 + $0x5ac] sm:$0xf0] }
 0x27f   :  { %2953 = vmatpush.bf16.msra.mxu1 %v4593_v41  ;;  %2965 = vmatpush.bf16.msra.mxu2 %v4881_v38  ;;  %v4462_v27 = vld [vmem:[#allocation18 + $0x4a8] sm:$0xf0]  ;;  %v5024_v41 = vld [vmem:[#allocation18 + $0x12c] sm:$0xf0] }
 0x280   :  { %2921 = vmatmul.bf16.vlgmr.msrb.gmra.mxu2 %v5966_v4  ;;  %v5203_v0 = vld [vmem:[#allocation18 + $0x6cc] sm:$0xf]  ;;  %v4465_v33 = vor.u32 %v5131_v26, %v4462_v27  ;;  %v4308_v38 = vld [vmem:[#allocation18 + $0x350] sm:$0xf]  ;;  %v4021_v49 = vor.u32 %v5024_v41, %v4020_v55  ;;  %v4118_v55 = vld [vmem:[#allocation18 + $0x1f0] sm:$0xf0] }
 0x281   :  { %v4750_v28 = vld [vmem:[#allocation18 + $0x6e8] sm:$0xf0]  ;;  %v5240_v18 = vld [vmem:[#allocation18 + $0x7ec] sm:$0xf0] }
 0x282   :  { %2932 = vmatpush.bf16.msrb.mxu3 %v3921_v50  ;;  %2944 = vmatpush.bf16.msra.mxu0 %v4209_v39  ;;  %v4753_v35 = vor.u32 %v5203_v0, %v4750_v28  ;;  %v5123_v6 = vld [vmem:[#allocation18 + $0x44c] sm:$0xf]  ;;  %v4309_v50 = vor.u32 %v5096_v61, %v4308_v38  ;;  %v3924_v8 = vld [vmem:[#allocation18 + $0x50] sm:$0xf] }
 0x283   :  { %2954 = vmatpush.bf16.msra.mxu1 %v4561_v54  ;;  %2966 = vmatpush.bf16.msra.mxu2 %v4849_v56  ;;  %v4430_v12 = vld [vmem:[#allocation18 + $0x468] sm:$0xf0]  ;;  %v5016_v54 = vld [vmem:[#allocation18 + $0xec] sm:$0xf0] }
 0x284   :  { %v5195_v34 = vld [vmem:[#allocation18 + $0x68c] sm:$0xf]  ;;  %v4433_v44 = vor.u32 %v5123_v6, %v4430_v12  ;;  %v4276_v56 = vld [vmem:[#allocation18 + $0x310] sm:$0xf]  ;;  %v3989_v3 = vor.u32 %v5016_v54, %v3988_v53  ;;  %v5036_v53 = vld [vmem:[#allocation18 + $0x194] sm:$0xf] }
 0x285   :  { %v4718_v40 = vld [vmem:[#allocation18 + $0x6a8] sm:$0xf0]  ;;  %v4277_v1 = vor.u32 %v5088_v58, %v4276_v56  ;;  %v5000_v9 = vld [vmem:[#allocation18 + $0x6c] sm:$0xf0]  ;;  %v4086_v54 = vld [vmem:[#allocation18 + $0x1b0] sm:$0xf0] }
 0x286   :  { %2933 = vmatpush.bf16.msrb.mxu3 %v3889_v52  ;;  %2945 = vmatpush.bf16.msra.mxu0 %v4177_v5  ;;  %v4721_v37 = vor.u32 %v5195_v34, %v4718_v40  ;;  %v5115_v45 = vld [vmem:[#allocation18 + $0x40c] sm:$0xf]  ;;  %v3956_v5 = vld [vmem:[#allocation18 + $0x90] sm:$0xf]  ;;  %v3925_v28 = vor.u32 %v5000_v9, %v3924_v8  ;;  %v5044_v40 = vld [vmem:[#allocation18 + $0x1d4] sm:$0xf] }
 0x287   :  { %2955 = vmatpush.bf16.msra.mxu1 %v4529_v10  ;;  %2967 = vmatpush.bf16.msra.mxu2 %v4817_v11  ;;  %v4398_v46 = vld [vmem:[#allocation18 + $0x428] sm:$0xf0]  ;;  %v4629_v10 = vor.u32 %v5176_v60, %v4628_v59  ;;  %v4244_v11 = vld [vmem:[#allocation18 + $0x2d0] sm:$0xf]  ;;  %v3957_v42 = vor.u32 %v5008_v7, %v3956_v5  ;;  %v5108_v56 = vld [vmem:[#allocation18 + $0x3d4] sm:$0xf] }
 0x288   :  { %v5187_v39 = vld [vmem:[#allocation18 + $0x64c] sm:$0xf]  ;;  %v4401_v62 = vor.u32 %v5115_v45, %v4398_v46  ;;  %v4245_v47 = vor.u32 %v5080_v25, %v4244_v11  ;;  %v5072_v26 = vld [vmem:[#allocation18 + $0x2ac] sm:$0xf0]  ;;  %v4374_v58 = vld [vmem:[#allocation18 + $0x3f0] sm:$0xf0] }
 0x289   :  { %2934 = vmatmul.bf16.vlgmr.msrb.gmra.mxu3 %v5945_v23  ;;  %v4686_v51 = vld [vmem:[#allocation18 + $0x668] sm:$0xf0]  ;;  %v4564_v27 = vld [vmem:[#allocation18 + $0x550] sm:$0xf]  ;;  %v5028_v7 = vld [vmem:[#allocation18 + $0x154] sm:$0xf] }
 0x28a   :  { %2978 = vmatpush.bf16.msra.mxu3 %v4117_v17  ;;  %2946 = vmatpush.bf16.msra.mxu0 %v4145_v20  ;;  %v4689_v63 = vor.u32 %v5187_v39, %v4686_v51  ;;  %v5179_v2 = vld [vmem:[#allocation18 + $0x60c] sm:$0xf]  ;;  %v4884_v17 = vld [vmem:[#allocation18 + $0x7d0] sm:$0xf]  ;;  %v4597_v20 = vor.u32 %v5168_v15, %v4596_v13  ;;  %v5100_v11 = vld [vmem:[#allocation18 + $0x394] sm:$0xf] }
 0x28b   :  { %2956 = vmatpush.bf16.msra.mxu1 %v4497_v22  ;;  %2968 = vmatpush.bf16.msra.mxu2 %v4785_v24  ;;  %v4654_v52 = vld [vmem:[#allocation18 + $0x628] sm:$0xf0]  ;;  %v4885_v22 = vor.u32 %v5240_v18, %v4884_v17  ;;  %v4212_v24 = vld [vmem:[#allocation18 + $0x290] sm:$0xf]  ;;  %v4342_v25 = vld [vmem:[#allocation18 + $0x3b0] sm:$0xf0] }
 0x28c   :  { %v4657_v19 = vor.u32 %v5179_v2, %v4654_v52  ;;  %v5232_v0 = vld [vmem:[#allocation18 + $0x7ac] sm:$0xf0]  ;;  %v4213_v29 = vor.u32 %v5072_v26, %v4212_v24  ;;  %v5020_v9 = vld [vmem:[#allocation18 + $0x114] sm:$0xf] }
 0x28d   :  { %2947 = vmatmul.bf16.vlgmr.msra.gmra.mxu0 %v5952_v14  ;;  %v3892_v30 = vld [vmem:[#allocation18 + $0x10] sm:$0xf]  ;;  %v4310_v24 = vld [vmem:[#allocation18 + $0x370] sm:$0xf0] }
 0x28e   :  { %2979 = vmatpush.bf16.msra.mxu3 %v4085_v57  ;;  %2991 = vmatpush.bf16.msrb.mxu0 %v4373_v16  ;;  %v5160_v57 = vld [vmem:[#allocation18 + $0x56c] sm:$0xf0] }
 0x28f   :  { %2957 = vmatpush.bf16.msra.mxu1 %v4465_v33  ;;  %2969 = vmatpush.bf16.msra.mxu2 %v4753_v35  ;;  %v4852_v16 = vld [vmem:[#allocation18 + $0x790] sm:$0xf]  ;;  %v4565_v32 = vor.u32 %v5160_v57, %v4564_v27 }
 0x290   :  { %v4992_v31 = vld [vmem:[#allocation18 + $0x2c] sm:$0xf0]  ;;  %v4853_v33 = vor.u32 %v5232_v0, %v4852_v16 }
 0x291   :  { %v4180_v35 = vld [vmem:[#allocation18 + $0x250] sm:$0xf]  ;;  %v3893_v41 = vor.u32 %v4992_v31, %v3892_v30  ;;  %v5012_v31 = vld [vmem:[#allocation18 + $0xd4] sm:$0xf] }
 0x292   :  { %2980 = vmatpush.bf16.msra.mxu3 %v4053_v43  ;;  %2992 = vmatpush.bf16.msrb.mxu0 %v4341_v36  ;;  %v5064_v6 = vld [vmem:[#allocation18 + $0x26c] sm:$0xf0] }
 0x293   :  { %2958 = vmatpush.bf16.msra.mxu1 %v4433_v44  ;;  %2970 = vmatpush.bf16.msra.mxu2 %v4721_v37  ;;  %v4532_v12 = vld [vmem:[#allocation18 + $0x510] sm:$0xf]  ;;  %v4181_v38 = vor.u32 %v5064_v6, %v4180_v35  ;;  %v4278_v35 = vld [vmem:[#allocation18 + $0x330] sm:$0xf0] }
 0x294   :  { %v5152_v43 = vld [vmem:[#allocation18 + $0x52c] sm:$0xf0]  ;;  %v5172_v6 = vld [vmem:[#allocation18 + $0x5d4] sm:$0xf] }
 0x295   :  { %v4820_v36 = vld [vmem:[#allocation18 + $0x750] sm:$0xf]  ;;  %v4533_v44 = vor.u32 %v5152_v43, %v4532_v12  ;;  %v4630_v12 = vld [vmem:[#allocation18 + $0x5f0] sm:$0xf0] }
 0x296   :  { %2981 = vmatpush.bf16.msra.mxu3 %v4021_v49  ;;  %2993 = vmatpush.bf16.msrb.mxu0 %v4309_v50  ;;  %v5224_v34 = vld [vmem:[#allocation18 + $0x76c] sm:$0xf0]  ;;  %v4121_v50 = vor.u32 %v5044_v40, %v4118_v55 }
 0x297   :  { %2959 = vmatpush.bf16.msra.mxu1 %v4401_v62  ;;  %2971 = vmatpush.bf16.msra.mxu2 %v4689_v63  ;;  %v4148_v61 = vld [vmem:[#allocation18 + $0x210] sm:$0xf]  ;;  %v4821_v37 = vor.u32 %v5224_v34, %v4820_v36 }
 0x298   :  { %v5056_v45 = vld [vmem:[#allocation18 + $0x22c] sm:$0xf0] }
 0x299   :  { %v4500_v46 = vld [vmem:[#allocation18 + $0x4d0] sm:$0xf]  ;;  %v4149_v59 = vor.u32 %v5056_v45, %v4148_v61  ;;  %v3958_v61 = vld [vmem:[#allocation18 + $0xb0] sm:$0xf0] }
 0x29a   :  { %2982 = vmatpush.bf16.msra.mxu3 %v3989_v3  ;;  %2994 = vmatpush.bf16.msrb.mxu0 %v4277_v1  ;;  %v5144_v49 = vld [vmem:[#allocation18 + $0x4ec] sm:$0xf0]  ;;  %v4089_v3 = vor.u32 %v5036_v53, %v4086_v54  ;;  %v4377_v1 = vor.u32 %v5108_v56, %v4374_v58  ;;  %v4246_v45 = vld [vmem:[#allocation18 + $0x2f0] sm:$0xf0] }
 0x29b   :  { %3004 = vmatpush.bf16.msrb.mxu1 %v4629_v10  ;;  %2972 = vmatpush.bf16.msra.mxu2 %v4657_v19  ;;  %v4788_v39 = vld [vmem:[#allocation18 + $0x710] sm:$0xf]  ;;  %v4501_v60 = vor.u32 %v5144_v49, %v4500_v46  ;;  %v4054_v10 = vld [vmem:[#allocation18 + $0x170] sm:$0xf0] }
 0x29c   :  { %2960 = vmatmul.bf16.vlgmr.msra.gmra.mxu1 %v5962_v48  ;;  %v5216_v51 = vld [vmem:[#allocation18 + $0x72c] sm:$0xf0]  ;;  %v4057_v19 = vor.u32 %v5028_v7, %v4054_v10  ;;  %v5164_v46 = vld [vmem:[#allocation18 + $0x594] sm:$0xf] }
 0x29d   :  { %v4789_v62 = vor.u32 %v5216_v51, %v4788_v39  ;;  %v4468_v63 = vld [vmem:[#allocation18 + $0x490] sm:$0xf]  ;;  %v4598_v49 = vld [vmem:[#allocation18 + $0x5b0] sm:$0xf0] }
 0x29e   :  { %2983 = vmatpush.bf16.msra.mxu3 %v3957_v42  ;;  %2995 = vmatpush.bf16.msrb.mxu0 %v4245_v47  ;;  %v5136_v2 = vld [vmem:[#allocation18 + $0x4ac] sm:$0xf0]  ;;  %v4345_v42 = vor.u32 %v5100_v11, %v4342_v25  ;;  %v4886_v39 = vld [vmem:[#allocation18 + $0x7f0] sm:$0xf0] }
 0x29f   :  { %3005 = vmatpush.bf16.msrb.mxu1 %v4597_v20  ;;  %3017 = vmatpush.bf16.msrb.mxu2 %v4885_v22  ;;  %v4756_v52 = vld [vmem:[#allocation18 + $0x6d0] sm:$0xf]  ;;  %v4469_v13 = vor.u32 %v5136_v2, %v4468_v63  ;;  %v4022_v20 = vld [vmem:[#allocation18 + $0x130] sm:$0xf0] }
 0x2a0   :  { %2973 = vmatmul.bf16.vlgmr.msra.gmra.mxu2 %v5966_v4  ;;  %v5208_v5 = vld [vmem:[#allocation18 + $0x6ec] sm:$0xf0]  ;;  %v5092_v22 = vld [vmem:[#allocation18 + $0x354] sm:$0xf]  ;;  %v4025_v0 = vor.u32 %v5020_v9, %v4022_v20  ;;  %v5049_v9 = vld [vmem:[#allocation18 + $0x1f4] sm:$0xf0] }
 0x2a1   :  { %v4757_v15 = vor.u32 %v5208_v5, %v4756_v52  ;;  %v4436_v17 = vld [vmem:[#allocation18 + $0x450] sm:$0xf]  ;;  %v4996_v56 = vld [vmem:[#allocation18 + $0x54] sm:$0xf] }
 0x2a2   :  { %2984 = vmatpush.bf16.msra.mxu3 %v3925_v28  ;;  %2996 = vmatpush.bf16.msrb.mxu0 %v4213_v29  ;;  %v5128_v18 = vld [vmem:[#allocation18 + $0x46c] sm:$0xf0]  ;;  %v4313_v28 = vor.u32 %v5092_v22, %v4310_v24  ;;  %v3926_v58 = vld [vmem:[#allocation18 + $0x70] sm:$0xf0] }
 0x2a3   :  { %3006 = vmatpush.bf16.msrb.mxu1 %v4565_v32  ;;  %3018 = vmatpush.bf16.msrb.mxu2 %v4853_v33  ;;  %v4724_v47 = vld [vmem:[#allocation18 + $0x690] sm:$0xf]  ;;  %v4437_v26 = vor.u32 %v5128_v18, %v4436_v17  ;;  %v3990_v32 = vld [vmem:[#allocation18 + $0xf0] sm:$0xf0]  ;;  %v3929_v5 = vor.u32 %v4996_v56, %v3926_v58  ;;  %v4028_v58 = vld [vmem:[#allocation18 + $0x118] sm:$0xf] }
 0x2a4   :  { %v5200_v8 = vld [vmem:[#allocation18 + $0x6ac] sm:$0xf0]  ;;  %v5084_v33 = vld [vmem:[#allocation18 + $0x314] sm:$0xf]  ;;  %v3993_v40 = vor.u32 %v5012_v31, %v3990_v32  ;;  %v4092_v31 = vld [vmem:[#allocation18 + $0x198] sm:$0xf] }
 0x2a5   :  { %v4725_v27 = vor.u32 %v5200_v8, %v4724_v47  ;;  %v4404_v57 = vld [vmem:[#allocation18 + $0x410] sm:$0xf]  ;;  %v4281_v55 = vor.u32 %v5084_v33, %v4278_v35  ;;  %v4214_v63 = vld [vmem:[#allocation18 + $0x2b0] sm:$0xf0]  ;;  %v4124_v8 = vld [vmem:[#allocation18 + $0x1d8] sm:$0xf] }
 0x2a6   :  { %2985 = vmatpush.bf16.msra.mxu3 %v3893_v41  ;;  %2997 = vmatpush.bf16.msrb.mxu0 %v4181_v38  ;;  %v5120_v16 = vld [vmem:[#allocation18 + $0x42c] sm:$0xf0]  ;;  %v5004_v38 = vld [vmem:[#allocation18 + $0x94] sm:$0xf]  ;;  %v5041_v32 = vld [vmem:[#allocation18 + $0x1b4] sm:$0xf0] }
 0x2a7   :  { %3007 = vmatpush.bf16.msrb.mxu1 %v4533_v44  ;;  %3019 = vmatpush.bf16.msrb.mxu2 %v4821_v37  ;;  %v4692_v29 = vld [vmem:[#allocation18 + $0x650] sm:$0xf]  ;;  %v4405_v43 = vor.u32 %v5120_v16, %v4404_v57  ;;  %v4633_v44 = vor.u32 %v5172_v6, %v4630_v12  ;;  %v5076_v37 = vld [vmem:[#allocation18 + $0x2d4] sm:$0xf]  ;;  %v3961_v53 = vor.u32 %v5004_v38, %v3958_v61  ;;  %v4380_v33 = vld [vmem:[#allocation18 + $0x3d8] sm:$0xf] }
 0x2a8   :  { %v5192_v30 = vld [vmem:[#allocation18 + $0x66c] sm:$0xf0]  ;;  %v4249_v54 = vor.u32 %v5076_v37, %v4246_v45  ;;  %v5156_v2 = vld [vmem:[#allocation18 + $0x554] sm:$0xf]  ;;  %v5113_v35 = vld [vmem:[#allocation18 + $0x3f4] sm:$0xf0] }
 0x2a9   :  { %2986 = vmatmul.bf16.vlgmr.msra.gmra.mxu3 %v5945_v23  ;;  %v4693_v36 = vor.u32 %v5192_v30, %v4692_v29  ;;  %v4660_v34 = vld [vmem:[#allocation18 + $0x610] sm:$0xf]  ;;  %v4854_v52 = vld [vmem:[#allocation18 + $0x7b0] sm:$0xf0]  ;;  %v4060_v61 = vld [vmem:[#allocation18 + $0x158] sm:$0xf] }
 0x2aa   :  { %3030 = vmatpush.bf16.msrb.mxu3 %v4121_v50  ;;  %2998 = vmatpush.bf16.msrb.mxu0 %v4149_v59  ;;  %v5184_v41 = vld [vmem:[#allocation18 + $0x62c] sm:$0xf0]  ;;  %v5236_v50 = vld [vmem:[#allocation18 + $0x7d4] sm:$0xf]  ;;  %v4601_v59 = vor.u32 %v5164_v46, %v4598_v49  ;;  %v4348_v37 = vld [vmem:[#allocation18 + $0x398] sm:$0xf] }
 0x2ab   :  { %3008 = vmatpush.bf16.msrb.mxu1 %v4501_v60  ;;  %3020 = vmatpush.bf16.msrb.mxu2 %v4789_v62  ;;  %v4661_v51 = vor.u32 %v5184_v41, %v4660_v34  ;;  %v4889_v60 = vor.u32 %v5236_v50, %v4886_v39  ;;  %v5068_v62 = vld [vmem:[#allocation18 + $0x294] sm:$0xf]  ;;  %v5105_v45 = vld [vmem:[#allocation18 + $0x3b4] sm:$0xf0] }
 0x2ac   :  { %v4217_v7 = vor.u32 %v5068_v62, %v4214_v63  ;;  %v4988_v10 = vld [vmem:[#allocation18 + $0x14] sm:$0xf]  ;;  %v5097_v62 = vld [vmem:[#allocation18 + $0x374] sm:$0xf0] }
 0x2ad   :  { %2999 = vmatmul.bf16.vlgmr.msrb.gmra.mxu0 %v5952_v14  ;;  %v3894_v11 = vld [vmem:[#allocation18 + $0x30] sm:$0xf0] }
 0x2ae   :  { %3031 = vmatpush.bf16.msrb.mxu3 %v4089_v3  ;;  %3043 = vmatpush.bf16.msra.mxu0 %v4377_v1  ;;  %v4566_v3 = vld [vmem:[#allocation18 + $0x570] sm:$0xf0]  ;;  %v3897_v20 = vor.u32 %v4988_v10, %v3894_v11 }
 0x2af   :  { %3009 = vmatpush.bf16.msrb.mxu1 %v4469_v13  ;;  %3021 = vmatpush.bf16.msrb.mxu2 %v4757_v15  ;;  %v5228_v1 = vld [vmem:[#allocation18 + $0x794] sm:$0xf]  ;;  %v4569_v25 = vor.u32 %v5156_v2, %v4566_v3 }
 0x2b0   :  { %v4857_v13 = vor.u32 %v5228_v1, %v4854_v52  ;;  %v5060_v15 = vld [vmem:[#allocation18 + $0x254] sm:$0xf] }
 0x2b1   :  { %v4182_v17 = vld [vmem:[#allocation18 + $0x270] sm:$0xf0] }
 0x2b2   :  { %3032 = vmatpush.bf16.msrb.mxu3 %v4057_v19  ;;  %3044 = vmatpush.bf16.msra.mxu0 %v4345_v42  ;;  %v5148_v18 = vld [vmem:[#allocation18 + $0x514] sm:$0xf]  ;;  %v4185_v22 = vor.u32 %v5060_v15, %v4182_v17  ;;  %v5017_v15 = vld [vmem:[#allocation18 + $0xf4] sm:$0xf0] }
 0x2b3   :  { %3010 = vmatpush.bf16.msrb.mxu1 %v4437_v26  ;;  %3022 = vmatpush.bf16.msrb.mxu2 %v4725_v27  ;;  %v4534_v19 = vld [vmem:[#allocation18 + $0x530] sm:$0xf0]  ;;  %v4284_v17 = vld [vmem:[#allocation18 + $0x318] sm:$0xf] }
 0x2b4   :  { %v5220_v42 = vld [vmem:[#allocation18 + $0x754] sm:$0xf]  ;;  %v4537_v26 = vor.u32 %v5148_v18, %v4534_v19  ;;  %v5089_v18 = vld [vmem:[#allocation18 + $0x334] sm:$0xf0] }
 0x2b5   :  { %v4822_v47 = vld [vmem:[#allocation18 + $0x770] sm:$0xf0]  ;;  %v4636_v19 = vld [vmem:[#allocation18 + $0x5d8] sm:$0xf] }
 0x2b6   :  { %3033 = vmatpush.bf16.msrb.mxu3 %v4025_v0  ;;  %3045 = vmatpush.bf16.msra.mxu0 %v4313_v28  ;;  %v5052_v24 = vld [vmem:[#allocation18 + $0x214] sm:$0xf]  ;;  %v4825_v27 = vor.u32 %v5220_v42, %v4822_v47  ;;  %v4125_v28 = vor.u32 %v5049_v9, %v4124_v8  ;;  %v5177_v42 = vld [vmem:[#allocation18 + $0x5f4] sm:$0xf0] }
 0x2b7   :  { %3011 = vmatpush.bf16.msrb.mxu1 %v4405_v43  ;;  %3023 = vmatpush.bf16.msrb.mxu2 %v4693_v36  ;;  %v4150_v57 = vld [vmem:[#allocation18 + $0x230] sm:$0xf0] }
 0x2b8   :  { %v5140_v16 = vld [vmem:[#allocation18 + $0x4d4] sm:$0xf]  ;;  %v4153_v6 = vor.u32 %v5052_v24, %v4150_v57  ;;  %v4637_v57 = vor.u32 %v5177_v42, %v4636_v19  ;;  %v5057_v19 = vld [vmem:[#allocation18 + $0x234] sm:$0xf0] }
 0x2b9   :  { %v4502_v0 = vld [vmem:[#allocation18 + $0x4f0] sm:$0xf0]  ;;  %v4508_v42 = vld [vmem:[#allocation18 + $0x4d8] sm:$0xf] }
 0x2ba   :  { %3034 = vmatpush.bf16.msrb.mxu3 %v3993_v40  ;;  %3046 = vmatpush.bf16.msra.mxu0 %v4281_v55  ;;  %v5212_v29 = vld [vmem:[#allocation18 + $0x714] sm:$0xf]  ;;  %v4505_v12 = vor.u32 %v5140_v16, %v4502_v0  ;;  %v4093_v40 = vor.u32 %v5041_v32, %v4092_v31  ;;  %v4381_v55 = vor.u32 %v5113_v35, %v4380_v33  ;;  %v4252_v16 = vld [vmem:[#allocation18 + $0x2d8] sm:$0xf]  ;;  %v5990_v33 = vld [vmem:[#allocation19] sm:$0xff] }
 0x2bb   :  { %3056 = vmatpush.bf16.msra.mxu1 %v4633_v44  ;;  %3024 = vmatpush.bf16.msrb.mxu2 %v4661_v51  ;;  %v4790_v30 = vld [vmem:[#allocation18 + $0x730] sm:$0xf0]  ;;  %v5033_v44 = vld [vmem:[#allocation18 + $0x174] sm:$0xf0] }
 0x2bc   :  { %3012 = vmatmul.bf16.vlgmr.msrb.gmra.mxu1 %v5962_v48  ;;  %v4793_v43 = vor.u32 %v5212_v29, %v4790_v30  ;;  %v5132_v36 = vld [vmem:[#allocation18 + $0x494] sm:$0xf]  ;;  %v4061_v51 = vor.u32 %v5033_v44, %v4060_v61  ;;  %v5081_v0 = vld [vmem:[#allocation18 + $0x2f4] sm:$0xf0] }
 0x2bd   :  { %v4470_v34 = vld [vmem:[#allocation18 + $0x4b0] sm:$0xf0]  ;;  %v5169_v29 = vld [vmem:[#allocation18 + $0x5b4] sm:$0xf0] }
 0x2be   :  { %3035 = vmatpush.bf16.msrb.mxu3 %v3961_v53  ;;  %3047 = vmatpush.bf16.msra.mxu0 %v4249_v54  ;;  %v5204_v41 = vld [vmem:[#allocation18 + $0x6d4] sm:$0xf]  ;;  %v4473_v46 = vor.u32 %v5132_v36, %v4470_v34  ;;  %v4349_v53 = vor.u32 %v5105_v45, %v4348_v37  ;;  %v4892_v30 = vld [vmem:[#allocation18 + $0x7d8] sm:$0xf] }
 0x2bf   :  { %3057 = vmatpush.bf16.msra.mxu1 %v4601_v59  ;;  %3069 = vmatpush.bf16.msra.mxu2 %v4889_v60  ;;  %v4758_v38 = vld [vmem:[#allocation18 + $0x6f0] sm:$0xf0]  ;;  %v5025_v59 = vld [vmem:[#allocation18 + $0x134] sm:$0xf0] }
 0x2c0   :  { %3025 = vmatmul.bf16.vlgmr.msrb.gmra.mxu2 %v5966_v4  ;;  %v4761_v49 = vor.u32 %v5204_v41, %v4758_v38  ;;  %v5124_v50 = vld [vmem:[#allocation18 + $0x454] sm:$0xf]  ;;  %v4316_v60 = vld [vmem:[#allocation18 + $0x358] sm:$0xf]  ;;  %v4029_v52 = vor.u32 %v5025_v59, %v4028_v58 }
 0x2c1   :  { %v4438_v39 = vld [vmem:[#allocation18 + $0x470] sm:$0xf0]  ;;  %v5241_v31 = vld [vmem:[#allocation18 + $0x7f4] sm:$0xf0] }
 0x2c2   :  { %3036 = vmatpush.bf16.msrb.mxu3 %v3929_v5  ;;  %3048 = vmatpush.bf16.msra.mxu0 %v4217_v7  ;;  %v5196_v54 = vld [vmem:[#allocation18 + $0x694] sm:$0xf]  ;;  %v4441_v63 = vor.u32 %v5124_v50, %v4438_v39  ;;  %v4317_v5 = vor.u32 %v5097_v62, %v4316_v60  ;;  %v5001_v36 = vld [vmem:[#allocation18 + $0x74] sm:$0xf0] }
 0x2c3   :  { %3058 = vmatpush.bf16.msra.mxu1 %v4569_v25  ;;  %3070 = vmatpush.bf16.msra.mxu2 %v4857_v13  ;;  %v4726_v56 = vld [vmem:[#allocation18 + $0x6b0] sm:$0xf0]  ;;  %v3996_v25 = vld [vmem:[#allocation18 + $0xd8] sm:$0xf] }
 0x2c4   :  { %v4729_v2 = vor.u32 %v5196_v54, %v4726_v56  ;;  %v5116_v3 = vld [vmem:[#allocation18 + $0x414] sm:$0xf]  ;;  %v4220_v41 = vld [vmem:[#allocation18 + $0x298] sm:$0xf] }
 0x2c5   :  { %v4406_v1 = vld [vmem:[#allocation18 + $0x430] sm:$0xf0]  ;;  %v5073_v38 = vld [vmem:[#allocation18 + $0x2b4] sm:$0xf0] }
 0x2c6   :  { %3037 = vmatpush.bf16.msrb.mxu3 %v3897_v20  ;;  %3049 = vmatpush.bf16.msra.mxu0 %v4185_v22  ;;  %v5188_v10 = vld [vmem:[#allocation18 + $0x654] sm:$0xf]  ;;  %v4409_v47 = vor.u32 %v5116_v3, %v4406_v1  ;;  %v3997_v20 = vor.u32 %v5017_v15, %v3996_v25  ;;  %v4285_v22 = vor.u32 %v5089_v18, %v4284_v17  ;;  %v4572_v61 = vld [vmem:[#allocation18 + $0x558] sm:$0xf]  ;;  %v5045_v1 = vld [vmem:[#allocation18 + $0x1dc] sm:$0xf] }
 0x2c7   :  { %3059 = vmatpush.bf16.msra.mxu1 %v4537_v26  ;;  %3071 = vmatpush.bf16.msra.mxu2 %v4825_v27  ;;  %v4694_v11 = vld [vmem:[#allocation18 + $0x670] sm:$0xf0]  ;;  %v3964_v26 = vld [vmem:[#allocation18 + $0x98] sm:$0xf]  ;;  %v4221_v39 = vor.u32 %v5073_v38, %v4220_v41 }
 0x2c8   :  { %v4697_v8 = vor.u32 %v5188_v10, %v4694_v11  ;;  %v5180_v9 = vld [vmem:[#allocation18 + $0x614] sm:$0xf]  ;;  %v5009_v27 = vld [vmem:[#allocation18 + $0xb4] sm:$0xf0] }
 0x2c9   :  { %3038 = vmatmul.bf16.vlgmr.msrb.gmra.mxu3 %v5945_v23  ;;  %v4662_v24 = vld [vmem:[#allocation18 + $0x630] sm:$0xf0]  ;;  %v3965_v35 = vor.u32 %v5009_v27, %v3964_v26  ;;  %v5161_v44 = vld [vmem:[#allocation18 + $0x574] sm:$0xf0]  ;;  %v4094_v26 = vld [vmem:[#allocation18 + $0x1b8] sm:$0xf0] }
 0x2ca   :  { %3082 = vmatpush.bf16.msra.mxu3 %v4125_v28  ;;  %3050 = vmatpush.bf16.msra.mxu0 %v4153_v6  ;;  %v5986_v7 = vpop.f32.mrf.mxu0  ;;  %v4604_v28 = vld [vmem:[#allocation18 + $0x598] sm:$0xf]  ;;  %v4665_v32 = vor.u32 %v5180_v9, %v4662_v24  ;;  %v4253_v6 = vor.u32 %v5081_v0, %v4252_v16  ;;  %v4573_v54 = vor.u32 %v5161_v44, %v4572_v61  ;;  %v5109_v27 = vld [vmem:[#allocation18 + $0x3dc] sm:$0xf] }
 0x2cb   :  { %3060 = vmatpush.bf16.msra.mxu1 %v4505_v12  ;;  %3072 = vmatpush.bf16.msra.mxu2 %v4793_v43  ;;  %v5988_v13 = vpop.f32.mrf.mxu3  ;;  %v3932_v43 = vld [vmem:[#allocation18 + $0x58] sm:$0xf]  ;;  %v4605_v34 = vor.u32 %v5169_v29, %v4604_v28 }
 0x2cc   :  { %v4860_v37 = vld [vmem:[#allocation18 + $0x798] sm:$0xf]  ;;  %v3933_v50 = vor.u32 %v5001_v36, %v3932_v43  ;;  %v5029_v43 = vld [vmem:[#allocation18 + $0x15c] sm:$0xf] }
 0x2cd   :  { %3051 = vmatmul.bf16.vlgmr.msra.gmra.mxu0 %v5952_v14  ;;  %v5233_v45 = vld [vmem:[#allocation18 + $0x7b4] sm:$0xf0] }
 0x2ce   :  { %3083 = vmatpush.bf16.msra.mxu3 %v4093_v40  ;;  %3095 = vmatpush.bf16.msrb.mxu0 %v4381_v55  ;;  %v4893_v40 = vor.u32 %v5241_v31, %v4892_v30  ;;  %v4861_v56 = vor.u32 %v5233_v45, %v4860_v37  ;;  %v4188_v58 = vld [vmem:[#allocation18 + $0x258] sm:$0xf] }
 0x2cf   :  { %3061 = vmatpush.bf16.msra.mxu1 %v4473_v46  ;;  %3073 = vmatpush.bf16.msra.mxu2 %v4761_v49  ;;  %v1474_v46 = vperm.slane %v5990_v33, 0  ;;  %v5065_v59 = vld [vmem:[#allocation18 + $0x274] sm:$0xf0] }
 0x2d0   :  { %v4540_v60 = vld [vmem:[#allocation18 + $0x518] sm:$0xf]  ;;  %v4189_v10 = vor.u32 %v5065_v59, %v4188_v58  ;;  %v1475_v58 = vperm.slane %v5990_v33, 1 }
 0x2d1   :  { %v5153_v62 = vld [vmem:[#allocation18 + $0x534] sm:$0xf0]  ;;  %v2780_v3 = vadd.f32 %v5988_v13, %v1474_v46 }
 0x2d2   :  { %3084 = vmatpush.bf16.msra.mxu3 %v4061_v51  ;;  %3096 = vmatpush.bf16.msrb.mxu0 %v4349_v53  ;;  %v2794_v12 = vpop.f32.mrf.mxu0  ;;  %v3900_v51 = vld [vmem:[#allocation18 + $0x18] sm:$0xf]  ;;  %v4541_v15 = vor.u32 %v5153_v62, %v4540_v60 }
 0x2d3   :  { %3062 = vmatpush.bf16.msra.mxu1 %v4441_v63  ;;  %3074 = vmatpush.bf16.msra.mxu2 %v4729_v2  ;;  %v2781_v55 = vpop.f32.mrf.mxu3  ;;  %v4993_v53 = vld [vmem:[#allocation18 + $0x34] sm:$0xf0] }
 0x2d4   :  { %v4828_v63 = vld [vmem:[#allocation18 + $0x758] sm:$0xf]  ;;  %v4350_v55 = vld [vmem:[#allocation18 + $0x3b8] sm:$0xf0] }
 0x2d5   :  { %v2805_v49 = vpop.f32.mrf.mxu1  ;;  %v5225_v2 = vld [vmem:[#allocation18 + $0x774] sm:$0xf0] }
 0x2d6   :  { %3085 = vmatpush.bf16.msra.mxu3 %v4029_v52  ;;  %3097 = vmatpush.bf16.msrb.mxu0 %v4317_v5  ;;  %v4126_v52 = vld [vmem:[#allocation18 + $0x1f8] sm:$0xf0]  ;;  %v3901_v5 = vor.u32 %v4993_v53, %v3900_v51  ;;  %v4156_v25 = vld [vmem:[#allocation18 + $0x218] sm:$0xf]  ;;  %v4829_v17 = vor.u32 %v5225_v2, %v4828_v63 }
 0x2d7   :  { %3063 = vmatpush.bf16.msra.mxu1 %v4409_v47  ;;  %3075 = vmatpush.bf16.msra.mxu2 %v4697_v8  ;;  %v5145_v47 = vld [vmem:[#allocation18 + $0x4f4] sm:$0xf0]  ;;  %v4129_v8 = vor.u32 %v5045_v1, %v4126_v52  ;;  %v4157_v16 = vor.u32 %v5057_v19, %v4156_v25  ;;  %v5093_v63 = vld [vmem:[#allocation18 + $0x35c] sm:$0xf] }
 0x2d8   :  { %v4796_v13 = vld [vmem:[#allocation18 + $0x718] sm:$0xf]  ;;  %v4509_v28 = vor.u32 %v5145_v47, %v4508_v42  ;;  %v4318_v2 = vld [vmem:[#allocation18 + $0x378] sm:$0xf0] }
 0x2d9   :  { %v5217_v9 = vld [vmem:[#allocation18 + $0x734] sm:$0xf0]  ;;  %v4321_v19 = vor.u32 %v5093_v63, %v4318_v2 }
 0x2da   :  { %3086 = vmatpush.bf16.msra.mxu3 %v3997_v20  ;;  %3098 = vmatpush.bf16.msrb.mxu0 %v4285_v22  ;;  %v5996_v11 = vpop.f32.mrf.mxu0  ;;  %v5037_v20 = vld [vmem:[#allocation18 + $0x19c] sm:$0xf]  ;;  %v2793_v22 = vadd.f32 %v5986_v7, %v2780_v3  ;;  %v4797_v29 = vor.u32 %v5217_v9, %v4796_v13  ;;  %v4476_v30 = vld [vmem:[#allocation18 + $0x498] sm:$0xf] }
 0x2db   :  { %3108 = vmatpush.bf16.msrb.mxu1 %v4637_v57  ;;  %3076 = vmatpush.bf16.msra.mxu2 %v4665_v32  ;;  %v5998_v18 = vpop.f32.mrf.mxu3  ;;  %v4382_v57 = vld [vmem:[#allocation18 + $0x3f8] sm:$0xf0]  ;;  %v5137_v31 = vld [vmem:[#allocation18 + $0x4b4] sm:$0xf0]  ;;  %v4097_v32 = vor.u32 %v5037_v20, %v4094_v26 }
 0x2dc   :  { %3064 = vmatmul.bf16.vlgmr.msra.gmra.mxu1 %v5962_v48  ;;  %v2806_v0 = vadd.f32 %v2805_v49, %v2793_v22  ;;  %v4764_v12 = vld [vmem:[#allocation18 + $0x6d8] sm:$0xf]  ;;  %v4477_v37 = vor.u32 %v5137_v31, %v4476_v30  ;;  %v3998_v13 = vld [vmem:[#allocation18 + $0xf8] sm:$0xf0]  ;;  %v2832_v9 = vadd.f32 %v5998_v18, %v1475_v58 }
 0x2dd   :  { %v2807_v24 = vpop.f32.mrf.mxu1  ;;  %v5209_v7 = vld [vmem:[#allocation18 + $0x6f4] sm:$0xf0]  ;;  %v4286_v26 = vld [vmem:[#allocation18 + $0x338] sm:$0xf0] }
 0x2de   :  { %3087 = vmatpush.bf16.msra.mxu3 %v3965_v35  ;;  %3099 = vmatpush.bf16.msrb.mxu0 %v4253_v6  ;;  %v4385_v35 = vor.u32 %v5109_v27, %v4382_v57  ;;  %v4444_v38 = vld [vmem:[#allocation18 + $0x458] sm:$0xf]  ;;  %v4765_v45 = vor.u32 %v5209_v7, %v4764_v12  ;;  %v5085_v24 = vld [vmem:[#allocation18 + $0x31c] sm:$0xf] }
 0x2df   :  { %3109 = vmatpush.bf16.msrb.mxu1 %v4605_v34  ;;  %3121 = vmatpush.bf16.msrb.mxu2 %v4893_v40  ;;  %v4062_v34 = vld [vmem:[#allocation18 + $0x178] sm:$0xf0]  ;;  %v5129_v49 = vld [vmem:[#allocation18 + $0x474] sm:$0xf0] }
 0x2e0   :  { %3077 = vmatmul.bf16.vlgmr.msra.gmra.mxu2 %v5966_v4  ;;  %v2818_v6 = vpop.f32.mrf.mxu2  ;;  %v5101_v40 = vld [vmem:[#allocation18 + $0x39c] sm:$0xf]  ;;  %v5201_v53 = vld [vmem:[#allocation18 + $0x6b4] sm:$0xf0] }
 0x2e1   :  { %v6002_v36 = vadd.f32 %v2818_v6, %v2806_v0  ;;  %v4353_v51 = vor.u32 %v5101_v40, %v4350_v55  ;;  %v4412_v3 = vld [vmem:[#allocation18 + $0x418] sm:$0xf]  ;;  %v5173_v57 = vld [vmem:[#allocation18 + $0x5dc] sm:$0xf]  ;;  %v4289_v6 = vor.u32 %v5085_v24, %v4286_v26 }
 0x2e2   :  { %3088 = vmatpush.bf16.msra.mxu3 %v3933_v50  ;;  %3100 = vmatpush.bf16.msrb.mxu0 %v4221_v39  ;;  %v2846_v41 = vpop.f32.mrf.mxu0  ;;  %v4732_v50 = vld [vmem:[#allocation18 + $0x698] sm:$0xf]  ;;  %v4065_v39 = vor.u32 %v5029_v43, %v4062_v34  ;;  %v3966_v7 = vld [vmem:[#allocation18 + $0xb8] sm:$0xf0] }
 0x2e3   :  { %3110 = vmatpush.bf16.msrb.mxu1 %v4573_v54  ;;  %3122 = vmatpush.bf16.msrb.mxu2 %v4861_v56  ;;  %v3186_v61 = vrot.slane %v6002_v36, 4  ;;  %v3242_v44 = vmul.f32 %v6002_v36, %v6002_v36  ;;  %v2833_v46 = vpop.f32.mrf.mxu3  ;;  %v5021_v54 = vld [vmem:[#allocation18 + $0x11c] sm:$0xf]  ;;  %v5121_v25 = vld [vmem:[#allocation18 + $0x434] sm:$0xf0]  ;;  %v2845_v41 = vadd.f32 %v5996_v11, %v2832_v9 }
 0x2e4   :  { %v4030_v56 = vld [vmem:[#allocation18 + $0x138] sm:$0xf0]  ;;  %v5193_v47 = vld [vmem:[#allocation18 + $0x674] sm:$0xf0]  ;;  %v4413_v30 = vor.u32 %v5121_v25, %v4412_v3 }
 0x2e5   :  { %v3187_v59 = vadd.f32 %v3186_v61, %v6002_v36  ;;  %v3250_v60 = vrot.slane %v3242_v44, 4  ;;  %v2857_v62 = vpop.f32.mrf.mxu1  ;;  %v4668_v0 = vld [vmem:[#allocation18 + $0x618] sm:$0xf]  ;;  %v5077_v43 = vld [vmem:[#allocation18 + $0x2dc] sm:$0xf] }
 0x2e6   :  { %3089 = vmatpush.bf16.msra.mxu3 %v3901_v5  ;;  %3101 = vmatpush.bf16.msrb.mxu0 %v4189_v10  ;;  %v4445_v5 = vor.u32 %v5129_v49, %v4444_v38  ;;  %v4733_v10 = vor.u32 %v5201_v53, %v4732_v50  ;;  %v4254_v34 = vld [vmem:[#allocation18 + $0x2f8] sm:$0xf0] }
 0x2e7   :  { %3111 = vmatpush.bf16.msrb.mxu1 %v4541_v15  ;;  %3123 = vmatpush.bf16.msrb.mxu2 %v4829_v17  ;;  %v3188_v1 = vrot.slane %v3187_v59, 2  ;;  %v3251_v52 = vadd.f32 %v3250_v60, %v3242_v44  ;;  %v4700_v15 = vld [vmem:[#allocation18 + $0x658] sm:$0xf]  ;;  %v4033_v17 = vor.u32 %v5021_v54, %v4030_v56  ;;  %v5165_v44 = vld [vmem:[#allocation18 + $0x59c] sm:$0xf]  ;;  %v4257_v54 = vor.u32 %v5077_v43, %v4254_v34 }
 0x2e8   :  { %v2820_v42 = vpop.f32.mrf.mxu2  ;;  %v4701_v31 = vor.u32 %v5193_v47, %v4700_v15  ;;  %v5237_v46 = vld [vmem:[#allocation18 + $0x7dc] sm:$0xf] }
 0x2e9   :  { %3090 = vmatmul.bf16.vlgmr.msra.gmra.mxu3 %v5945_v23  ;;  %v3189_v20 = vadd.f32 %v3188_v1, %v3187_v59  ;;  %v3252_v22 = vrot.slane %v3251_v52, 2  ;;  %v4894_v49 = vld [vmem:[#allocation18 + $0x7f8] sm:$0xf0] }
 0x2ea   :  { %3134 = vmatpush.bf16.msrb.mxu3 %v4129_v8  ;;  %3102 = vmatpush.bf16.msrb.mxu0 %v4157_v16  ;;  %v5013_v8 = vld [vmem:[#allocation18 + $0xdc] sm:$0xf]  ;;  %v6011_v27 = vpop.f32.mrf.mxu0  ;;  %v4897_v3 = vor.u32 %v5237_v46, %v4894_v49 }
 0x2eb   :  { %3112 = vmatpush.bf16.msrb.mxu1 %v4509_v28  ;;  %3124 = vmatpush.bf16.msrb.mxu2 %v4797_v29  ;;  %v4638_v16 = vld [vmem:[#allocation18 + $0x5f8] sm:$0xf0]  ;;  %v3190_v28 = vrot.slane %v3189_v20, 1  ;;  %v3253_v29 = vadd.f32 %v3252_v22, %v3251_v52  ;;  %v4001_v18 = vor.u32 %v5013_v8, %v3998_v13 }
 0x2ec   :  { %v6013_v12 = vpop.f32.mrf.mxu3  ;;  %v4641_v38 = vor.u32 %v5173_v57, %v4638_v16  ;;  %v4997_v58 = vld [vmem:[#allocation18 + $0x5c] sm:$0xf] }
 0x2ed   :  { %3103 = vmatmul.bf16.vlgmr.msrb.gmra.mxu0 %v5952_v14  ;;  %v3191_v40 = vadd.f32 %v3190_v28, %v3189_v20  ;;  %v3254_v55 = vrot.slane %v3253_v29, 1  ;;  %v2859_v61 = vpop.f32.mrf.mxu1  ;;  %v3934_v59 = vld [vmem:[#allocation18 + $0x78] sm:$0xf0] }
 0x2ee   :  { %3135 = vmatpush.bf16.msrb.mxu3 %v4097_v32  ;;  %3147 = vmatpush.bf16.msra.mxu0 %v4385_v35  ;;  %v5185_v32 = vld [vmem:[#allocation18 + $0x634] sm:$0xf0]  ;;  %v5005_v35 = vld [vmem:[#allocation18 + $0x9c] sm:$0xf]  ;;  %v3937_v13 = vor.u32 %v4997_v58, %v3934_v59 }
 0x2ef   :  { %3113 = vmatpush.bf16.msrb.mxu1 %v4477_v37  ;;  %3125 = vmatpush.bf16.msrb.mxu2 %v4765_v45  ;;  %v4606_v37 = vld [vmem:[#allocation18 + $0x5b8] sm:$0xf0]  ;;  %v4669_v45 = vor.u32 %v5185_v32, %v4668_v0  ;;  %v6017_v50 = vmul.f32 %v3191_v40, %v5822_v21  ;;  %v3969_v53 = vor.u32 %v5005_v35, %v3966_v7 }
 0x2f0   :  { %v4609_v56 = vor.u32 %v5165_v44, %v4606_v37  ;;  %v2870_v11 = vpop.f32.mrf.mxu2  ;;  %v5069_v60 = vld [vmem:[#allocation18 + $0x29c] sm:$0xf] }
 0x2f1   :  { %v3306_v2 = vmul.f32 %v6017_v50, %v6017_v50  ;;  %v5157_v52 = vld [vmem:[#allocation18 + $0x55c] sm:$0xf] }
 0x2f2   :  { %3136 = vmatpush.bf16.msrb.mxu3 %v4065_v39  ;;  %3148 = vmatpush.bf16.msra.mxu0 %v4353_v51  ;;  %v3255_v39 = vadd.f32 %v3254_v55, %v3253_v29  ;;  %v2858_v51 = vadd.f32 %v2857_v62, %v2845_v41  ;;  %v4222_v62 = vld [vmem:[#allocation18 + $0x2b8] sm:$0xf0] }
 0x2f3   :  { %3114 = vmatpush.bf16.msrb.mxu1 %v4445_v5  ;;  %3126 = vmatpush.bf16.msrb.mxu2 %v4733_v10  ;;  %v4574_v5 = vld [vmem:[#allocation18 + $0x578] sm:$0xf0]  ;;  %v2898_v10 = vpop.f32.mrf.mxu0  ;;  %v4225_v9 = vor.u32 %v5069_v60, %v4222_v62 }
 0x2f4   :  { %v3298_v63 = vmul.f32 %v3255_v39, %v5822_v21  ;;  %v6022_v1 = vadd.f32 %v2870_v11, %v2858_v51  ;;  %v5229_v25 = vld [vmem:[#allocation18 + $0x79c] sm:$0xf]  ;;  %v4577_v20 = vor.u32 %v5157_v52, %v4574_v5  ;;  %v2885_v22 = vpop.f32.mrf.mxu3 }
 0x2f5   :  { %v4862_v15 = vld [vmem:[#allocation18 + $0x7b8] sm:$0xf0] }
 0x2f6   :  { %3137 = vmatpush.bf16.msrb.mxu3 %v4033_v17  ;;  %3149 = vmatpush.bf16.msra.mxu0 %v4321_v19  ;;  %v3314_v17 = vsub.f32 %v3298_v63, %v3306_v2  ;;  %v1476_v19 = vperm.slane %v5990_v33, 2  ;;  %v3192_v42 = vrot.slane %v6022_v1, 4  ;;  %v3243_v47 = vmul.f32 %v6022_v1, %v6022_v1  ;;  %v4989_v8 = vld [vmem:[#allocation18 + $0x1c] sm:$0xf] }
 0x2f7   :  { %3115 = vmatpush.bf16.msrb.mxu1 %v4413_v30  ;;  %3127 = vmatpush.bf16.msrb.mxu2 %v4701_v31  ;;  %v3902_v24 = vld [vmem:[#allocation18 + $0x38] sm:$0xf0]  ;;  %v4865_v29 = vor.u32 %v5229_v25, %v4862_v15 }
 0x2f8   :  { %v5061_v26 = vld [vmem:[#allocation18 + $0x25c] sm:$0xf]  ;;  %v6029_v16 = vadd.f32 0.9, %v3314_v17  ;;  %v3193_v0 = vadd.f32 %v3192_v42, %v6022_v1  ;;  %v3256_v28 = vrot.slane %v3243_v47, 4  ;;  %v3905_v43 = vor.u32 %v4989_v8, %v3902_v24  ;;  %v2872_v40 = vpop.f32.mrf.mxu2 }
 0x2f9   :  { %v4190_v57 = vld [vmem:[#allocation18 + $0x278] sm:$0xf0]  ;;  %v2909_v7 = vpop.f32.mrf.mxu1  ;;  %v2884_v46 = vadd.f32 %v6013_v12, %v1476_v19 }
 0x2fa   :  { %3138 = vmatpush.bf16.msrb.mxu3 %v4001_v18  ;;  %3150 = vmatpush.bf16.msra.mxu0 %v4289_v6  ;;  %v5149_v30 = vld [vmem:[#allocation18 + $0x51c] sm:$0xf]  ;;  %5280 = vrsqrt.f32 %v6029_v16  ;;  %v3194_v18 = vrot.slane %v3193_v0, 2  ;;  %v3257_v6 = vadd.f32 %v3256_v28, %v3243_v47  ;;  %v4193_v34 = vor.u32 %v5061_v26, %v4190_v57 }
 0x2fb   :  { %3160 = vmatpush.bf16.msra.mxu1 %v4641_v38  ;;  %3128 = vmatpush.bf16.msrb.mxu2 %v4669_v45  ;;  %v4542_v31 = vld [vmem:[#allocation18 + $0x538] sm:$0xf0]  ;;  %v2897_v62 = vadd.f32 %v6011_v27, %v2884_v46  ;;  %vm3370_vm11 = vweird.f32 %v6029_v16 }
 0x2fc   :  { %3116 = vmatmul.bf16.vlgmr.msrb.gmra.mxu1 %v5962_v48  ;;  %v5221_v32 = vld [vmem:[#allocation18 + $0x75c] sm:$0xf]  ;;  %v3195_v41 = vadd.f32 %v3194_v18, %v3193_v0  ;;  %v3258_v38 = vrot.slane %v3257_v6, 2  ;;  %v4545_v61 = vor.u32 %v5149_v30, %v4542_v31 }
 0x2fd   :  { %v4830_v35 = vld [vmem:[#allocation18 + $0x778] sm:$0xf0]  ;;  %v2910_v19 = vadd.f32 %v2909_v7, %v2897_v62  ;;  %v6068_v62 = vld [vmem:[#allocation22] sm:$0xff] }
 0x2fe   :  { %3139 = vmatpush.bf16.msrb.mxu3 %v3969_v53  ;;  %3151 = vmatpush.bf16.msra.mxu0 %v4257_v54  ;;  %v5053_v55 = vld [vmem:[#allocation18 + $0x21c] sm:$0xf]  ;;  %v4833_v44 = vor.u32 %v5221_v32, %v4830_v35  ;;  %v3196_v53 = vrot.slane %v3195_v41, 1  ;;  %v3259_v54 = vadd.f32 %v3258_v38, %v3257_v6 }
 0x2ff   :  { %3161 = vmatpush.bf16.msra.mxu1 %v4609_v56  ;;  %3173 = vmatpush.bf16.msra.mxu2 %v4897_v3  ;;  %v4158_v37 = vld [vmem:[#allocation18 + $0x238] sm:$0xf0] }
 0x300   :  { %3129 = vmatmul.bf16.vlgmr.msrb.gmra.mxu2 %v5966_v4  ;;  %v5141_v45 = vld [vmem:[#allocation18 + $0x4dc] sm:$0xf]  ;;  %v4161_v56 = vor.u32 %v5053_v55, %v4158_v37  ;;  %v6035_v11 = vpop.eup %5280  ;;  %v3197_v58 = vadd.f32 %v3196_v53, %v3195_v41  ;;  %v3260_v59 = vrot.slane %v3259_v54, 1 }
 0x301   :  { %v4510_v49 = vld [vmem:[#allocation18 + $0x4f8] sm:$0xf0]  ;;  %v3365_v12 = vmul.f32 %v6035_v11, %v6029_v16  ;;  %v2911_v15 = vpop.f32.mrf.mxu1  ;;  %vm3371_vm10 = vweird.f32 %v6035_v11 }
 0x302   :  { %3140 = vmatpush.bf16.msrb.mxu3 %v3937_v13  ;;  %3152 = vmatpush.bf16.msra.mxu0 %v4225_v9  ;;  %v5213_v39 = vld [vmem:[#allocation18 + $0x71c] sm:$0xf]  ;;  %v4513_v60 = vor.u32 %v5141_v45, %v4510_v49  ;;  %v6041_v10 = vmul.f32 %v3197_v58, %v5822_v21  ;;  %v3261_v25 = vadd.f32 %v3260_v59, %v3259_v54  ;;  %vm3372_vm12 = vmor %vm3370_vm11, %vm3371_vm10 }
 0x303   :  { %3162 = vmatpush.bf16.msra.mxu1 %v4577_v20  ;;  %3174 = vmatpush.bf16.msra.mxu2 %v4865_v29  ;;  %v4798_v51 = vld [vmem:[#allocation18 + $0x738] sm:$0xf0]  ;;  %v3366_v17 = vmul.f32 %v6035_v11, %v3365_v12  ;;  %v2922_v13 = vpop.f32.mrf.mxu2  ;;  %v3323_v58 = vsub.f32 %v6002_v36, %v6017_v50 }
 0x304   :  { %v4801_v63 = vor.u32 %v5213_v39, %v4798_v51  ;;  %v5133_v2 = vld [vmem:[#allocation18 + $0x49c] sm:$0xf]  ;;  %v3299_v47 = vmul.f32 %v3261_v25, %v5822_v21  ;;  %v3307_v8 = vmul.f32 %v6041_v10, %v6041_v10  ;;  %v6048_v20 = vadd.f32 %v2922_v13, %v2910_v19 }
 0x305   :  { %v4478_v3 = vld [vmem:[#allocation18 + $0x4b8] sm:$0xf0]  ;;  %v3367_v57 = vmul.f32 0.5, %v3366_v17  ;;  %v3454_v19 = vperm.slane %v6068_v62, 0 }
 0x306   :  { %3141 = vmatpush.bf16.msrb.mxu3 %v3905_v43  ;;  %3153 = vmatpush.bf16.msra.mxu0 %v4193_v34  ;;  %v5205_v52 = vld [vmem:[#allocation18 + $0x6dc] sm:$0xf]  ;;  %v4481_v42 = vor.u32 %v5133_v2, %v4478_v3  ;;  %v3315_v26 = vsub.f32 %v3299_v47, %v3307_v8  ;;  %v3198_v0 = vrot.slane %v6048_v20, 4  ;;  %v3244_v28 = vmul.f32 %v6048_v20, %v6048_v20 }
 0x307   :  { %3163 = vmatpush.bf16.msra.mxu1 %v4545_v61  ;;  %3175 = vmatpush.bf16.msra.mxu2 %v4833_v44  ;;  %v4766_v5 = vld [vmem:[#allocation18 + $0x6f8] sm:$0xf0]  ;;  %v6058_v44 = vld [vmem:[#allocation21] sm:$0xff] }
 0x308   :  { %v4769_v27 = vor.u32 %v5205_v52, %v4766_v5  ;;  %v5125_v9 = vld [vmem:[#allocation18 + $0x45c] sm:$0xf]  ;;  %v6054_v29 = vadd.f32 0.9, %v3315_v26  ;;  %v3199_v18 = vadd.f32 %v3198_v0, %v6048_v20  ;;  %v3262_v6 = vrot.slane %v3244_v28, 4 }
 0x309   :  { %3142 = vmatmul.bf16.vlgmr.msrb.gmra.mxu3 %v5945_v23  ;;  %v4446_v22 = vld [vmem:[#allocation18 + $0x478] sm:$0xf0]  ;;  %v3332_v59 = vperm.slane %v6058_v44, 0 }
 0x30a   :  { %3154 = vmatpush.bf16.msra.mxu0 %v4161_v56  ;;  %v5197_v23 = vld [vmem:[#allocation18 + $0x69c] sm:$0xf]  ;;  %v4449_v30 = vor.u32 %v5125_v9, %v4446_v22  ;;  %5282 = vrsqrt.f32 %v6054_v29  ;;  %v3200_v34 = vrot.slane %v3199_v18, 2  ;;  %v3263_v40 = vadd.f32 %v3262_v6, %v3244_v28  ;;  %v2948_v55 = vpop.f32.mrf.mxu0 }
 0x30b   :  { %3164 = vmatpush.bf16.msra.mxu1 %v4513_v60  ;;  %3176 = vmatpush.bf16.msra.mxu2 %v4801_v63  ;;  %v4734_v24 = vld [vmem:[#allocation18 + $0x6b8] sm:$0xf0]  ;;  %v2924_v61 = vpop.f32.mrf.mxu2  ;;  %v3348_v50 = vmul.f32 %v3332_v59, %v3323_v58  ;;  %vm3380_vm14 = vweird.f32 %v6054_v29 }
 0x30c   :  { %v4737_v31 = vor.u32 %v5197_v23, %v4734_v24  ;;  %v5117_v32 = vld [vmem:[#allocation18 + $0x41c] sm:$0xf]  ;;  %v3201_v37 = vadd.f32 %v3200_v34, %v3199_v18  ;;  %v3264_v45 = vrot.slane %v3263_v40, 2  ;;  %v2935_v46 = vpop.f32.mrf.mxu3 }
 0x30d   :  { %3155 = vmatmul.bf16.vlgmr.msra.gmra.mxu0 %v5952_v14  ;;  %v4414_v35 = vld [vmem:[#allocation18 + $0x438] sm:$0xf0]  ;;  %v3368_v14 = vsub.f32 1.5, %v3367_v57 }
 0x30e   :  { %v5189_v7 = vld [vmem:[#allocation18 + $0x65c] sm:$0xf]  ;;  %v4417_v41 = vor.u32 %v5117_v32, %v4414_v35  ;;  %v3202_v53 = vrot.slane %v3201_v37, 1  ;;  %v3265_v54 = vadd.f32 %v3264_v45, %v3263_v40 }
 0x30f   :  { %3165 = vmatpush.bf16.msra.mxu1 %v4481_v42  ;;  %3177 = vmatpush.bf16.msra.mxu2 %v4769_v27  ;;  %v4702_v43 = vld [vmem:[#allocation18 + $0x678] sm:$0xf0]  ;;  %v3369_v51 = vmul.f32 %v6035_v11, %v3368_v14  ;;  %v3333_v42 = vperm.slane %v6058_v44, 1 }
 0x310   :  { %v4705_v38 = vor.u32 %v5189_v7, %v4702_v43  ;;  %v5181_v49 = vld [vmem:[#allocation18 + $0x61c] sm:$0xf]  ;;  %v5283_v56 = vpop.eup %5282  ;;  %v3203_v2 = vadd.f32 %v3202_v53, %v3201_v37  ;;  %v3266_v3 = vrot.slane %v3265_v54, 1 }
 0x311   :  { %v4670_v39 = vld [vmem:[#allocation18 + $0x638] sm:$0xf0]  ;;  %v3375_v63 = vmul.f32 %v5283_v56, %v6054_v29  ;;  %v3373_v12 = vsel %vm3372_vm12, %v6035_v11, %v3369_v51  ;;  %v3324_v11 = vsub.f32 %v6022_v1, %v6041_v10  ;;  %vm3381_vm13 = vweird.f32 %v5283_v56 }
 0x312   :  { %v4673_v60 = vor.u32 %v5181_v49, %v4670_v39  ;;  %v2950_v36 = vpop.f32.mrf.mxu0  ;;  %v6072_v25 = vmul.f32 %v3203_v2, %v5822_v21  ;;  %v3267_v16 = vadd.f32 %v3266_v3, %v3265_v54  ;;  %v3444_v17 = vmul.f32 %v3373_v12, %v3348_v50  ;;  %vm3382_vm15 = vmor %vm3380_vm14, %vm3381_vm13 }
 0x313   :  { %3166 = vmatpush.bf16.msra.mxu1 %v4449_v30  ;;  %3178 = vmatpush.bf16.msra.mxu2 %v4737_v31  ;;  %v3376_v52 = vmul.f32 %v5283_v56, %v3375_v63  ;;  %v3349_v23 = vmul.f32 %v3333_v42, %v3324_v11  ;;  %v3455_v1 = vperm.slane %v6068_v62, 1  ;;  %v1478_v50 = vperm.slane %v5990_v33, 4 }
 0x314   :  { %v2937_v15 = vpop.f32.mrf.mxu3  ;;  %v3300_v13 = vmul.f32 %v3267_v16, %v5822_v21  ;;  %v3308_v9 = vmul.f32 %v6072_v25, %v6072_v25  ;;  %v3470_v22 = vadd.f32 %v3454_v19, %v3444_v17 }
 0x315   :  { %v3377_v5 = vmul.f32 0.5, %v3376_v52 }
 0x316   :  { %v3316_v57 = vsub.f32 %v3300_v13, %v3308_v9  ;;  %v3486_v0 = vmul.f32 0.2, %v3470_v22  ;;  %vm3478_vm0 = vcmp.gt.f32.partialorder %v3470_v22, 0.0 }
 0x317   :  { %3167 = vmatpush.bf16.msra.mxu1 %v4417_v41  ;;  %3179 = vmatpush.bf16.msra.mxu2 %v4705_v38  ;;  %v3378_v47 = vsub.f32 1.5, %v3377_v5 }
 0x318   :  { %v3358_v31 = vadd.f32 0.9, %v3316_v57  ;;  %v3494_v35 = vsel %vm3478_vm0, %v3470_v22, %v3486_v0  ;;  %v3456_v0 = vperm.slane %v6068_v62, 2 }
 0x319   :  { %v2961_v8 = vpop.f32.mrf.mxu1  ;;  %v3379_v27 = vmul.f32 %v5283_v56, %v3378_v47 }
 0x31a   :  { %3168 = vmatmul.bf16.vlgmr.msra.gmra.mxu1 %v5962_v48  ;;  %v1477_v48 = vperm.slane %v5990_v33, 3  ;;  %5284 = vrsqrt.f32 %v3358_v31  ;;  %vm3390_vm3 = vweird.f32 %v3358_v31 }
 0x31b   :  { %3180 = vmatpush.bf16.msra.mxu2 %v4673_v60  ;;  %v3383_v10 = vsel %vm3382_vm15, %v5283_v56, %v3379_v27  ;;  %v3334_v27 = vperm.slane %v6058_v44, 2 }
 0x31c   :  { %v2936_v24 = vadd.f32 %v2935_v46, %v1477_v48  ;;  %v3445_v26 = vmul.f32 %v3383_v10, %v3349_v23 }
 0x31e   :  { %3181 = vmatmul.bf16.vlgmr.msra.gmra.mxu2 %v5966_v4  ;;  %v3471_v4 = vadd.f32 %v3455_v1, %v3445_v26  ;;  %v2949_v28 = vadd.f32 %v2948_v55, %v2936_v24 }
 0x320   :  { %vm3479_vm1 = vcmp.gt.f32.partialorder %v3471_v4, 0.0  ;;  %v3487_v29 = vmul.f32 0.2, %v3471_v4  ;;  %v2962_v32 = vadd.f32 %v2961_v8, %v2949_v28  ;;  %v5285_v45 = vpop.eup %5284  ;;  %v3325_v8 = vsub.f32 %v6048_v20, %v6072_v25 }
 0x321   :  { %v2963_v30 = vpop.f32.mrf.mxu1  ;;  %v3385_v54 = vmul.f32 %v5285_v45, %v3358_v31  ;;  %vm3391_vm2 = vweird.f32 %v5285_v45  ;;  %v3335_v20 = vperm.slane %v6058_v44, 3 }
 0x322   :  { %v3495_v18 = vsel %vm3479_vm1, %v3471_v4, %v3487_v29  ;;  %vm3392_vm4 = vmor %vm3390_vm3, %vm3391_vm2  ;;  %v3350_v24 = vmul.f32 %v3334_v27, %v3325_v8 }
 0x323   :  { %v2974_v6 = vpop.f32.mrf.mxu2  ;;  %v3502_v7 = vpack.c.bf16 %v3495_v18, %v3494_v35  ;;  %v3386_v2 = vmul.f32 %v5285_v45, %v3385_v54 }
 0x324   :  { %v6085_v43 = vadd.f32 %v2974_v6, %v2962_v32 }
 0x325   :  { %3506 = vst [vmem:[%s6172_s15] sm:$0xff] %v3502_v7  ;;  %v3387_v5 = vmul.f32 0.5, %v3386_v2  ;;  %v3457_v7 = vperm.slane %v6068_v62, 3 }
 0x326   :  { %v3204_v14 = vrot.slane %v6085_v43, 4  ;;  %v3245_v34 = vmul.f32 %v6085_v43, %v6085_v43 }
 0x327   :  { %v3388_v19 = vsub.f32 1.5, %v3387_v5 }
 0x328   :  { %v3205_v40 = vadd.f32 %v3204_v14, %v6085_v43  ;;  %v3268_v55 = vrot.slane %v3245_v34, 4 }
 0x329   :  { %v3389_v42 = vmul.f32 %v5285_v45, %v3388_v19 }
 0x32a   :  { %v3206_v41 = vrot.slane %v3205_v40, 2  ;;  %v3269_v38 = vadd.f32 %v3268_v55, %v3245_v34  ;;  %v3000_v61 = vpop.f32.mrf.mxu0 }
 0x32b   :  { %v2976_v37 = vpop.f32.mrf.mxu2  ;;  %v3393_v1 = vsel %vm3392_vm4, %v5285_v45, %v3389_v42 }
 0x32c   :  { %v3207_v46 = vadd.f32 %v3206_v41, %v3205_v40  ;;  %v3270_v49 = vrot.slane %v3269_v38, 2  ;;  %v2987_v39 = vpop.f32.mrf.mxu3  ;;  %v3446_v4 = vmul.f32 %v3393_v1, %v3350_v24 }
 0x32d   :  { %v2988_v17 = vadd.f32 %v2987_v39, %v1478_v50 }
 0x32e   :  { %v3208_v51 = vrot.slane %v3207_v46, 1  ;;  %v3271_v53 = vadd.f32 %v3270_v49, %v3269_v38  ;;  %v3472_v34 = vadd.f32 %v3456_v0, %v3446_v4 }
 0x32f   :  { %v3001_v11 = vadd.f32 %v3000_v61, %v2988_v17 }
 0x330   :  { %v3209_v56 = vadd.f32 %v3208_v51, %v3207_v46  ;;  %v3272_v58 = vrot.slane %v3271_v53, 1  ;;  %v3488_v46 = vmul.f32 0.2, %v3472_v34  ;;  %vm3480_vm8 = vcmp.gt.f32.partialorder %v3472_v34, 0.0 }
 0x332   :  { %v3237_v59 = vmul.f32 %v3209_v56, %v5822_v21  ;;  %v3273_v60 = vadd.f32 %v3272_v58, %v3271_v53  ;;  %v3002_v63 = vpop.f32.mrf.mxu0  ;;  %v3496_v56 = vsel %vm3480_vm8, %v3472_v34, %v3488_v46 }
 0x334   :  { %v3301_v3 = vmul.f32 %v3273_v60, %v5822_v21  ;;  %v3309_v12 = vmul.f32 %v3237_v59, %v3237_v59  ;;  %v2989_v52 = vpop.f32.mrf.mxu3  ;;  %v3326_v28 = vsub.f32 %v6085_v43, %v3237_v59 }
 0x336   :  { %v3317_v36 = vsub.f32 %v3301_v3, %v3309_v12  ;;  %v3351_v40 = vmul.f32 %v3335_v20, %v3326_v28  ;;  %v1479_v3 = vperm.slane %v5990_v33, 5 }
 0x338   :  { %v3359_v15 = vadd.f32 0.9, %v3317_v36 }
 0x339   :  { %v3013_v16 = vpop.f32.mrf.mxu1 }
 0x33a   :  { %5286 = vrsqrt.f32 %v3359_v15  ;;  %v3014_v13 = vadd.f32 %v3013_v16, %v3001_v11  ;;  %vm3400_vm6 = vweird.f32 %v3359_v15 }
 0x340   :  { %v5287_v48 = vpop.eup %5286 }
 0x341   :  { %v3015_v47 = vpop.f32.mrf.mxu1  ;;  %v3395_v9 = vmul.f32 %v5287_v48, %v3359_v15  ;;  %vm3401_vm5 = vweird.f32 %v5287_v48 }
 0x342   :  { %vm3402_vm7 = vmor %vm3400_vm6, %vm3401_vm5 }
 0x343   :  { %v3026_v22 = vpop.f32.mrf.mxu2  ;;  %v3396_v10 = vmul.f32 %v5287_v48, %v3395_v9 }
 0x344   :  { %v6100_v23 = vadd.f32 %v3026_v22, %v3014_v13 }
 0x345   :  { %v3397_v25 = vmul.f32 0.5, %v3396_v10 }
 0x346   :  { %v3210_v26 = vrot.slane %v6100_v23, 4  ;;  %v3246_v57 = vmul.f32 %v6100_v23, %v6100_v23 }
 0x347   :  { %v3398_v31 = vsub.f32 1.5, %v3397_v25 }
 0x348   :  { %v3211_v29 = vadd.f32 %v3210_v26, %v6100_v23  ;;  %v3274_v30 = vrot.slane %v3246_v57, 4 }
 0x349   :  { %v3399_v6 = vmul.f32 %v5287_v48, %v3398_v31 }
 0x34a   :  { %v3212_v32 = vrot.slane %v3211_v29, 2  ;;  %v3275_v35 = vadd.f32 %v3274_v30, %v3246_v57  ;;  %v3052_v18 = vpop.f32.mrf.mxu0 }
 0x34b   :  { %v3028_v14 = vpop.f32.mrf.mxu2  ;;  %v3403_v43 = vsel %vm3402_vm7, %v5287_v48, %v3399_v6 }
 0x34c   :  { %v3213_v55 = vadd.f32 %v3212_v32, %v3211_v29  ;;  %v3276_v41 = vrot.slane %v3275_v35, 2  ;;  %v3039_v38 = vpop.f32.mrf.mxu3  ;;  %v3447_v61 = vmul.f32 %v3403_v43, %v3351_v40  ;;  %v1480_v14 = vperm.slane %v5990_v33, 6 }
 0x34d   :  { %v3040_v50 = vadd.f32 %v3039_v38, %v1479_v3 }
 0x34e   :  { %v3214_v37 = vrot.slane %v3213_v55, 1  ;;  %v3277_v45 = vadd.f32 %v3276_v41, %v3275_v35  ;;  %v3473_v49 = vadd.f32 %v3457_v7, %v3447_v61 }
 0x34f   :  { %v3053_v16 = vadd.f32 %v3052_v18, %v3040_v50 }
 0x350   :  { %v3215_v39 = vadd.f32 %v3214_v37, %v3213_v55  ;;  %v3278_v51 = vrot.slane %v3277_v45, 1  ;;  %vm3481_vm9 = vcmp.gt.f32.partialorder %v3473_v49, 0.0  ;;  %v3489_v53 = vmul.f32 0.2, %v3473_v49 }
 0x352   :  { %v3054_v54 = vpop.f32.mrf.mxu0  ;;  %v3497_v58 = vsel %vm3481_vm9, %v3473_v49, %v3489_v53  ;;  %v6111_v59 = vmul.f32 %v3215_v39, %v5822_v21  ;;  %v3279_v60 = vadd.f32 %v3278_v51, %v3277_v45  ;;  %v3336_v49 = vperm.slane %v6058_v44, 4 }
 0x353   :  { %v3503_v2 = vpack.c.bf16 %v3497_v58, %v3496_v56 }
 0x354   :  { %v3041_v63 = vpop.f32.mrf.mxu3  ;;  %v3302_v52 = vmul.f32 %v3279_v60, %v5822_v21  ;;  %v3310_v36 = vmul.f32 %v6111_v59, %v6111_v59  ;;  %v3327_v46 = vsub.f32 %v6100_v23, %v6111_v59  ;;  %v3337_v23 = vperm.slane %v6058_v44, 5 }
 0x355   :  { %3507 = vst [vmem:[%s6172_s15 + $0x8] sm:$0xff] %v3503_v2  ;;  %v3458_v2 = vperm.slane %v6068_v62, 4 }
 0x356   :  { %v3318_v5 = vsub.f32 %v3302_v52, %v3310_v36  ;;  %v3352_v58 = vmul.f32 %v3336_v49, %v3327_v46 }
 0x358   :  { %v3360_v17 = vadd.f32 0.9, %v3318_v5 }
 0x359   :  { %v3065_v12 = vpop.f32.mrf.mxu1 }
 0x35a   :  { %v3066_v19 = vadd.f32 %v3065_v12, %v3053_v16  ;;  %5288 = vrsqrt.f32 %v3360_v17  ;;  %vm3410_vm11 = vweird.f32 %v3360_v17 }
 0x360   :  { %v5289_v10 = vpop.eup %5288 }
 0x361   :  { %v3067_v15 = vpop.f32.mrf.mxu1  ;;  %v3405_v25 = vmul.f32 %v5289_v10, %v3360_v17  ;;  %vm3411_vm10 = vweird.f32 %v5289_v10 }
 0x362   :  { %vm3412_vm12 = vmor %vm3410_vm11, %vm3411_vm10 }
 0x363   :  { %v3078_v11 = vpop.f32.mrf.mxu2  ;;  %v3406_v32 = vmul.f32 %v5289_v10, %v3405_v25 }
 0x364   :  { %v6120_v42 = vadd.f32 %v3078_v11, %v3066_v19  ;;  %v3459_v19 = vperm.slane %v6068_v62, 5 }
 0x365   :  { %v3407_v34 = vmul.f32 0.5, %v3406_v32  ;;  %v5296_v32 = vld [vmem:[#allocation19] sm:$0xff] }
 0x366   :  { %v3216_v47 = vrot.slane %v6120_v42, 4  ;;  %v3247_v48 = vmul.f32 %v6120_v42, %v6120_v42 }
 0x367   :  { %v3408_v38 = vsub.f32 1.5, %v3407_v34 }
 0x368   :  { %v3217_v8 = vadd.f32 %v3216_v47, %v6120_v42  ;;  %v3280_v27 = vrot.slane %v3247_v48, 4 }
 0x369   :  { %v3409_v61 = vmul.f32 %v5289_v10, %v3408_v38 }
 0x36a   :  { %v3218_v13 = vrot.slane %v3217_v8, 2  ;;  %v3281_v9 = vadd.f32 %v3280_v27, %v3247_v48  ;;  %v3104_v22 = vpop.f32.mrf.mxu0 }
 0x36b   :  { %v3080_v1 = vpop.f32.mrf.mxu2  ;;  %v3413_v54 = vsel %vm3412_vm12, %v5289_v10, %v3409_v61 }
 0x36c   :  { %v3219_v24 = vadd.f32 %v3218_v13, %v3217_v8  ;;  %v3282_v26 = vrot.slane %v3281_v9, 2  ;;  %v3091_v57 = vpop.f32.mrf.mxu3  ;;  %v3448_v3 = vmul.f32 %v3413_v54, %v3352_v58 }
 0x36d   :  { %v3092_v41 = vadd.f32 %v3091_v57, %v1480_v14 }
 0x36e   :  { %v3220_v0 = vrot.slane %v3219_v24, 1  ;;  %v3283_v20 = vadd.f32 %v3282_v26, %v3281_v9  ;;  %v3474_v47 = vadd.f32 %v3458_v2, %v3448_v3 }
 0x36f   :  { %v3105_v43 = vadd.f32 %v3104_v22, %v3092_v41 }
 0x370   :  { %v3221_v4 = vadd.f32 %v3220_v0, %v3219_v24  ;;  %v3284_v28 = vrot.slane %v3283_v20, 1  ;;  %v3490_v10 = vmul.f32 0.2, %v3474_v47  ;;  %vm3482_vm0 = vcmp.gt.f32.partialorder %v3474_v47, 0.0 }
 0x372   :  { %v3239_v29 = vmul.f32 %v3221_v4, %v5822_v21  ;;  %v3285_v30 = vadd.f32 %v3284_v28, %v3283_v20  ;;  %v3106_v31 = vpop.f32.mrf.mxu0  ;;  %v3498_v25 = vsel %vm3482_vm0, %v3474_v47, %v3490_v10  ;;  %v3339_v10 = vperm.slane %v6058_v44, 7 }
 0x374   :  { %v3303_v35 = vmul.f32 %v3285_v30, %v5822_v21  ;;  %v3311_v18 = vmul.f32 %v3239_v29, %v3239_v29  ;;  %v3093_v6 = vpop.f32.mrf.mxu3  ;;  %v3328_v12 = vsub.f32 %v6120_v42, %v3239_v29 }
 0x376   :  { %v3319_v7 = vsub.f32 %v3303_v35, %v3311_v18  ;;  %v3353_v48 = vmul.f32 %v3337_v23, %v3328_v12  ;;  %v1481_v35 = vperm.slane %v5296_v32, 7 }
 0x378   :  { %v3361_v55 = vadd.f32 0.9, %v3319_v7 }
 0x379   :  { %v3117_v40 = vpop.f32.mrf.mxu1 }
 0x37a   :  { %5290 = vrsqrt.f32 %v3361_v55  ;;  %v3118_v39 = vadd.f32 %v3117_v40, %v3105_v43  ;;  %vm3420_vm14 = vweird.f32 %v3361_v55 }
 0x380   :  { %v5291_v45 = vpop.eup %5290 }
 0x381   :  { %v3119_v37 = vpop.f32.mrf.mxu1  ;;  %v3415_v51 = vmul.f32 %v5291_v45, %v3361_v55  ;;  %vm3421_vm13 = vweird.f32 %v5291_v45 }
 0x382   :  { %vm3422_vm15 = vmor %vm3420_vm14, %vm3421_vm13 }
 0x383   :  { %v3130_v33 = vpop.f32.mrf.mxu2  ;;  %v3416_v56 = vmul.f32 %v5291_v45, %v3415_v51 }
 0x384   :  { %v6132_v53 = vadd.f32 %v3130_v33, %v3118_v39 }
 0x385   :  { %v3417_v59 = vmul.f32 0.5, %v3416_v56 }
 0x386   :  { %v3222_v60 = vrot.slane %v6132_v53, 4  ;;  %v3248_v63 = vmul.f32 %v6132_v53, %v6132_v53 }
 0x387   :  { %v3418_v50 = vsub.f32 1.5, %v3417_v59 }
 0x388   :  { %v3223_v52 = vadd.f32 %v3222_v60, %v6132_v53  ;;  %v3286_v36 = vrot.slane %v3248_v63, 4 }
 0x389   :  { %v3419_v17 = vmul.f32 %v5291_v45, %v3418_v50 }
 0x38a   :  { %v3224_v5 = vrot.slane %v3223_v52, 2  ;;  %v3287_v16 = vadd.f32 %v3286_v36, %v3248_v63  ;;  %v3156_v15 = vpop.f32.mrf.mxu0 }
 0x38b   :  { %v3132_v11 = vpop.f32.mrf.mxu2  ;;  %v3423_v42 = vsel %vm3422_vm15, %v5291_v45, %v3419_v17 }
 0x38c   :  { %v3225_v8 = vadd.f32 %v3224_v5, %v3223_v52  ;;  %v3288_v27 = vrot.slane %v3287_v16, 2  ;;  %v3143_v13 = vpop.f32.mrf.mxu3  ;;  %v3449_v9 = vmul.f32 %v3423_v42, %v3353_v48  ;;  %v3338_v48 = vperm.slane %v6058_v44, 6 }
 0x38d   :  { %v3144_v14 = vadd.f32 %v3143_v13, %v1481_v35 }
 0x38e   :  { %v3226_v22 = vrot.slane %v3225_v8, 1  ;;  %v3289_v1 = vadd.f32 %v3288_v27, %v3287_v16  ;;  %v3475_v24 = vadd.f32 %v3459_v19, %v3449_v9 }
 0x38f   :  { %v3157_v40 = vadd.f32 %v3156_v15, %v3144_v14 }
 0x390   :  { %v3227_v26 = vadd.f32 %v3226_v22, %v3225_v8  ;;  %v3290_v57 = vrot.slane %v3289_v1, 1  ;;  %vm3483_vm1 = vcmp.gt.f32.partialorder %v3475_v24, 0.0  ;;  %v3491_v0 = vmul.f32 0.2, %v3475_v24 }
 0x391   :  { %v3460_v22 = vperm.slane %v6068_v62, 6 }
 0x392   :  { %v3158_v20 = vpop.f32.mrf.mxu0  ;;  %v3499_v4 = vsel %vm3483_vm1, %v3475_v24, %v3491_v0  ;;  %v3240_v28 = vmul.f32 %v3227_v26, %v5822_v21  ;;  %v3291_v29 = vadd.f32 %v3290_v57, %v3289_v1  ;;  %v3461_v0 = vperm.slane %v6068_v62, 7 }
 0x393   :  { %v3504_v31 = vpack.c.bf16 %v3499_v4, %v3498_v25 }
 0x394   :  { %v3145_v30 = vpop.f32.mrf.mxu3  ;;  %v3304_v6 = vmul.f32 %v3291_v29, %v5822_v21  ;;  %v3312_v7 = vmul.f32 %v3240_v28, %v3240_v28  ;;  %v3329_v47 = vsub.f32 %v6132_v53, %v3240_v28 }
 0x395   :  { %3508 = vst [vmem:[%s6172_s15 + $0x10] sm:$0xff] %v3504_v31 }
 0x396   :  { %v3320_v34 = vsub.f32 %v3304_v6, %v3312_v7  ;;  %v3354_v42 = vmul.f32 %v3338_v48, %v3329_v47 }
 0x397   :  { %v3169_v18 = vpop.f32.mrf.mxu1 }
 0x398   :  { %v3362_v41 = vadd.f32 0.9, %v3320_v34  ;;  %v3170_v38 = vadd.f32 %v3169_v18, %v3157_v40 }
 0x39a   :  { %5292 = vrsqrt.f32 %v3362_v41  ;;  %vm3430_vm3 = vweird.f32 %v3362_v41 }
 0x39f   :  { %v3171_v55 = vpop.f32.mrf.mxu1 }
 0x3a0   :  { %v5293_v54 = vpop.eup %5292 }
 0x3a1   :  { %v3182_v43 = vpop.f32.mrf.mxu2  ;;  %v3425_v2 = vmul.f32 %v5293_v54, %v3362_v41  ;;  %vm3431_vm2 = vweird.f32 %v5293_v54 }
 0x3a2   :  { %v3183_v61 = vadd.f32 %v3182_v43, %v3170_v38  ;;  %vm3432_vm4 = vmor %vm3430_vm3, %vm3431_vm2 }
 0x3a3   :  { %v3426_v52 = vmul.f32 %v5293_v54, %v3425_v2 }
 0x3a4   :  { %v3228_v37 = vrot.slane %v3183_v61, 4  ;;  %v3249_v45 = vmul.f32 %v3183_v61, %v3183_v61 }
 0x3a5   :  { %v3427_v16 = vmul.f32 0.5, %v3426_v52 }
 0x3a6   :  { %v3229_v46 = vadd.f32 %v3228_v37, %v3183_v61  ;;  %v3292_v49 = vrot.slane %v3249_v45, 4 }
 0x3a7   :  { %v3428_v17 = vsub.f32 1.5, %v3427_v16 }
 0x3a8   :  { %v3230_v39 = vrot.slane %v3229_v46, 2  ;;  %v3293_v51 = vadd.f32 %v3292_v49, %v3249_v45 }
 0x3a9   :  { %v3184_v33 = vpop.f32.mrf.mxu2  ;;  %v3429_v19 = vmul.f32 %v5293_v54, %v3428_v17 }
 0x3aa   :  { %v3231_v56 = vadd.f32 %v3230_v39, %v3229_v46  ;;  %v3294_v58 = vrot.slane %v3293_v51, 2 }
 0x3ab   :  { %v3433_v27 = vsel %vm3432_vm4, %v5293_v54, %v3429_v19 }
 0x3ac   :  { %v3232_v60 = vrot.slane %v3231_v56, 1  ;;  %v3295_v63 = vadd.f32 %v3294_v58, %v3293_v51  ;;  %v3450_v9 = vmul.f32 %v3433_v27, %v3354_v42 }
 0x3ae   :  { %v3233_v23 = vadd.f32 %v3232_v60, %v3231_v56  ;;  %v3296_v59 = vrot.slane %v3295_v63, 1  ;;  %v3476_v53 = vadd.f32 %v3460_v22, %v3450_v9 }
 0x3b0   :  { %v3241_v3 = vmul.f32 %v3233_v23, %v5822_v21  ;;  %v3297_v12 = vadd.f32 %v3296_v59, %v3295_v63  ;;  %v3492_v4 = vmul.f32 0.2, %v3476_v53  ;;  %vm3484_vm8 = vcmp.gt.f32.partialorder %v3476_v53, 0.0 }
 0x3b2   :  { %v3305_v36 = vmul.f32 %v3297_v12, %v5822_v21  ;;  %v3313_v50 = vmul.f32 %v3241_v3, %v3241_v3  ;;  %v3330_v1 = vsub.f32 %v3183_v61, %v3241_v3  ;;  %v3500_v30 = vsel %vm3484_vm8, %v3476_v53, %v3492_v4 }
 0x3b4   :  { %v3321_v5 = vsub.f32 %v3305_v36, %v3313_v50  ;;  %v3355_v57 = vmul.f32 %v3339_v10, %v3330_v1 }
 0x3b6   :  { %v3363_v15 = vadd.f32 0.9, %v3321_v5 }
 0x3b8   :  { %5294 = vrsqrt.f32 %v3363_v15  ;;  %vm3440_vm6 = vweird.f32 %v3363_v15 }
 0x3be   :  { %v5295_v11 = vpop.eup %5294 }
 0x3bf   :  { %v3435_v8 = vmul.f32 %v5295_v11, %v3363_v15  ;;  %vm3441_vm5 = vweird.f32 %v5295_v11 }
 0x3c0   :  { %vm3442_vm7 = vmor %vm3440_vm6, %vm3441_vm5 }
 0x3c1   :  { %v3436_v13 = vmul.f32 %v5295_v11, %v3435_v8 }
 0x3c3   :  { %v3437_v21 = vmul.f32 0.5, %v3436_v13 }
 0x3c5   :  { %v3438_v24 = vsub.f32 1.5, %v3437_v21 }
 0x3c7   :  { %v3439_v26 = vmul.f32 %v5295_v11, %v3438_v24 }
 0x3c9   :  { %v3443_v20 = vsel %vm3442_vm7, %v5295_v11, %v3439_v26 }
 0x3ca   :  { %v3451_v25 = vmul.f32 %v3443_v20, %v3355_v57 }
 0x3cc   :  { %v3477_v28 = vadd.f32 %v3461_v0, %v3451_v25 }
 0x3ce   :  { %vm3485_vm9 = vcmp.gt.f32.partialorder %v3477_v28, 0.0  ;;  %v3493_v29 = vmul.f32 0.2, %v3477_v28 }
 0x3d0   :  { %v3501_v31 = vsel %vm3485_vm9, %v3477_v28, %v3493_v29 }
 0x3d1   :  { %v3505_v32 = vpack.c.bf16 %v3501_v31, %v3500_v30 }
 0x3d3   :  { %3509 = vst [vmem:[%s6172_s15 + $0x18] sm:$0xff] %v3505_v32 }
 0x3d4   :  { %3514 = vsyncpa [#allocation3], 1 }
 0x3d5   :  { %3515 = vsyncpa [#allocation5], 1 }
 0x3d6   :  { %3516 = vsyncpa [#allocation8], 1 }
 0x3d7   :  { %3517 = vsyncpa [#allocation11], 1 }
 0x3d8   :  { %3518 = vsyncpa [#allocation14], 1 }
 0x3d9   :  { %3519 = vsyncpa [#allocation17], 1 }
 0x3da   :  { %3520 = vsyncpa [#allocation20], 1 }
 0x3db   :  { %3521 = vsyncpa [#allocation23], 1 }

</bundles_post_ra>
